<compile_context>
chip_gen: v7x
topology: tpu7x:2x2x1
jax: 0.10.0
libtpu: 0.0.40
codegen_flags: <defaults>
</compile_context>

<pallas_src>
import functools

import jax
import jax.numpy as jnp
from jax.experimental import pallas as pl
from jax.experimental.pallas import tpu as pltpu

_HIGHEST = jax.lax.Precision.HIGHEST


def _round_up(x, m):
    return ((x + m - 1) // m) * m


def _choose_block_b(B, S, FP, vmem_budget_bytes=48 << 20):
    """Largest divisor of B whose per-step working set fits the VMEM budget.

    Divisors that would leave a non-8-multiple sublane block on the output are
    skipped unless they cover the whole batch (the (8,128) BlockSpec rule)."""
    valid = [d for d in range(1, B + 1) if B % d == 0 and (d == B or d % 8 == 0)]

    def est(d):
        rows = 2 * d
        return 4 * (2 * rows * S * FP        # double-buffered feature tiles
                    + rows * S * 3 * FP      # fused QKV activations
                    + 2 * rows * S * S       # score tiles
                    + 8 * rows * FP          # ctx / residual / LN temporaries
                    + FP * 3 * FP + 5 * FP)  # packed params

    best = valid[0]
    for d in valid:
        if est(d) <= vmem_budget_bytes:
            best = max(best, d)
    return best


def _dual_attention_kernel(feats_ref, wqkv_ref, bqkv_ref, ln_ref, out_ref, *,
                           feature_dim):
    B2, S, FP = feats_ref.shape      # B2 = 2*block_b: stream-1 rows, then stream-2
    Bb = B2 // 2
    inv_f = 1.0 / float(feature_dim)
    inv_s = 1.0 / float(S)

    feats = feats_ref[...]                                            # (2Bb, S, FP)

    # One fused projection matmul for both streams and all of Q/K/V:
    # (2Bb*S, FP) x (FP, 3FP).  Zero-padded lanes stay zero through the ReLU.
    x2d = feats.reshape(B2 * S, FP)
    qkv = jnp.dot(x2d, wqkv_ref[...], precision=_HIGHEST,
                  preferred_element_type=jnp.float32) + bqkv_ref[...]
    qkv = jnp.maximum(qkv, 0.0).reshape(B2, S, 3 * FP)                # ReLU

    # 128-lane-aligned (vreg boundary) segment slices -> no masked lane extracts.
    q = qkv[:, :, 0:FP]
    k = qkv[:, :, FP:2 * FP]
    v = qkv[:, :, 2 * FP:3 * FP]

    # Contiguous batch-axis halves (major dim, nearly free) -> no swap copy.
    q1, q2 = q[:Bb], q[Bb:]
    k1, k2 = k[:Bb], k[Bb:]
    v1, v2 = v[:Bb], v[Bb:]
    f1, f2 = feats[:Bb], feats[Bb:]

    # scores_i = tanh(K_i @ Q_other^T): contract the last dims directly (trans-B).
    dn = (((2,), (2,)), ((0,), (0,)))
    s1 = jnp.tanh(jax.lax.dot_general(k1, q2, dn, precision=_HIGHEST,
                                      preferred_element_type=jnp.float32))
    s2 = jnp.tanh(jax.lax.dot_general(k2, q1, dn, precision=_HIGHEST,
                                      preferred_element_type=jnp.float32))

    gamma = ln_ref[0:1, :]
    beta = ln_ref[1:2, :]
    if FP != feature_dim:  # LayerNorm stats must only cover the real F lanes
        lane = jax.lax.broadcasted_iota(jnp.int32, (1, FP), 1)
        fmask = (lane < feature_dim).astype(jnp.float32)
    else:
        fmask = None

    def pool_and_norm(scores, vv, ff):
        # TODO(synk): attention_mask branch and nn.Dropout(p=0.2) on the
        # attention weights are omitted (forward default mask=None, eval mode).
        logits = jnp.sum(scores, axis=2)                              # (Bb, S)
        m = jnp.max(logits, axis=1, keepdims=True)
        e = jnp.exp(logits - m)
        w = e / jnp.sum(e, axis=1, keepdims=True)                     # exact softmax
        # Pooled context via a tiny batched MXU matmul: (Bb,1,S) x (Bb,S,FP).
        ctx = jax.lax.dot_general(
            w.reshape(Bb, 1, S), vv, (((2,), (1,)), ((0,), (0,))),
            precision=_HIGHEST,
            preferred_element_type=jnp.float32).reshape(Bb, FP)
        # Residual mean over the sequence + LayerNorm over the real F lanes.
        x = jnp.sum(ff, axis=1) * inv_s + ctx                         # padded lanes stay 0
        mu = jnp.sum(x, axis=1, keepdims=True) * inv_f
        xc = x - mu
        if fmask is not None:
            xc = xc * fmask                                           # zero padded lanes
        var = jnp.sum(xc * xc, axis=1, keepdims=True) * inv_f
        return gamma * xc * jax.lax.rsqrt(var + 1e-5) + beta

    # Two lane-dense (block_b, FP) stores; no lane concat.
    out_ref[0] = pool_and_norm(s1, v1, f1)    # context_vector_1 rows
    out_ref[1] = pool_and_norm(s2, v2, f2)    # context_vector_2 rows


def dual_attention_pallas(features_1, features_2, params, block_b=None):
    B, S, F = features_1.shape
    FP = _round_up(F, 128)
    pad = FP - F

    if block_b is None:
        block_b = _choose_block_b(B, S, FP)
    assert B % block_b == 0, "block_b must divide the batch size"
    num_blocks = B // block_b

    # Stack the two streams per block in the wrapper (one-time HBM op) and pad
    # the feature dim to FP lanes -> the kernel reads one lane-aligned slab.
    feats = jnp.stack([features_1.reshape(num_blocks, block_b, S, F),
                       features_2.reshape(num_blocks, block_b, S, F)],
                      axis=1).reshape(num_blocks * 2 * block_b, S, F)
    if pad:
        feats = jnp.pad(feats, ((0, 0), (0, 0), (0, pad)))

    # Fused QKV weights/bias: each projection owns a 128-lane-aligned, zero
    # padded segment so in-kernel Q/K/V slices land on vreg boundaries.
    def wseg(w):
        return jnp.pad(w, ((0, pad), (0, pad)))

    def vseg(b):
        return jnp.pad(b, ((0, pad),))

    w_qkv = jnp.concatenate(
        [wseg(params["wq"]), wseg(params["wk"]), wseg(params["wv"])], axis=1)  # (FP, 3FP)
    b_qkv = jnp.concatenate(
        [vseg(params["bq"]), vseg(params["bk"]), vseg(params["bv"])]).reshape(1, 3 * FP)
    ln = jnp.stack([vseg(params["gamma"]), vseg(params["beta"])], axis=0)      # (2, FP)

    kernel = functools.partial(_dual_attention_kernel, feature_dim=F)
    out = pl.pallas_call(
        kernel,
        out_shape=jax.ShapeDtypeStruct((2, B, FP), jnp.float32),
        grid_spec=pltpu.PrefetchScalarGridSpec(
            num_scalar_prefetch=0,
            grid=(num_blocks,),
            in_specs=[pl.BlockSpec((2 * block_b, S, FP), lambda b: (b, 0, 0)),
                      pl.BlockSpec((FP, 3 * FP), lambda b: (0, 0)),
                      pl.BlockSpec((1, 3 * FP), lambda b: (0, 0)),
                      pl.BlockSpec((2, FP), lambda b: (0, 0))],
            out_specs=pl.BlockSpec((2, block_b, FP), lambda b: (0, b, 0)),
        ),
        compiler_params=pltpu.CompilerParams(
            dimension_semantics=("parallel",),
            vmem_limit_bytes=64 << 20),
    )(feats, w_qkv, b_qkv, ln)

    # Lane-dense kernel output -> split streams / drop lane padding wrapper-side.
    return out[0, :, :F], out[1, :, :F]


def dual_attention_ref(features_1, features_2, params):
    """Pure-JAX reference mirroring the PyTorch forward (eval mode, mask=None)."""

    def proj(x, w, b):
        return jax.nn.relu(jnp.dot(x, w, precision=_HIGHEST) + b)

    q1 = proj(features_1, params["wq"], params["bq"])
    k1 = proj(features_1, params["wk"], params["bk"])
    v1 = proj(features_1, params["wv"], params["bv"])
    q2 = proj(features_2, params["wq"], params["bq"])
    k2 = proj(features_2, params["wk"], params["bk"])
    v2 = proj(features_2, params["wv"], params["bv"])

    s1 = jnp.tanh(jnp.einsum("bsf,btf->bst", k1, q2, precision=_HIGHEST))
    s2 = jnp.tanh(jnp.einsum("bsf,btf->bst", k2, q1, precision=_HIGHEST))
    w1 = jax.nn.softmax(jnp.sum(s1, axis=2), axis=1)
    w2 = jax.nn.softmax(jnp.sum(s2, axis=2), axis=1)
    c1 = jnp.einsum("bs,bsf->bf", w1, v1, precision=_HIGHEST)
    c2 = jnp.einsum("bs,bsf->bf", w2, v2, precision=_HIGHEST)

    def layer_norm(x):
        mu = jnp.mean(x, axis=-1, keepdims=True)
        var = jnp.mean(jnp.square(x - mu), axis=-1, keepdims=True)
        return params["gamma"] * (x - mu) / jnp.sqrt(var + 1e-5) + params["beta"]

    o1 = layer_norm(jnp.mean(features_1, axis=1) + c1)
    o2 = layer_norm(jnp.mean(features_2, axis=1) + c2)
    return o1, o2


if __name__ == "__main__":
    B, S, F = 4, 8, 32      # batch, seq, feature_dim (num_heads=4 -> head_dim=8)
    key = jax.random.PRNGKey(0)
    ks = jax.random.split(key, 10)

    features_1 = jax.random.normal(ks[0], (B, S, F), dtype=jnp.float32)
    features_2 = jax.random.normal(ks[1], (B, S, F), dtype=jnp.float32)

    scale = 1.0 / jnp.sqrt(jnp.float32(F))
    params = {
        "wq": jax.random.normal(ks[2], (F, F), dtype=jnp.float32) * scale,
        "bq": jax.random.normal(ks[3], (F,), dtype=jnp.float32) * 0.1,
        "wk": jax.random.normal(ks[4], (F, F), dtype=jnp.float32) * scale,
        "bk": jax.random.normal(ks[5], (F,), dtype=jnp.float32) * 0.1,
        "wv": jax.random.normal(ks[6], (F, F), dtype=jnp.float32) * scale,
        "bv": jax.random.normal(ks[7], (F,), dtype=jnp.float32) * 0.1,
        "gamma": jnp.ones((F,), dtype=jnp.float32)
                 + 0.1 * jax.random.normal(ks[8], (F,), dtype=jnp.float32),
        "beta": 0.1 * jax.random.normal(ks[9], (F,), dtype=jnp.float32),
    }

    o1, o2 = dual_attention_pallas(features_1, features_2, params)
    jax.block_until_ready((o1, o2))

    r1, r2 = dual_attention_ref(features_1, features_2, params)
    # Exact softmax divide + HIGHEST-precision matmuls on both sides: the only
    # residual differences are kernel-vs-XLA transcendental (tanh/exp/rsqrt)
    # rounding, well under this tolerance.
    assert jnp.allclose(o1, r1, atol=5e-4, rtol=5e-4), "mismatch in context_vector_1"
    assert jnp.allclose(o2, r2, atol=5e-4, rtol=5e-4), "mismatch in context_vector_2"

    print("KERNEL_OK")
</pallas_src>

<mosaic_0001>
module attributes {stable_mosaic.version = 11 : i64} {
  func.func @_dual_attention_kernel(%arg0: i32, %arg1: memref<8x8x128xf32, #tpu.memory_space<vmem>>, %arg2: memref<128x384xf32, #tpu.memory_space<vmem>>, %arg3: memref<1x384xf32, #tpu.memory_space<vmem>>, %arg4: memref<2x128xf32, #tpu.memory_space<vmem>>, %arg5: memref<2x4x128xf32, #tpu.memory_space<vmem>>) attributes {dimension_semantics = [#tpu.dimension_semantics<parallel>], iteration_bounds = array<i64: 1>, scalar_prefetch = 0 : i64, scratch_operands = 0 : i64, tpu.core_type = #tpu.core_type<tc>, window_params = [{transform_indices = @transform_0, window_bounds = array<i64: 8, 8, 128>}, {pipeline_mode = #tpu.pipeline_mode<synchronous>, transform_indices = @transform_1, window_bounds = array<i64: 128, 384>}, {pipeline_mode = #tpu.pipeline_mode<synchronous>, transform_indices = @transform_2, window_bounds = array<i64: 1, 384>}, {pipeline_mode = #tpu.pipeline_mode<synchronous>, transform_indices = @transform_3, window_bounds = array<i64: 2, 128>}, {transform_indices = @transform_4, window_bounds = array<i64: 2, 4, 128>}]} {
    %c0 = arith.constant 0 : index
    %c0_0 = arith.constant 0 : index
    %c0_1 = arith.constant 0 : index
    %0 = vector.load %arg1[%c0, %c0_0, %c0_1] : memref<8x8x128xf32, #tpu.memory_space<vmem>>, vector<8x8x128xf32>
    %1 = vector.shape_cast %0 : vector<8x8x128xf32> to vector<64x128xf32>
    %c0_2 = arith.constant 0 : index
    %c0_3 = arith.constant 0 : index
    %2 = vector.load %arg2[%c0_2, %c0_3] : memref<128x384xf32, #tpu.memory_space<vmem>>, vector<128x384xf32>
    %cst = arith.constant dense<0.000000e+00> : vector<64x384xf32>
    %3 = tpu.matmul %1, %2, %cst {dimension_numbers = #tpu.dot_dimension_numbers<[1], [0], [0], [1], [0, 0, 1, 1], [], []>, precision = #tpu.contract_precision<fp32>} : vector<64x128xf32>, vector<128x384xf32>, vector<64x384xf32> -> vector<64x384xf32>
    %c0_4 = arith.constant 0 : index
    %c0_5 = arith.constant 0 : index
    %4 = vector.load %arg3[%c0_4, %c0_5] : memref<1x384xf32, #tpu.memory_space<vmem>>, vector<1x384xf32>
    %5 = vector.broadcast %4 : vector<1x384xf32> to vector<64x384xf32>
    %6 = arith.addf %3, %5 : vector<64x384xf32>
    %cst_6 = arith.constant 0.000000e+00 : f32
    %7 = vector.broadcast %cst_6 : f32 to vector<64x384xf32>
    %8 = arith.maximumf %6, %7 : vector<64x384xf32>
    %9 = vector.shape_cast %8 : vector<64x384xf32> to vector<8x8x384xf32>
    %10 = vector.extract_strided_slice %9 {offsets = [0, 0, 0], sizes = [8, 8, 128], strides = [1, 1, 1]} : vector<8x8x384xf32> to vector<8x8x128xf32>
    %11 = vector.extract_strided_slice %9 {offsets = [0, 0, 128], sizes = [8, 8, 128], strides = [1, 1, 1]} : vector<8x8x384xf32> to vector<8x8x128xf32>
    %12 = vector.extract_strided_slice %9 {offsets = [0, 0, 256], sizes = [8, 8, 128], strides = [1, 1, 1]} : vector<8x8x384xf32> to vector<8x8x128xf32>
    %13 = vector.extract_strided_slice %10 {offsets = [0, 0, 0], sizes = [4, 8, 128], strides = [1, 1, 1]} : vector<8x8x128xf32> to vector<4x8x128xf32>
    %14 = vector.extract_strided_slice %10 {offsets = [4, 0, 0], sizes = [4, 8, 128], strides = [1, 1, 1]} : vector<8x8x128xf32> to vector<4x8x128xf32>
    %15 = vector.extract_strided_slice %11 {offsets = [0, 0, 0], sizes = [4, 8, 128], strides = [1, 1, 1]} : vector<8x8x128xf32> to vector<4x8x128xf32>
    %16 = vector.extract_strided_slice %11 {offsets = [4, 0, 0], sizes = [4, 8, 128], strides = [1, 1, 1]} : vector<8x8x128xf32> to vector<4x8x128xf32>
    %17 = vector.extract_strided_slice %12 {offsets = [0, 0, 0], sizes = [4, 8, 128], strides = [1, 1, 1]} : vector<8x8x128xf32> to vector<4x8x128xf32>
    %18 = vector.extract_strided_slice %12 {offsets = [4, 0, 0], sizes = [4, 8, 128], strides = [1, 1, 1]} : vector<8x8x128xf32> to vector<4x8x128xf32>
    %19 = vector.extract_strided_slice %0 {offsets = [0, 0, 0], sizes = [4, 8, 128], strides = [1, 1, 1]} : vector<8x8x128xf32> to vector<4x8x128xf32>
    %20 = vector.extract_strided_slice %0 {offsets = [4, 0, 0], sizes = [4, 8, 128], strides = [1, 1, 1]} : vector<8x8x128xf32> to vector<4x8x128xf32>
    %cst_7 = arith.constant dense<0.000000e+00> : vector<4x8x8xf32>
    %21 = tpu.matmul %15, %14, %cst_7 {dimension_numbers = #tpu.dot_dimension_numbers<[2], [2], [1], [1], [0, 0, 0, 1, 1, 1], [0], [0]>, precision = #tpu.contract_precision<fp32>} : vector<4x8x128xf32>, vector<4x8x128xf32>, vector<4x8x8xf32> -> vector<4x8x8xf32>
    %22 = math.tanh %21 : vector<4x8x8xf32>
    %cst_8 = arith.constant dense<0.000000e+00> : vector<4x8x8xf32>
    %23 = tpu.matmul %16, %13, %cst_8 {dimension_numbers = #tpu.dot_dimension_numbers<[2], [2], [1], [1], [0, 0, 0, 1, 1, 1], [0], [0]>, precision = #tpu.contract_precision<fp32>} : vector<4x8x128xf32>, vector<4x8x128xf32>, vector<4x8x8xf32> -> vector<4x8x8xf32>
    %24 = math.tanh %23 : vector<4x8x8xf32>
    %c0_9 = arith.constant 0 : index
    %c0_10 = arith.constant 0 : index
    %25 = vector.load %arg4[%c0_9, %c0_10] : memref<2x128xf32, #tpu.memory_space<vmem>>, vector<1x128xf32>
    %c1 = arith.constant 1 : index
    %c0_11 = arith.constant 0 : index
    %26 = vector.load %arg4[%c1, %c0_11] : memref<2x128xf32, #tpu.memory_space<vmem>>, vector<1x128xf32>
    %27 = tpu.iota {dimensions = array<i32: 1>} : vector<1x128xi32>
    %c32_i32 = arith.constant 32 : i32
    %28 = vector.broadcast %c32_i32 : i32 to vector<1x128xi32>
    %29 = arith.cmpi slt, %27, %28 : vector<1x128xi32>
    %30 = arith.extui %29 : vector<1x128xi1> to vector<1x128xi32>
    %31 = arith.sitofp %30 : vector<1x128xi32> to vector<1x128xf32>
    %cst_12 = arith.constant dense<0.000000e+00> : vector<4x8xf32>
    %32 = vector.multi_reduction <add>, %22, %cst_12 [2] : vector<4x8x8xf32> to vector<4x8xf32>
    %cst_13 = arith.constant dense<0xFF800000> : vector<4xf32>
    %33 = vector.multi_reduction <maximumf>, %32, %cst_13 [1] : vector<4x8xf32> to vector<4xf32>
    %34 = vector.shape_cast %33 : vector<4xf32> to vector<4x1xf32>
    %35 = vector.broadcast %34 : vector<4x1xf32> to vector<4x8xf32>
    %36 = arith.subf %32, %35 : vector<4x8xf32>
    %37 = math.exp %36 : vector<4x8xf32>
    %cst_14 = arith.constant dense<0.000000e+00> : vector<4xf32>
    %38 = vector.multi_reduction <add>, %37, %cst_14 [1] : vector<4x8xf32> to vector<4xf32>
    %39 = vector.shape_cast %38 : vector<4xf32> to vector<4x1xf32>
    %40 = vector.broadcast %39 : vector<4x1xf32> to vector<4x8xf32>
    %41 = arith.divf %37, %40 : vector<4x8xf32>
    %42 = vector.shape_cast %41 : vector<4x8xf32> to vector<4x1x8xf32>
    %cst_15 = arith.constant dense<0.000000e+00> : vector<4x1x128xf32>
    %43 = tpu.matmul %42, %17, %cst_15 {dimension_numbers = #tpu.dot_dimension_numbers<[2], [1], [1], [2], [0, 0, 0, 1, 1, 2], [0], [0]>, precision = #tpu.contract_precision<fp32>} : vector<4x1x8xf32>, vector<4x8x128xf32>, vector<4x1x128xf32> -> vector<4x1x128xf32>
    %44 = vector.shape_cast %43 : vector<4x1x128xf32> to vector<4x128xf32>
    %cst_16 = arith.constant dense<0.000000e+00> : vector<4x128xf32>
    %45 = vector.multi_reduction <add>, %19, %cst_16 [1] : vector<4x8x128xf32> to vector<4x128xf32>
    %cst_17 = arith.constant 1.250000e-01 : f32
    %46 = vector.broadcast %cst_17 : f32 to vector<4x128xf32>
    %47 = arith.mulf %45, %46 : vector<4x128xf32>
    %48 = arith.addf %47, %44 : vector<4x128xf32>
    %cst_18 = arith.constant dense<0.000000e+00> : vector<4xf32>
    %49 = vector.multi_reduction <add>, %48, %cst_18 [1] : vector<4x128xf32> to vector<4xf32>
    %50 = vector.shape_cast %49 : vector<4xf32> to vector<4x1xf32>
    %cst_19 = arith.constant 3.125000e-02 : f32
    %51 = vector.broadcast %cst_19 : f32 to vector<4x1xf32>
    %52 = arith.mulf %50, %51 : vector<4x1xf32>
    %53 = vector.broadcast %52 : vector<4x1xf32> to vector<4x128xf32>
    %54 = arith.subf %48, %53 : vector<4x128xf32>
    %55 = vector.broadcast %31 : vector<1x128xf32> to vector<4x128xf32>
    %56 = arith.mulf %54, %55 : vector<4x128xf32>
    %57 = arith.mulf %56, %56 : vector<4x128xf32>
    %cst_20 = arith.constant dense<0.000000e+00> : vector<4xf32>
    %58 = vector.multi_reduction <add>, %57, %cst_20 [1] : vector<4x128xf32> to vector<4xf32>
    %59 = vector.shape_cast %58 : vector<4xf32> to vector<4x1xf32>
    %cst_21 = arith.constant 3.125000e-02 : f32
    %60 = vector.broadcast %cst_21 : f32 to vector<4x1xf32>
    %61 = arith.mulf %59, %60 : vector<4x1xf32>
    %62 = vector.broadcast %25 : vector<1x128xf32> to vector<4x128xf32>
    %63 = arith.mulf %62, %56 : vector<4x128xf32>
    %cst_22 = arith.constant 9.99999974E-6 : f32
    %64 = vector.broadcast %cst_22 : f32 to vector<4x1xf32>
    %65 = arith.addf %61, %64 : vector<4x1xf32>
    %66 = math.rsqrt %65 : vector<4x1xf32>
    %67 = vector.broadcast %66 : vector<4x1xf32> to vector<4x128xf32>
    %68 = arith.mulf %63, %67 : vector<4x128xf32>
    %69 = vector.broadcast %26 : vector<1x128xf32> to vector<4x128xf32>
    %70 = arith.addf %68, %69 : vector<4x128xf32>
    %c0_23 = arith.constant 0 : index
    %c0_24 = arith.constant 0 : index
    %c0_25 = arith.constant 0 : index
    %71 = vector.load %arg5[%c0_23, %c0_24, %c0_25] : memref<2x4x128xf32, #tpu.memory_space<vmem>>, vector<1x4x128xf32>
    %72 = vector.shape_cast %71 : vector<1x4x128xf32> to vector<4x128xf32>
    %73 = vector.shape_cast %70 : vector<4x128xf32> to vector<1x4x128xf32>
    tpu.vector_store %arg5[%c0_23, %c0_24, %c0_25], %73 {strides = array<i32>} : memref<2x4x128xf32, #tpu.memory_space<vmem>>, vector<1x4x128xf32>,
    %cst_26 = arith.constant dense<0.000000e+00> : vector<4x8xf32>
    %74 = vector.multi_reduction <add>, %24, %cst_26 [2] : vector<4x8x8xf32> to vector<4x8xf32>
    %cst_27 = arith.constant dense<0xFF800000> : vector<4xf32>
    %75 = vector.multi_reduction <maximumf>, %74, %cst_27 [1] : vector<4x8xf32> to vector<4xf32>
    %76 = vector.shape_cast %75 : vector<4xf32> to vector<4x1xf32>
    %77 = vector.broadcast %76 : vector<4x1xf32> to vector<4x8xf32>
    %78 = arith.subf %74, %77 : vector<4x8xf32>
    %79 = math.exp %78 : vector<4x8xf32>
    %cst_28 = arith.constant dense<0.000000e+00> : vector<4xf32>
    %80 = vector.multi_reduction <add>, %79, %cst_28 [1] : vector<4x8xf32> to vector<4xf32>
    %81 = vector.shape_cast %80 : vector<4xf32> to vector<4x1xf32>
    %82 = vector.broadcast %81 : vector<4x1xf32> to vector<4x8xf32>
    %83 = arith.divf %79, %82 : vector<4x8xf32>
    %84 = vector.shape_cast %83 : vector<4x8xf32> to vector<4x1x8xf32>
    %cst_29 = arith.constant dense<0.000000e+00> : vector<4x1x128xf32>
    %85 = tpu.matmul %84, %18, %cst_29 {dimension_numbers = #tpu.dot_dimension_numbers<[2], [1], [1], [2], [0, 0, 0, 1, 1, 2], [0], [0]>, precision = #tpu.contract_precision<fp32>} : vector<4x1x8xf32>, vector<4x8x128xf32>, vector<4x1x128xf32> -> vector<4x1x128xf32>
    %86 = vector.shape_cast %85 : vector<4x1x128xf32> to vector<4x128xf32>
    %cst_30 = arith.constant dense<0.000000e+00> : vector<4x128xf32>
    %87 = vector.multi_reduction <add>, %20, %cst_30 [1] : vector<4x8x128xf32> to vector<4x128xf32>
    %cst_31 = arith.constant 1.250000e-01 : f32
    %88 = vector.broadcast %cst_31 : f32 to vector<4x128xf32>
    %89 = arith.mulf %87, %88 : vector<4x128xf32>
    %90 = arith.addf %89, %86 : vector<4x128xf32>
    %cst_32 = arith.constant dense<0.000000e+00> : vector<4xf32>
    %91 = vector.multi_reduction <add>, %90, %cst_32 [1] : vector<4x128xf32> to vector<4xf32>
    %92 = vector.shape_cast %91 : vector<4xf32> to vector<4x1xf32>
    %cst_33 = arith.constant 3.125000e-02 : f32
    %93 = vector.broadcast %cst_33 : f32 to vector<4x1xf32>
    %94 = arith.mulf %92, %93 : vector<4x1xf32>
    %95 = vector.broadcast %94 : vector<4x1xf32> to vector<4x128xf32>
    %96 = arith.subf %90, %95 : vector<4x128xf32>
    %97 = vector.broadcast %31 : vector<1x128xf32> to vector<4x128xf32>
    %98 = arith.mulf %96, %97 : vector<4x128xf32>
    %99 = arith.mulf %98, %98 : vector<4x128xf32>
    %cst_34 = arith.constant dense<0.000000e+00> : vector<4xf32>
    %100 = vector.multi_reduction <add>, %99, %cst_34 [1] : vector<4x128xf32> to vector<4xf32>
    %101 = vector.shape_cast %100 : vector<4xf32> to vector<4x1xf32>
    %cst_35 = arith.constant 3.125000e-02 : f32
    %102 = vector.broadcast %cst_35 : f32 to vector<4x1xf32>
    %103 = arith.mulf %101, %102 : vector<4x1xf32>
    %104 = vector.broadcast %25 : vector<1x128xf32> to vector<4x128xf32>
    %105 = arith.mulf %104, %98 : vector<4x128xf32>
    %cst_36 = arith.constant 9.99999974E-6 : f32
    %106 = vector.broadcast %cst_36 : f32 to vector<4x1xf32>
    %107 = arith.addf %103, %106 : vector<4x1xf32>
    %108 = math.rsqrt %107 : vector<4x1xf32>
    %109 = vector.broadcast %108 : vector<4x1xf32> to vector<4x128xf32>
    %110 = arith.mulf %105, %109 : vector<4x128xf32>
    %111 = vector.broadcast %26 : vector<1x128xf32> to vector<4x128xf32>
    %112 = arith.addf %110, %111 : vector<4x128xf32>
    %c1_37 = arith.constant 1 : index
    %c0_38 = arith.constant 0 : index
    %c0_39 = arith.constant 0 : index
    %113 = vector.load %arg5[%c1_37, %c0_38, %c0_39] : memref<2x4x128xf32, #tpu.memory_space<vmem>>, vector<1x4x128xf32>
    %114 = vector.shape_cast %113 : vector<1x4x128xf32> to vector<4x128xf32>
    %115 = vector.shape_cast %112 : vector<4x128xf32> to vector<1x4x128xf32>
    tpu.vector_store %arg5[%c1_37, %c0_38, %c0_39], %115 {strides = array<i32>} : memref<2x4x128xf32, #tpu.memory_space<vmem>>, vector<1x4x128xf32>,
    return
  }
  func.func @transform_0(%arg0: i32) -> (i32, i32, i32) {
    %c0_i32 = arith.constant 0 : i32
    %c0_i32_0 = arith.constant 0 : i32
    %c0_i32_1 = arith.constant 0 : i32
    return %arg0, %c0_i32, %c0_i32_0 : i32, i32, i32
  }
  func.func @transform_1(%arg0: i32) -> (i32, i32) {
    %c0_i32 = arith.constant 0 : i32
    %c0_i32_0 = arith.constant 0 : i32
    %c0_i32_1 = arith.constant 0 : i32
    return %c0_i32, %c0_i32_0 : i32, i32
  }
  func.func @transform_2(%arg0: i32) -> (i32, i32) {
    %c0_i32 = arith.constant 0 : i32
    %c0_i32_0 = arith.constant 0 : i32
    %c0_i32_1 = arith.constant 0 : i32
    return %c0_i32, %c0_i32_0 : i32, i32
  }
  func.func @transform_3(%arg0: i32) -> (i32, i32) {
    %c0_i32 = arith.constant 0 : i32
    %c0_i32_0 = arith.constant 0 : i32
    %c0_i32_1 = arith.constant 0 : i32
    return %c0_i32, %c0_i32_0 : i32, i32
  }
  func.func @transform_4(%arg0: i32) -> (i32, i32, i32) {
    %c0_i32 = arith.constant 0 : i32
    %c0_i32_0 = arith.constant 0 : i32
    %c0_i32_1 = arith.constant 0 : i32
    return %c0_i32, %arg0, %c0_i32_0 : i32, i32, i32
  }
}

</mosaic_0001>

<bundles_post_ra>
// kernel: tpu_custom_call.1
= control target key start
LH: loop header
LB: loop body
LE: loop exit
PB: predicated region body
PF: predicated region fallthrough
CT: control target
= control target key end

     0   :  { %9 = vsyncpa [#allocation3], 0  ;;  %s13816_s0 = inlined_call_operand.hbm [shape: f32[8,8,128], index: 0, kind: input, shape index: {}]   ;;  %s13817_s1 = inlined_call_operand.hbm [shape: f32[128,384], index: 1, kind: input, shape index: {}]   ;;  %s13818_s2 = inlined_call_operand.hbm [shape: f32[1,384], index: 2, kind: input, shape index: {}]   ;;  %s13819_s3 = inlined_call_operand.hbm [shape: f32[2,128], index: 3, kind: input, shape index: {}]   ;;  %s13820_s4 = inlined_call_operand.hbm [shape: f32[2,4,128], index: 4, kind: output, shape index: {}]  }
   0x1   :  { %10 = vsyncpa [#allocation6], 0 }
   0x2   :  { %11 = vsyncpa [#allocation9], 0 }
   0x3   :  { %12 = vsyncpa [#allocation4], 0  ;;  %s11934_s15 = smov [#allocation5]   ;;  %s11816_s19 = scalar_lea.hbm %s13817_s1, 6144 }
   0x4   :  { %s30_s16 = sshll.u32 %s11934_s15, 4  ;;  %p11817_p0 = scmp.ne.s32.totalorder %s13817_s1, %s11816_s19  ;;  %s31_s16 = int_to_ptr.vmem [resolvable:$true] %s30_s16 }
   0x5   :  { %p11820_p1 = scmp.lt.u32.totalorder %s11816_s19, %s13817_s1 }
   0x7   :  { %p11822_p2 = pnand %p11820_p1, %p11817_p0 }
   0x9   :  { %11825 = shalt.err (!%p11822_p2)
}
   0xa   :  { %s11826_s24 = scalar_lea.vmem %s31_s16, 6144  ;;  %p11831_p4 = scmp.lt.s32.totalorder %s31_s16, %s31_s16 }
   0xb   :  { %p11827_p3 = scmp.ne.s32.totalorder %s31_s16, %s11826_s24  ;;  %p11832_p5 = scmp.lt.s32.totalorder %s11826_s24, %s11826_s24 }
   0xd   :  { %p11833_p6 = por %p11832_p5, %p11831_p4 }
   0xf   :  { %p11834_p7 = pnand %p11833_p6, %p11827_p3 }
  0x11   :  { %11837 = shalt.err (!%p11834_p7)
}
  0x12   :  { %s11935_s25 = smov 384   ;;  %s11936_s26 = smov 24  }
  0x13   :  { %36 = dma.hbm_to_vmem [thread:$0]  %s13817_s1, 6144, %s31_s16, [#allocation6], %s11935_s25, %s11935_s25, %s11936_s26  }
  0x14   :  { %s11937_s29 = smov [#allocation2]   ;;  %s11838_s7 = scalar_lea.hbm %s13816_s0, 1024 }
  0x15   :  { %s18_s30 = sshll.u32 %s11937_s29, 4  ;;  %p11839_p8 = scmp.ne.s32.totalorder %s13816_s0, %s11838_s7  ;;  %s19_s30 = int_to_ptr.vmem [resolvable:$true] %s18_s30 }
  0x16   :  { %p11842_p9 = scmp.lt.u32.totalorder %s11838_s7, %s13816_s0 }
  0x18   :  { %p11844_p10 = pnand %p11842_p9, %p11839_p8 }
  0x1a   :  { %11847 = shalt.err (!%p11844_p10)
}
  0x1b   :  { %s11848_s12 = scalar_lea.vmem %s19_s30, 1024  ;;  %p11853_p12 = scmp.lt.s32.totalorder %s19_s30, %s19_s30 }
  0x1c   :  { %p11849_p11 = scmp.ne.s32.totalorder %s19_s30, %s11848_s12  ;;  %p11854_p13 = scmp.lt.s32.totalorder %s11848_s12, %s11848_s12 }
  0x1e   :  { %p11855_p0 = por %p11854_p13, %p11853_p12 }
  0x20   :  { %p11856_p1 = pnand %p11855_p0, %p11849_p11 }
  0x22   :  { %11859 = shalt.err (!%p11856_p1)
}
  0x23   :  { %s11938_s1 = smov 128   ;;  %s11939_s13 = smov 8  }
  0x24   :  { %24 = dma.hbm_to_vmem [thread:$0]  %s13816_s0, 1024, %s19_s30, [#allocation3], %s11938_s1, %s11938_s1, %s11939_s13  }
  0x25   :  { %s11940_s16 = smov [#allocation7]   ;;  %s11941_s18 = smov [#allocation8]  }
  0x26   :  { %s43_s17 = sshll.u32 %s11940_s16, 4  ;;  %s53_s19 = sshll.u32 %s11941_s18, 4  ;;  %s44_s17 = int_to_ptr.vmem [resolvable:$true] %s43_s17  ;;  %s54_s19 = int_to_ptr.vmem [resolvable:$true] %s53_s19 }
  0x27   :  { %s11860_s22 = scalar_lea.hbm %s13818_s2, 48 }
  0x28   :  { %p11861_p2 = scmp.ne.s32.totalorder %s13818_s2, %s11860_s22  ;;  %p11864_p3 = scmp.lt.u32.totalorder %s11860_s22, %s13818_s2 }
  0x2a   :  { %p11866_p4 = pnand %p11864_p3, %p11861_p2 }
  0x2c   :  { %11869 = shalt.err (!%p11866_p4)
}
  0x2d   :  { %s11870_s0 = scalar_lea.vmem %s44_s17, 48  ;;  %s11874_s27 = scalar_lea.vmem %s44_s17, 64 }
  0x2e   :  { %p11871_p5 = scmp.ne.s32.totalorder %s44_s17, %s11870_s0  ;;  %p11875_p6 = scmp.lt.s32.totalorder %s44_s17, %s44_s17 }
  0x2f   :  { %p11876_p7 = scmp.lt.s32.totalorder %s11874_s27, %s11870_s0 }
  0x31   :  { %p11877_p8 = por %p11876_p7, %p11875_p6 }
  0x33   :  { %p11878_p9 = pnand %p11877_p8, %p11871_p5 }
  0x35   :  { %11881 = shalt.err (!%p11878_p9)
}
  0x36   :  { %46 = dma.hbm_to_vmem [thread:$0]  %s13818_s2, 48, %s44_s17, [#allocation6]  }
  0x37   :  { %s11882_s6 = scalar_lea.hbm %s13819_s3, 32 }
  0x38   :  { %p11883_p10 = scmp.ne.s32.totalorder %s13819_s3, %s11882_s6  ;;  %p11886_p11 = scmp.lt.u32.totalorder %s11882_s6, %s13819_s3 }
  0x3a   :  { %p11888_p12 = pnand %p11886_p11, %p11883_p10 }
  0x3c   :  { %11891 = shalt.err (!%p11888_p12)
}
  0x3d   :  { %s11892_s11 = scalar_lea.vmem %s54_s19, 32  ;;  %p11897_p0 = scmp.lt.s32.totalorder %s54_s19, %s54_s19 }
  0x3e   :  { %p11893_p13 = scmp.ne.s32.totalorder %s54_s19, %s11892_s11  ;;  %p11898_p1 = scmp.lt.s32.totalorder %s11892_s11, %s11892_s11 }
  0x40   :  { %p11899_p2 = por %p11898_p1, %p11897_p0 }
  0x42   :  { %p11900_p3 = pnand %p11899_p2, %p11893_p13 }
  0x44   :  { %11903 = shalt.err (!%p11900_p3)
}
  0x45   :  { %56 = dma.hbm_to_vmem [thread:$0]  %s13819_s3, 32, %s54_s19, [#allocation9]  }
  0x46   :  { %11926 = dma.done.wait [#allocation3], 1024  }
  0x47   :  { %11927 = vsyncadd [#allocation3], 4294966272 }
  0x48   :  { %11928 = dma.done.wait [#allocation6], 6192  }
  0x49   :  { %11929 = vsyncadd [#allocation6], 4294961104 }
  0x4a   :  { %11930 = dma.done.wait [#allocation9], 32  }
  0x4b   :  { %11931 = vsyncadd [#allocation9], 4294967264  ;;  %v13821_v0 = vmov 0.0   ;;  %v78_v1 = vld [vmem:[#allocation5 + $0x8] sm:$0xff]  ;;  %v81_v2 = vld [vmem:[#allocation5 + $0x20] sm:$0xff]  ;;  %vm11943_vm0 = vmmov 0  }
  0x4c   :  { %238 = vmatprep.mubr.f32.mxu0 %v13821_v0  ;;  %v77_v3 = vld [vmem:[#allocation5] sm:$0xff]  ;;  %v142_v4 = vand.u32 4294901760, %v78_v1  ;;  %v146_v5 = vand.u32 4294901760, %v81_v2  ;;  %v80_v6 = vld [vmem:[#allocation5 + $0x18] sm:$0xff]  ;;  %v87_v9 = vld [vmem:[#allocation5 + $0x50] sm:$0xff]  ;;  %vm5889_vm1 = vcmask 64512  }
  0x4d   :  { %v144_v7 = vand.u32 4294901760, %v77_v3  ;;  %v84_v8 = vld [vmem:[#allocation5 + $0x38] sm:$0xff]  ;;  %v148_v10 = vand.u32 4294901760, %v80_v6  ;;  %v154_v12 = vand.u32 4294901760, %v87_v9  ;;  %v83_v13 = vld [vmem:[#allocation5 + $0x30] sm:$0xff]  ;;  %v86_v14 = vld [vmem:[#allocation5 + $0x48] sm:$0xff] }
  0x4e   :  { %v150_v11 = vand.u32 4294901760, %v84_v8  ;;  %v90_v15 = vld [vmem:[#allocation5 + $0x68] sm:$0xff]  ;;  %v12022_v16 = vpack.c.bf16 %v146_v5, %v142_v4  ;;  %v12024_v17 = vsub.f32 %v78_v1, %v142_v4  ;;  %v12026_v18 = vsub.f32 %v81_v2, %v146_v5  ;;  %v93_v20 = vld [vmem:[#allocation5 + $0x80] sm:$0xff]  ;;  %v92_v22 = vld [vmem:[#allocation5 + $0x78] sm:$0xff]  ;;  %s11945_s3 = smov [#allocation10]  }
  0x4f   :  { %v12028_v19 = vsub.f32 %v77_v3, %v144_v7  ;;  %v89_v21 = vld [vmem:[#allocation5 + $0x60] sm:$0xff]  ;;  %v12030_v23 = vpack.c.bf16 %v148_v10, %v144_v7  ;;  %v12032_v24 = vsub.f32 %v80_v6, %v148_v10  ;;  %v96_v27 = vld [vmem:[#allocation5 + $0x98] sm:$0xff]  ;;  %v12039_v28 = vsub.f32 %v87_v9, %v154_v12  ;;  %v99_v32 = vld [vmem:[#allocation5 + $0xb0] sm:$0xff]  ;;  %s10035_s1 = sshll.u32 %s11945_s3, 4  ;;  %s10036_s1 = int_to_ptr.vmem [resolvable:$true] %s10035_s1 }
  0x50   :  { %13971 = vst [vmem:[#allocation15_spill] sm:$0xff] %v12022_v16  ;;  %v12034_v25 = vpack.c.bf16 %v154_v12, %v150_v11  ;;  %v12036_v26 = vsub.f32 %v84_v8, %v150_v11  ;;  %11133 = vmatprep.subr.bf16.mxu0 %v12022_v16  ;;  %v152_v29 = vand.u32 4294901760, %v83_v13  ;;  %v156_v30 = vand.u32 4294901760, %v86_v14  ;;  %v95_v37 = vld [vmem:[#allocation5 + $0x90] sm:$0xff]  ;;  %v98_v38 = vld [vmem:[#allocation5 + $0xa8] sm:$0xff]  ;;  %v105_v44 = vld [vmem:[#allocation5 + $0xe0] sm:$0xff]  ;;  %p11909_p5 = scmp.lt.s32.totalorder %s10036_s1, %s10036_s1 }
  0x51   :  { %13972 = vst [vmem:[#allocation16_spill] sm:$0xff] %v12030_v23  ;;  %v158_v31 = vand.u32 4294901760, %v90_v15  ;;  %11135 = vmatpush1.bf16.msra.mxu0 %v12030_v23  ;;  %v162_v33 = vand.u32 4294901760, %v93_v20  ;;  %v160_v34 = vand.u32 4294901760, %v89_v21  ;;  %v164_v35 = vand.u32 4294901760, %v92_v22  ;;  %v102_v43 = vld [vmem:[#allocation5 + $0xc8] sm:$0xff] }
  0x52   :  { %13973 = vst [vmem:[#allocation17_spill] sm:$0xff] %v12034_v25  ;;  %v166_v36 = vand.u32 4294901760, %v96_v27  ;;  %11137 = vmatprep.subr.bf16.mxu0 %v12034_v25  ;;  %v12043_v39 = vpack.c.bf16 %v156_v30, %v152_v29  ;;  %v12045_v40 = vsub.f32 %v83_v13, %v152_v29  ;;  %v12047_v41 = vsub.f32 %v86_v14, %v156_v30  ;;  %v101_v45 = vld [vmem:[#allocation5 + $0xc0] sm:$0xff]  ;;  %v104_v50 = vld [vmem:[#allocation5 + $0xd8] sm:$0xff]  ;;  %v111_v60 = vld [vmem:[#allocation5 + $0x110] sm:$0xff]  ;;  %s11904_s13 = scalar_lea.vmem %s10036_s1, 128 }
  0x53   :  { %v12049_v42 = vsub.f32 %v90_v15, %v158_v31  ;;  %v12051_v46 = vpack.c.bf16 %v162_v33, %v158_v31  ;;  %v12053_v47 = vsub.f32 %v93_v20, %v162_v33  ;;  %v12055_v48 = vpack.c.bf16 %v164_v35, %v160_v34  ;;  %v108_v59 = vld [vmem:[#allocation5 + $0xf8] sm:$0xff]  ;;  %v107_v2 = vld [vmem:[#allocation5 + $0xf0] sm:$0xff]  ;;  %v110_v3 = vld [vmem:[#allocation5 + $0x108] sm:$0xff]  ;;  %p11905_p4 = scmp.ne.s32.totalorder %s10036_s1, %s11904_s13  ;;  %p11910_p6 = scmp.lt.s32.totalorder %s11904_s13, %s11904_s13 }
  0x54   :  { %13974 = vst [vmem:[#allocation18_spill] sm:$0xff] %v12043_v39  ;;  %v12057_v49 = vsub.f32 %v89_v21, %v160_v34  ;;  %v12059_v51 = vsub.f32 %v92_v22, %v164_v35  ;;  %v170_v52 = vand.u32 4294901760, %v99_v32  ;;  %v12061_v53 = vsub.f32 %v96_v27, %v166_v36  ;;  %v114_v4 = vld [vmem:[#allocation5 + $0x128] sm:$0xff]  ;;  %v117_v9 = vld [vmem:[#allocation5 + $0x140] sm:$0xff]  ;;  %v116_v11 = vld [vmem:[#allocation5 + $0x138] sm:$0xff] }
  0x55   :  { %13975 = vst [vmem:[#allocation19_spill] sm:$0xff] %v12051_v46  ;;  %13976 = vst [vmem:[#allocation20_spill] sm:$0xff] %v12055_v48  ;;  %v168_v54 = vand.u32 4294901760, %v95_v37  ;;  %11139 = vmatpush1.bf16.msra.mxu0 %v12043_v39  ;;  %v172_v55 = vand.u32 4294901760, %v98_v38  ;;  %v174_v56 = vand.u32 4294901760, %v102_v43  ;;  %v178_v57 = vand.u32 4294901760, %v105_v44  ;;  %p11911_p7 = por %p11910_p6, %p11909_p5 }
  0x56   :  { %v176_v58 = vand.u32 4294901760, %v101_v45  ;;  %11141 = vmatprep.subr.bf16.mxu0 %v12051_v46  ;;  %v12065_v61 = vpack.c.bf16 %v170_v52, %v166_v36  ;;  %v12067_v62 = vsub.f32 %v99_v32, %v170_v52  ;;  %v180_v1 = vand.u32 4294901760, %v104_v50  ;;  %v113_v10 = vld [vmem:[#allocation5 + $0x120] sm:$0xff]  ;;  %v120_v33 = vld [vmem:[#allocation5 + $0x158] sm:$0xff]  ;;  %v12409_v16 = vld [vmem:[#allocation5 + $0xe8] sm:$0xff] }
  0x57   :  { %v12069_v63 = vsub.f32 %v95_v37, %v168_v54  ;;  %v12071_v5 = vpack.c.bf16 %v172_v55, %v168_v54  ;;  %v12073_v6 = vsub.f32 %v98_v38, %v172_v55  ;;  %v12075_v7 = vpack.c.bf16 %v178_v57, %v174_v56  ;;  %v123_v38 = vld [vmem:[#allocation5 + $0x170] sm:$0xff]  ;;  %v69_v55 = vld [vmem:[#allocation2] sm:$0xff]  ;;  %p11912_p8 = pnand %p11911_p7, %p11905_p4 }
  0x58   :  { %13977 = vst [vmem:[#allocation21_spill] sm:$0xff] %v12065_v61  ;;  %v12077_v8 = vsub.f32 %v102_v43, %v174_v56  ;;  %v12079_v12 = vsub.f32 %v105_v44, %v178_v57  ;;  %v12081_v13 = vpack.c.bf16 %v180_v1, %v176_v58  ;;  %v12083_v14 = vsub.f32 %v101_v45, %v176_v58  ;;  %v119_v43 = vld [vmem:[#allocation5 + $0x150] sm:$0xff]  ;;  %v122_v44 = vld [vmem:[#allocation5 + $0x168] sm:$0xff] }
  0x59   :  { %13978 = vst [vmem:[#allocation22_spill] sm:$0xff] %v12071_v5  ;;  %13979 = vst [vmem:[#allocation23_spill] sm:$0xff] %v12075_v7  ;;  %v12085_v15 = vsub.f32 %v104_v50, %v180_v1  ;;  %11143 = vmatpush1.bf16.msra.mxu0 %v12055_v48  ;;  %v182_v20 = vand.u32 4294901760, %v108_v59  ;;  %v186_v21 = vand.u32 4294901760, %v111_v60  ;;  %v184_v22 = vand.u32 4294901760, %v107_v2 }
  0x5a   :  { %13980 = vst [vmem:[#allocation24_spill] sm:$0xff] %v12081_v13  ;;  %v188_v27 = vand.u32 4294901760, %v110_v3  ;;  %11145 = vmatprep.subr.bf16.mxu0 %v12065_v61  ;;  %v190_v29 = vand.u32 4294901760, %v114_v4  ;;  %v194_v30 = vand.u32 4294901760, %v117_v9  ;;  %v192_v31 = vand.u32 4294901760, %v113_v10 }
  0x5b   :  { %13981 = vst [vmem:[#allocation25_spill] sm:$0xff] %v12085_v15  ;;  %v196_v32 = vand.u32 4294901760, %v116_v11  ;;  %v12089_v34 = vpack.c.bf16 %v186_v21, %v182_v20  ;;  %v12091_v35 = vsub.f32 %v108_v59, %v182_v20  ;;  %v12093_v36 = vsub.f32 %v111_v60, %v186_v21 }
  0x5c   :  { %v12095_v37 = vpack.c.bf16 %v188_v27, %v184_v22  ;;  %v12097_v45 = vsub.f32 %v107_v2, %v184_v22  ;;  %v12099_v50 = vsub.f32 %v110_v3, %v188_v27  ;;  %v12101_v52 = vpack.c.bf16 %v194_v30, %v190_v29  ;;  %v70_v22 = vld [vmem:[#allocation2 + $0x8] sm:$0xff] }
  0x5d   :  { %13982 = vst [vmem:[#allocation26_spill] sm:$0xff] %v12089_v34  ;;  %v12103_v54 = vsub.f32 %v114_v4, %v190_v29  ;;  %11147 = vmatpush1.bf16.msra.mxu0 %v12071_v5  ;;  %v12106_v56 = vsub.f32 %v117_v9, %v194_v30  ;;  %v12108_v57 = vpack.c.bf16 %v196_v32, %v192_v31  ;;  %v198_v60 = vand.u32 4294901760, %v120_v33 }
  0x5e   :  { %13983 = vst [vmem:[#allocation27_spill] sm:$0xff] %v12095_v37  ;;  %13984 = vst [vmem:[#allocation28_spill] sm:$0xff] %v12097_v45  ;;  %v12110_v58 = vsub.f32 %v113_v10, %v192_v31  ;;  %v12112_v59 = vsub.f32 %v116_v11, %v196_v32  ;;  %11149 = vmatprep.subr.bf16.mxu0 %v12075_v7  ;;  %v202_v1 = vand.u32 4294901760, %v123_v38  ;;  %v200_v2 = vand.u32 4294901760, %v119_v43 }
  0x5f   :  { %13985 = vst [vmem:[#allocation29_spill] sm:$0xff] %v12101_v52  ;;  %13986 = vst [vmem:[#allocation30_spill] sm:$0xff] %v12108_v57  ;;  %v204_v3 = vand.u32 4294901760, %v122_v44  ;;  %v12115_v20 = vand.u32 4294901760, %v69_v55  ;;  %v13823_v4 = vand.u32 4294901760, %v12024_v17  ;;  %v13824_v21 = vand.u32 4294901760, %v12026_v18 }
  0x60   :  { %v13825_v9 = vand.u32 4294901760, %v12028_v19  ;;  %v12120_v27 = vpack.c.bf16 %v202_v1, %v198_v60  ;;  %v12122_v10 = vsub.f32 %v120_v33, %v198_v60  ;;  %v12124_v11 = vsub.f32 %v123_v38, %v202_v1 }
  0x61   :  { %13987 = vst [vmem:[#allocation31_spill] sm:$0xff] %v12115_v20  ;;  %v12126_v29 = vpack.c.bf16 %v204_v3, %v200_v2  ;;  %11151 = vmatpush1.bf16.msra.mxu0 %v12081_v13  ;;  %v12129_v30 = vsub.f32 %v119_v43, %v200_v2  ;;  %v12131_v31 = vsub.f32 %v122_v44, %v204_v3  ;;  %v13830_v43 = vand.u32 4294901760, %v12032_v24  ;;  %v71_v13 = vld [vmem:[#allocation2 + $0x10] sm:$0xff] }
  0x62   :  { %13988 = vst [vmem:[#allocation32_spill] sm:$0xff] %v12120_v27  ;;  %v12134_v32 = vsub.f32 %v69_v55, %v12115_v20  ;;  %v330_v0 = vsub.f32 %v12024_v17, %v13823_v4  ;;  %11153 = vmatprep.subr.bf16.mxu0 %v12089_v34  ;;  %v342_v33 = vsub.f32 %v12026_v18, %v13824_v21  ;;  %v12147_v44 = vand.u32 4294901760, %v70_v22 }
  0x63   :  { %13989 = vst [vmem:[#allocation33_spill] sm:$0xff] %v12126_v29  ;;  %v336_v38 = vsub.f32 %v12028_v19, %v13825_v9  ;;  %v13841_v1 = vand.u32 4294901760, %v12036_v26  ;;  %v13842_v2 = vand.u32 4294901760, %v12039_v28  ;;  %v348_v21 = vsub.f32 %v12032_v24, %v13830_v43 }
  0x64   :  { %13990 = vst [vmem:[#allocation34_spill] sm:$0xff] %v12134_v32  ;;  %13991 = vst [vmem:[#allocation35_spill] sm:$0xff] %v12147_v44  ;;  %v12150_v55 = vand.u32 4294901760, %v12134_v32  ;;  %v331_v60 = vand.u32 4294901760, %v330_v0  ;;  %v343_v3 = vand.u32 4294901760, %v342_v33  ;;  %v12158_v9 = vsub.f32 %v70_v22, %v12147_v44 }
  0x65   :  { %v337_v4 = vand.u32 4294901760, %v336_v38  ;;  %11155 = vmatpush1.bf16.msra.mxu0 %v12095_v37  ;;  %v354_v0 = vsub.f32 %v12036_v26, %v13841_v1  ;;  %v366_v33 = vsub.f32 %v12039_v28, %v13842_v2  ;;  %v13847_v38 = vand.u32 4294901760, %v12045_v40 }
  0x66   :  { %13992 = vst [vmem:[#allocation36_spill] sm:$0xff] %v12150_v55  ;;  %13993 = vst [vmem:[#allocation37_spill] sm:$0xff] %v12158_v9  ;;  %v242_v34 = vsub.f32 %v12134_v32, %v12150_v55  ;;  %11157 = vmatprep.subr.bf16.mxu0 %v12101_v52  ;;  %v11164_v22 = vpack.c.bf16 %v343_v3, %v331_v60  ;;  %v349_v43 = vand.u32 4294901760, %v348_v21  ;;  %v12172_v37 = vand.u32 4294901760, %v12158_v9  ;;  %v72_v3 = vld [vmem:[#allocation2 + $0x18] sm:$0xff]  ;;  %v75_v32 = vld [vmem:[#allocation2 + $0x30] sm:$0xff] }
  0x67   :  { %v13848_v55 = vand.u32 4294901760, %v12047_v41  ;;  %v355_v5 = vand.u32 4294901760, %v354_v0  ;;  %v367_v61 = vand.u32 4294901760, %v366_v33  ;;  %v360_v1 = vsub.f32 %v12045_v40, %v13847_v38 }
  0x68   :  { %13994 = vst [vmem:[#allocation38_spill] sm:$0xff] %v12172_v37  ;;  %v243_v7 = vand.u32 4294901760, %v242_v34  ;;  %v11166_v2 = vpack.c.bf16 %v349_v43, %v337_v4  ;;  %v253_v48 = vsub.f32 %v12158_v9, %v12172_v37  ;;  %v12183_v60 = vand.u32 4294901760, %v71_v13 }
  0x69   :  { %v372_v21 = vsub.f32 %v12047_v41, %v13848_v55  ;;  %11159 = vmatpush1.bf16.msra.mxu0 %v12108_v57  ;;  %v11168_v34 = vpack.c.bf16 %v367_v61, %v355_v5  ;;  %v361_v0 = vand.u32 4294901760, %v360_v1  ;;  %v13853_v33 = vand.u32 4294901760, %v12049_v42 }
  0x6a   :  { %13995 = vst [vmem:[#allocation39_spill] sm:$0xff] %v12183_v60  ;;  %v13856_v52 = vand.u32 4294901760, %v12053_v47  ;;  %10420 = vmatprep.mubr.f32.mxu1 %v243_v7  ;;  %11161 = vmatprep.subr.bf16.mxu0 %v12120_v27  ;;  %v12189_v4 = vand.u32 4294901760, %v253_v48  ;;  %v12192_v38 = vsub.f32 %v71_v13, %v12183_v60  ;;  %v13859_v55 = vand.u32 4294901760, %v12057_v49 }
  0x6b   :  { %v373_v43 = vand.u32 4294901760, %v372_v21  ;;  %v378_v61 = vsub.f32 %v12049_v42, %v13853_v33  ;;  %v13866_v1 = vand.u32 4294901760, %v12059_v51  ;;  %v12202_v37 = vand.u32 4294901760, %v72_v3 }
  0x6c   :  { %13996 = vst [vmem:[#allocation40_spill] sm:$0xff] %v12189_v4  ;;  %13997 = vst [vmem:[#allocation41_spill] sm:$0xff] %v12192_v38  ;;  %v390_v5 = vsub.f32 %v12053_v47, %v13856_v52  ;;  %v12205_v21 = vand.u32 4294901760, %v12192_v38  ;;  %v384_v13 = vsub.f32 %v12057_v49, %v13859_v55  ;;  %v13867_v27 = vand.u32 4294901760, %v12061_v53 }
  0x6d   :  { %v11170_v48 = vpack.c.bf16 %v373_v43, %v361_v0  ;;  %11163 = vmatpush1.bf16.msra.mxu0 %v12126_v29  ;;  %v379_v33 = vand.u32 4294901760, %v378_v61  ;;  %v396_v52 = vsub.f32 %v12059_v51, %v13866_v1  ;;  %v12216_v46 = vsub.f32 %v72_v3, %v12202_v37  ;;  %v73_v61 = vld [vmem:[#allocation2 + $0x20] sm:$0xff] }
  0x6e   :  { %13998 = vst [vmem:[#allocation42_spill] sm:$0xff] %v12205_v21  ;;  %v391_v57 = vand.u32 4294901760, %v390_v5  ;;  %11165 = vmatprep.subr.bf16.mxu0 %v11164_v22  ;;  %v264_v0 = vsub.f32 %v12192_v38, %v12205_v21  ;;  %v385_v43 = vand.u32 4294901760, %v384_v13  ;;  %v402_v55 = vsub.f32 %v12061_v53, %v13867_v27 }
  0x6f   :  { %13999 = vst [vmem:[#allocation43_spill] sm:$0xff] %v12216_v46  ;;  %v13870_v29 = vand.u32 4294901760, %v12067_v62  ;;  %v397_v39 = vand.u32 4294901760, %v396_v52  ;;  %v12225_v9 = vand.u32 4294901760, %v12216_v46  ;;  %v13875_v3 = vand.u32 4294901760, %v12069_v63 }
  0x70   :  { %v11172_v5 = vpack.c.bf16 %v391_v57, %v379_v33  ;;  %244 = vmatmul.mubr.f32.vlgmr.msra.gmra.mrb[0].mxu0 %v243_v7  ;;  %v12228_v22 = vand.u32 4294901760, %v264_v0  ;;  %v403_v1 = vand.u32 4294901760, %v402_v55  ;;  %v13876_v27 = vand.u32 4294901760, %v12073_v6 }
  0x71   :  { %14000 = vst [vmem:[#allocation44_spill] sm:$0xff] %v12225_v9  ;;  %v414_v13 = vsub.f32 %v12067_v62, %v13870_v29  ;;  %11167 = vmatpush1.bf16.msra.mxu0 %v11166_v2  ;;  %v14002_v21 = vmov 0.0   ;;  %v11174_v57 = vpack.c.bf16 %v397_v39, %v385_v43  ;;  %v275_v52 = vsub.f32 %v12216_v46, %v12225_v9  ;;  %v74_v39 = vld [vmem:[#allocation2 + $0x28] sm:$0xff] }
  0x72   :  { %14001 = vst [vmem:[#allocation45_spill] sm:$0xff] %v12228_v22  ;;  %249 = vmatprep.mubr.f32.mxu0 %v14002_v21  ;;  %v408_v7 = vsub.f32 %v12069_v63, %v13875_v3  ;;  %v12240_v33 = vand.u32 4294901760, %v73_v61  ;;  %11169 = vmatprep.subr.bf16.mxu0 %v11168_v34  ;;  %v420_v0 = vsub.f32 %v12073_v6, %v13876_v27  ;;  %v13879_v2 = vand.u32 4294901760, %v12077_v8 }
  0x73   :  { %v415_v55 = vand.u32 4294901760, %v414_v13  ;;  %v13880_v29 = vand.u32 4294901760, %v12079_v12  ;;  %v12247_v43 = vand.u32 4294901760, %v275_v52  ;;  %v13885_v3 = vand.u32 4294901760, %v12083_v14 }
  0x74   :  { %v409_v9 = vand.u32 4294901760, %v408_v7  ;;  %v12250_v46 = vsub.f32 %v73_v61, %v12240_v33  ;;  %255 = vmatmul.mubr.f32.gmra.mrb[2].mxu0 %v12189_v4  ;;  %v421_v13 = vand.u32 4294901760, %v420_v0  ;;  %v426_v27 = vsub.f32 %v12077_v8, %v13879_v2  ;;  %v12365_v4 = vld [vmem:[#allocation5 + $0x40] sm:$0xff] }
  0x75   :  { %14003 = vst [vmem:[#allocation46_spill] sm:$0xff] %v12247_v43  ;;  %v11176_v34 = vpack.c.bf16 %v415_v55, %v403_v1  ;;  %v438_v38 = vsub.f32 %v12079_v12, %v13880_v29  ;;  %11171 = vmatpush1.bf16.msra.mxu0 %v11170_v48  ;;  %260 = vmatprep.mubr.f32.mxu0 %v14002_v21  ;;  %v13888_v1 = vand.u32 4294901760, %v12085_v15  ;;  %v12268_v7 = vand.u32 4294901760, %v74_v39 }
  0x76   :  { %14004 = vst [vmem:[#allocation47_spill] sm:$0xff] %v12250_v46  ;;  %v12262_v61 = vand.u32 4294901760, %v12250_v46  ;;  %v432_v52 = vsub.f32 %v12083_v14, %v13885_v3  ;;  %11173 = vmatprep.subr.bf16.mxu0 %v11172_v5  ;;  %v11178_v55 = vpack.c.bf16 %v421_v13, %v409_v9  ;;  %v427_v0 = vand.u32 4294901760, %v426_v27 }
  0x77   :  { %14006 = vst [vmem:[#allocation49_spill] sm:$0xff] %v12268_v7  ;;  %v439_v2 = vand.u32 4294901760, %v438_v38  ;;  %v13889_v29 = vand.u32 4294901760, %v12091_v35  ;;  %v444_v23 = vsub.f32 %v12085_v15, %v13888_v1  ;;  %v12277_v3 = vsub.f32 %v74_v39, %v12268_v7 }
  0x78   :  { %14005 = vst [vmem:[#allocation48_spill] sm:$0xff] %v12262_v61  ;;  %v286_v48 = vsub.f32 %v12250_v46, %v12262_v61  ;;  %v433_v25 = vand.u32 4294901760, %v432_v52  ;;  %266 = vmatmul.mubr.f32.gmra.mrb[4].mxu0 %v12228_v22  ;;  %v13892_v27 = vand.u32 4294901760, %v12093_v36  ;;  %v13895_v38 = vand.u32 4294901760, %v12097_v45  ;;  %v76_v22 = vld [vmem:[#allocation2 + $0x38] sm:$0xff] }
  0x79   :  { %14007 = vst [vmem:[#allocation50_spill] sm:$0xff] %v12277_v3  ;;  %v11180_v5 = vpack.c.bf16 %v439_v2, %v427_v0  ;;  %v450_v9 = vsub.f32 %v12091_v35, %v13889_v29  ;;  %11175 = vmatpush1.bf16.msra.mxu0 %v11174_v57  ;;  %271 = vmatprep.mubr.f32.mxu0 %v14002_v21  ;;  %v445_v52 = vand.u32 4294901760, %v444_v23  ;;  %v12289_v39 = vand.u32 4294901760, %v12277_v3 }
  0x7a   :  { %v12286_v13 = vand.u32 4294901760, %v286_v48  ;;  %v13897_v1 = vand.u32 4294901760, %v12099_v50  ;;  %11177 = vmatprep.subr.bf16.mxu0 %v11176_v34  ;;  %v462_v0 = vsub.f32 %v12093_v36, %v13892_v27  ;;  %v456_v57 = vsub.f32 %v12097_v45, %v13895_v38 }
  0x7b   :  { %14009 = vst [vmem:[#allocation52_spill] sm:$0xff] %v12289_v39  ;;  %v451_v2 = vand.u32 4294901760, %v450_v9  ;;  %v12298_v29 = vand.u32 4294901760, %v75_v32  ;;  %v11182_v48 = vpack.c.bf16 %v445_v52, %v433_v25  ;;  %v297_v23 = vsub.f32 %v12277_v3, %v12289_v39 }
  0x7c   :  { %14008 = vst [vmem:[#allocation51_spill] sm:$0xff] %v12286_v13  ;;  %v468_v61 = vsub.f32 %v12099_v50, %v13897_v1  ;;  %v13902_v34 = vand.u32 4294901760, %v12103_v54  ;;  %277 = vmatmul.mubr.f32.gmra.mrb[6].mxu0 %v12247_v43  ;;  %v463_v9 = vand.u32 4294901760, %v462_v0  ;;  %v457_v27 = vand.u32 4294901760, %v456_v57  ;;  %v82_v43 = vld [vmem:[#allocation5 + $0x28] sm:$0xff] }
  0x7d   :  { %14010 = vst [vmem:[#allocation53_spill] sm:$0xff] %v12298_v29  ;;  %v12308_v46 = vsub.f32 %v75_v32, %v12298_v29  ;;  %v13903_v38 = vand.u32 4294901760, %v12106_v56  ;;  %11179 = vmatpush1.bf16.msra.mxu0 %v11178_v55  ;;  %282 = vmatprep.mubr.f32.mxu0 %v14002_v21  ;;  %v12312_v25 = vand.u32 4294901760, %v297_v23  ;;  %v13904_v39 = vand.u32 4294901760, %v12110_v58  ;;  %v12422_v29 = vld [vmem:[#allocation5 + $0x100] sm:$0xff] }
  0x7e   :  { %v469_v52 = vand.u32 4294901760, %v468_v61  ;;  %v474_v1 = vsub.f32 %v12103_v54, %v13902_v34  ;;  %11181 = vmatprep.subr.bf16.mxu0 %v11180_v5  ;;  %v11184_v0 = vpack.c.bf16 %v463_v9, %v451_v2  ;;  %v13907_v57 = vand.u32 4294901760, %v12112_v59 }
  0x7f   :  { %14011 = vst [vmem:[#allocation54_spill] sm:$0xff] %v12308_v46  ;;  %14012 = vst [vmem:[#allocation55_spill] sm:$0xff] %v12312_v25  ;;  %v12319_v32 = vand.u32 4294901760, %v12308_v46  ;;  %v486_v55 = vsub.f32 %v12106_v56, %v13903_v38  ;;  %v480_v61 = vsub.f32 %v12110_v58, %v13904_v39  ;;  %v12328_v34 = vand.u32 4294901760, %v76_v22 }
  0x80   :  { %v11186_v23 = vpack.c.bf16 %v469_v52, %v457_v27  ;;  %v475_v3 = vand.u32 4294901760, %v474_v1  ;;  %288 = vmatmul.mubr.f32.gmra.mrb[8].mxu0 %v12286_v13  ;;  %v492_v9 = vsub.f32 %v12112_v59, %v13907_v57  ;;  %v13910_v38 = vand.u32 4294901760, %v12122_v10  ;;  %v79_v13 = vld [vmem:[#allocation5 + $0x10] sm:$0xff] }
  0x81   :  { %14013 = vst [vmem:[#allocation56_spill] sm:$0xff] %v12319_v32  ;;  %14014 = vst [vmem:[#allocation57_spill] sm:$0xff] %v12328_v34  ;;  %v308_v5 = vsub.f32 %v12308_v46, %v12319_v32  ;;  %v487_v2 = vand.u32 4294901760, %v486_v55  ;;  %11183 = vmatpush1.bf16.msra.mxu0 %v11182_v48  ;;  %293 = vmatprep.mubr.f32.mxu0 %v14002_v21  ;;  %v481_v1 = vand.u32 4294901760, %v480_v61  ;;  %v13911_v52 = vand.u32 4294901760, %v12124_v11 }
  0x82   :  { %v12339_v27 = vsub.f32 %v76_v22, %v12328_v34  ;;  %v13912_v39 = vand.u32 4294901760, %v12129_v30  ;;  %11185 = vmatprep.subr.bf16.mxu0 %v11184_v0  ;;  %v493_v55 = vand.u32 4294901760, %v492_v9  ;;  %v498_v57 = vsub.f32 %v12122_v10, %v13910_v38 }
  0x83   :  { %v11188_v32 = vpack.c.bf16 %v487_v2, %v475_v3  ;;  %v510_v48 = vsub.f32 %v12124_v11, %v13911_v52  ;;  %v13917_v61 = vand.u32 4294901760, %v12131_v31  ;;  %v12357_v3 = vand.u32 4294901760, %v308_v5 }
  0x84   :  { %14015 = vst [vmem:[#allocation58_spill] sm:$0xff] %v12339_v27  ;;  %v12347_v46 = vand.u32 4294901760, %v12339_v27  ;;  %v504_v22 = vsub.f32 %v12129_v30, %v13912_v39  ;;  %299 = vmatmul.mubr.f32.gmra.mrb[10].mxu0 %v12312_v25  ;;  %v11190_v0 = vpack.c.bf16 %v493_v55, %v481_v1  ;;  %v499_v2 = vand.u32 4294901760, %v498_v57  ;;  %v12367_v57 = vld [vmem:[#allocation5 + $0x58] sm:$0xff] }
  0x85   :  { %14017 = vst [vmem:[#allocation60_spill] sm:$0xff] %v12357_v3  ;;  %11187 = vmatpush1.bf16.msra.mxu0 %v11186_v23  ;;  %304 = vmatprep.mubr.f32.mxu0 %v14002_v21  ;;  %v511_v38 = vand.u32 4294901760, %v510_v48  ;;  %v516_v39 = vsub.f32 %v12131_v31, %v13917_v61  ;;  %v1341_v1 = vand.u32 4294901760, %v79_v13  ;;  %v1344_v48 = vand.u32 4294901760, %v82_v43  ;;  %v97_v61 = vld [vmem:[#allocation5 + $0xa0] sm:$0xff] }
  0x86   :  { %14016 = vst [vmem:[#allocation59_spill] sm:$0xff] %v12347_v46  ;;  %v319_v9 = vsub.f32 %v12339_v27, %v12347_v46  ;;  %v505_v52 = vand.u32 4294901760, %v504_v22  ;;  %11189 = vmatprep.subr.bf16.mxu0 %v11188_v32  ;;  %v12373_v22 = vld [vmem:[#allocation5 + $0x70] sm:$0xff]  ;;  %v12375_v32 = vld [vmem:[#allocation5 + $0x88] sm:$0xff]  ;;  %v12393_v46 = vld [vmem:[#allocation5 + $0xb8] sm:$0xff]  ;;  %v11200_v27 = vpack.c.bf16 %v12039_v28, %v12036_v26  ;;  %v11210_v34 = vpack.c.bf16 %v12073_v6, %v12069_v63 }
  0x87   :  { %v11192_v25 = vpack.c.bf16 %v511_v38, %v499_v2  ;;  %v517_v5 = vand.u32 4294901760, %v516_v39  ;;  %v11196_v38 = vpack.c.bf16 %v12026_v18, %v12024_v17  ;;  %v1347_v39 = vand.u32 4294901760, %v12365_v4  ;;  %14021 = vst [vmem:[#allocation64_spill] sm:$0xff] %v12393_v46 }
  0x88   :  { %310 = vmatmul.mubr.f32.gmra.mrb[12].mxu0 %v12357_v3  ;;  %v12370_v23 = vand.u32 4294901760, %v319_v9  ;;  %v13922_v2 = vand.u32 4294901760, %v12367_v57  ;;  %v12381_v9 = vpack.c.bf16 %v1344_v48, %v1341_v1  ;;  %v12407_v3 = vld [vmem:[#allocation5 + $0xd0] sm:$0xff]  ;;  %v12426_v7 = vsub.f32 %v79_v13, %v1341_v1 }
  0x89   :  { %11191 = vmatpush1.bf16.msra.mxu0 %v11190_v0  ;;  %315 = vmatprep.mubr.f32.mxu0 %v14002_v21  ;;  %v11194_v55 = vpack.c.bf16 %v517_v5, %v505_v52  ;;  %v1353_v0 = vand.u32 4294901760, %v12373_v22  ;;  %v1356_v5 = vand.u32 4294901760, %v12375_v32  ;;  %v11214_v13 = vpack.c.bf16 %v12085_v15, %v12083_v14  ;;  %v12473_v15 = vld [vmem:[#allocation5 + $0x178] sm:$0xff] }
  0x8a   :  { %14018 = vst [vmem:[#allocation61_spill] sm:$0xff] %v12370_v23  ;;  %11193 = vmatprep.subr.bf16.mxu0 %v11192_v25  ;;  %14019 = vst [vmem:[#allocation62_spill] sm:$0xff] %v12381_v9  ;;  %v12386_v52 = vpack.c.bf16 %v13922_v2, %v1347_v39  ;;  %v11198_v25 = vpack.c.bf16 %v12032_v24, %v12028_v19  ;;  %11325 = vmatprep.subr.bf16.mxu1 %v12381_v9  ;;  %v1359_v2 = vand.u32 4294901760, %v97_v61  ;;  %vm5922_vm2 = vcmask 1041409  }
  0x8b   :  { %11327 = vmatpush3.bf16.msra.mxu1 %v12381_v9  ;;  %v11204_v9 = vpack.c.bf16 %v12053_v47, %v12049_v42  ;;  %v14027_v1 = vand.u32 4294901760, %v12407_v3  ;;  %vm5924_vm3 = vcmask 1042434   ;;  %vm5926_vm4 = vcmask 1043459  }
  0x8c   :  { %321 = vmatmul.mubr.f32.gmra.mrb[14].mxu0 %v12370_v23  ;;  %14020 = vst [vmem:[#allocation63_spill] sm:$0xff] %v12386_v52  ;;  %11329 = vmatprep.subr.bf16.mxu1 %v12386_v52  ;;  %v13941_v23 = vand.u32 4294901760, %v12393_v46  ;;  %v12493_v45 = vsub.f32 %v97_v61, %v1359_v2  ;;  %vm5929_vm5 = vcmask 60416   ;;  %vm7901_vm6 = vcmask 1043456  }
  0x8d   :  { %11195 = vmatpush1.bf16.msra.mxu0 %v11194_v55  ;;  %551 = vmatprep.mubr.f32.mxu0 %v14002_v21  ;;  %v12401_v55 = vpack.c.bf16 %v1356_v5, %v1353_v0 }
  0x8e   :  { %11197 = vmatprep.subr.bf16.mxu0 %v11196_v38  ;;  %v11202_v38 = vpack.c.bf16 %v12047_v41, %v12045_v40 }
  0x8f   :  { %14022 = vst [vmem:[#allocation65_spill] sm:$0xff] %v12401_v55  ;;  %11331 = vmatpush3.bf16.msra.mxu1 %v12386_v52  ;;  %v11206_v52 = vpack.c.bf16 %v12059_v51, %v12057_v49 }
  0x90   :  { %553 = vmatmul.mubr.f32.vlgmr.msra.gmra.mrb[0].mxu0 %v12115_v20  ;;  %11333 = vmatprep.subr.bf16.mxu1 %v12401_v55  ;;  %v11212_v20 = vpack.c.bf16 %v12079_v12, %v12077_v8 }
  0x91   :  { %11199 = vmatpush1.bf16.msra.mxu0 %v11198_v25  ;;  %558 = vmatprep.mubr.f32.mxu0 %v14002_v21  ;;  %v12418_v25 = vpack.c.bf16 %v13941_v23, %v1359_v2  ;;  %v11208_v23 = vpack.c.bf16 %v12067_v62, %v12061_v53  ;;  %v14041_v2 = vand.u32 4294901760, %v12049_v42 }
  0x92   :  { %11201 = vmatprep.subr.bf16.mxu0 %v11200_v27  ;;  %v12424_v27 = vld [vmem:[#allocation5 + $0x118] sm:$0xff] }
  0x93   :  { %14023 = vst [vmem:[#allocation66_spill] sm:$0xff] %v12418_v25  ;;  %11335 = vmatpush3.bf16.msra.mxu1 %v12401_v55  ;;  %v14028_v55 = vand.u32 4294901760, %v12409_v16 }
  0x94   :  { %560 = vmatmul.mubr.f32.gmra.mrb[2].mxu0 %v12147_v44  ;;  %v12431_v44 = vsub.f32 %v82_v43, %v1344_v48  ;;  %11337 = vmatprep.subr.bf16.mxu1 %v12418_v25  ;;  %v12462_v48 = vld [vmem:[#allocation5 + $0x130] sm:$0xff] }
  0x95   :  { %11203 = vmatpush1.bf16.msra.mxu0 %v11202_v38  ;;  %565 = vmatprep.mubr.f32.mxu0 %v14002_v21  ;;  %v14025_v38 = vand.u32 4294901760, %v12026_v18  ;;  %v12460_v43 = vpack.c.bf16 %v14028_v55, %v14027_v1  ;;  %v12466_v18 = vld [vmem:[#allocation5 + $0x160] sm:$0xff]  ;;  %v14030_v55 = vand.u32 4294901760, %v12367_v57 }
  0x96   :  { %11205 = vmatprep.subr.bf16.mxu0 %v11204_v9  ;;  %v14024_v9 = vand.u32 4294901760, %v12024_v17  ;;  %v12464_v17 = vld [vmem:[#allocation5 + $0x148] sm:$0xff] }
  0x97   :  { %14029 = vst [vmem:[#allocation68_spill] sm:$0xff] %v12460_v43  ;;  %v12479_v1 = vsub.f32 %v12367_v57, %v14030_v55  ;;  %v14034_v57 = vand.u32 4294901760, %v12039_v28  ;;  %11339 = vmatpush3.bf16.msra.mxu1 %v12418_v25  ;;  %v1380_v28 = vand.u32 4294901760, %v12464_v17 }
  0x98   :  { %v12450_v46 = vpack.c.bf16 %v14025_v38, %v14024_v9  ;;  %567 = vmatmul.mubr.f32.gmra.mrb[4].mxu0 %v12183_v60  ;;  %v12470_v38 = vsub.f32 %v12365_v4, %v1347_v39  ;;  %v14031_v9 = vand.u32 4294901760, %v12028_v19  ;;  %v14032_v4 = vand.u32 4294901760, %v12032_v24  ;;  %11341 = vmatprep.subr.bf16.mxu1 %v12460_v43 }
  0x99   :  { %11207 = vmatpush1.bf16.msra.mxu0 %v11206_v52  ;;  %572 = vmatprep.mubr.f32.mxu0 %v14002_v21  ;;  %v12491_v52 = vsub.f32 %v12375_v32, %v1356_v5  ;;  %v14033_v60 = vand.u32 4294901760, %v12036_v26  ;;  %v14036_v19 = vand.u32 4294901760, %v12047_v41  ;;  %v14037_v24 = vand.u32 4294901760, %v12422_v29 }
  0x9a   :  { %14026 = vst [vmem:[#allocation67_spill] sm:$0xff] %v12450_v46  ;;  %v12482_v46 = vsub.f32 %v12373_v22, %v1353_v0  ;;  %v12488_v39 = vpack.c.bf16 %v14032_v4, %v14031_v9  ;;  %11209 = vmatprep.subr.bf16.mxu0 %v11208_v23  ;;  %v14035_v22 = vand.u32 4294901760, %v12045_v40  ;;  %v14038_v23 = vand.u32 4294901760, %v12424_v27 }
  0x9b   :  { %v12499_v55 = vpack.c.bf16 %v14034_v57, %v14033_v60  ;;  %v1377_v26 = vand.u32 4294901760, %v12462_v48  ;;  %v1383_v60 = vand.u32 4294901760, %v12466_v18  ;;  %v1386_v40 = vand.u32 4294901760, %v12473_v15  ;;  %11343 = vmatpush3.bf16.msra.mxu1 %v12460_v43 }
  0x9c   :  { %v12505_v0 = vpack.c.bf16 %v14036_v19, %v14035_v22  ;;  %v12512_v61 = vpack.c.bf16 %v14038_v23, %v14037_v24  ;;  %574 = vmatmul.mubr.f32.gmra.mrb[6].mxu0 %v12202_v37  ;;  %v14040_v41 = vand.u32 4294901760, %v12426_v7  ;;  %v14042_v5 = vand.u32 4294901760, %v12053_v47 }
  0x9d   :  { %v14043_v4 = vand.u32 4294901760, %v12057_v49  ;;  %v14044_v57 = vand.u32 4294901760, %v12059_v51  ;;  %11211 = vmatpush1.bf16.msra.mxu0 %v11210_v34  ;;  %579 = vmatprep.mubr.f32.mxu0 %v14002_v21  ;;  %v14045_v19 = vand.u32 4294901760, %v12431_v44  ;;  %v13953_v23 = vand.u32 4294901760, %v12470_v38 }
  0x9e   :  { %14039 = vst [vmem:[#allocation69_spill] sm:$0xff] %v12512_v61  ;;  %v1505_v32 = vsub.f32 %v12426_v7, %v14040_v41  ;;  %v12527_v9 = vpack.c.bf16 %v14042_v5, %v14041_v2  ;;  %v13954_v42 = vand.u32 4294901760, %v12479_v1  ;;  %11213 = vmatprep.subr.bf16.mxu0 %v11212_v20  ;;  %v14046_v41 = vand.u32 4294901760, %v12061_v53  ;;  %11345 = vmatprep.subr.bf16.mxu1 %v12512_v61 }
  0x9f   :  { %v12533_v22 = vpack.c.bf16 %v14044_v57, %v14043_v4  ;;  %v1512_v24 = vsub.f32 %v12431_v44, %v14045_v19  ;;  %v14047_v34 = vand.u32 4294901760, %v12067_v62  ;;  %v14048_v5 = vand.u32 4294901760, %v12069_v63  ;;  %11347 = vmatpush3.bf16.msra.mxu1 %v12512_v61 }
  0xa0   :  { %v14049_v4 = vand.u32 4294901760, %v12073_v6  ;;  %v11220_v19 = vpack.c.bf16 %v12106_v56, %v12103_v54  ;;  %v11222_v20 = vpack.c.bf16 %v12112_v59, %v12110_v58  ;;  %v11224_v51 = vpack.c.bf16 %v12124_v11, %v12122_v10  ;;  %581 = vmatmul.mubr.f32.gmra.mrb[8].mxu0 %v12240_v33 }
  0xa1   :  { %v12548_v2 = vpack.c.bf16 %v14047_v34, %v14046_v41  ;;  %v12567_v62 = vpack.c.bf16 %v1380_v28, %v1377_v26  ;;  %v12569_v63 = vpack.c.bf16 %v1386_v40, %v1383_v60  ;;  %v1506_v6 = vand.u32 4294901760, %v1505_v32  ;;  %v14053_v41 = vld [vmem:[#allocation64_spill] sm:$0xff]  ;;  %11215 = vmatpush1.bf16.msra.mxu0 %v11214_v13  ;;  %586 = vmatprep.mubr.f32.mxu0 %v14002_v21 }
  0xa2   :  { %v12554_v57 = vpack.c.bf16 %v14049_v4, %v14048_v5  ;;  %v14054_v34 = vand.u32 4294901760, %v14053_v41  ;;  %v1513_v4 = vand.u32 4294901760, %v1512_v24  ;;  %v1519_v53 = vsub.f32 %v12470_v38, %v13953_v23 }
  0xa3   :  { %14051 = vst [vmem:[#allocation71_spill] sm:$0xff] %v12567_v62  ;;  %14052 = vst [vmem:[#allocation72_spill] sm:$0xff] %v12569_v63  ;;  %v1526_v49 = vsub.f32 %v12479_v1, %v13954_v42  ;;  %v14055_v47 = vand.u32 4294901760, %v12077_v8  ;;  %v14056_v32 = vand.u32 4294901760, %v12079_v12  ;;  %v14058_v13 = vpack.c.bf16 %v12093_v36, %v12091_v35  ;;  %11349 = vmatprep.subr.bf16.mxu1 %v12567_v62 }
  0xa4   :  { %14050 = vst [vmem:[#allocation70_spill] sm:$0xff] %v12554_v57  ;;  %v12574_v5 = vsub.f32 %v14053_v41, %v14054_v34  ;;  %v14059_v24 = vand.u32 4294901760, %v12482_v46  ;;  %v14060_v34 = vand.u32 4294901760, %v12491_v52  ;;  %v14061_v8 = vand.u32 4294901760, %v12493_v45  ;;  %v14069_v57 = vld [vmem:[#allocation49_spill] sm:$0xff]  ;;  %11351 = vmatpush3.bf16.msra.mxu1 %v12567_v62  ;;  %v14131_v62 = vld [vmem:[#allocation27_spill] sm:$0xff] }
  0xa5   :  { %v12587_v43 = vpack.c.bf16 %v14056_v32, %v14055_v47  ;;  %11217 = vmatprep.subr.bf16.mxu0 %v14058_v13  ;;  %v14062_v47 = vand.u32 4294901760, %v12407_v3  ;;  %v14063_v13 = vand.u32 4294901760, %v12409_v16  ;;  %588 = vmatmul.mubr.f32.gmra.mrb[10].mxu0 %v14069_v57 }
  0xa6   :  { %v12595_v41 = vsub.f32 %v12482_v46, %v14059_v24  ;;  %v12600_v23 = vsub.f32 %v12491_v52, %v14060_v34  ;;  %v12605_v12 = vsub.f32 %v12493_v45, %v14061_v8  ;;  %v14064_v34 = vand.u32 4294901760, %v12422_v29  ;;  %593 = vmatprep.mubr.f32.mxu0 %v14002_v21  ;;  %11353 = vmatprep.subr.bf16.mxu1 %v12569_v63 }
  0xa7   :  { %14057 = vst [vmem:[#allocation64_spill] sm:$0xff] %v12587_v43  ;;  %v12610_v32 = vsub.f32 %v12407_v3, %v14062_v47  ;;  %v12616_v24 = vsub.f32 %v12409_v16, %v14063_v13  ;;  %v14065_v8 = vand.u32 4294901760, %v12424_v27  ;;  %v14066_v3 = vand.u32 4294901760, %v12083_v14  ;;  %v14067_v47 = vld [vmem:[#allocation25_spill] sm:$0xff]  ;;  %v14072_v14 = vld [vmem:[#allocation28_spill] sm:$0xff] }
  0xa8   :  { %v12621_v42 = vsub.f32 %v12422_v29, %v14064_v34  ;;  %v14068_v43 = vand.u32 4294901760, %v14067_v47  ;;  %v12637_v16 = vsub.f32 %v12462_v48, %v1377_v26  ;;  %v12640_v29 = vsub.f32 %v12464_v17, %v1380_v28  ;;  %11355 = vmatpush3.bf16.msra.mxu1 %v12569_v63 }
  0xa9   :  { %v12626_v25 = vsub.f32 %v12424_v27, %v14065_v8  ;;  %v14070_v13 = vand.u32 4294901760, %v12091_v35  ;;  %v14071_v27 = vand.u32 4294901760, %v12093_v36  ;;  %v1553_v8 = vand.u32 4294901760, %v12574_v5 }
  0xaa   :  { %v12632_v61 = vpack.c.bf16 %v14068_v43, %v14066_v3  ;;  %v14073_v43 = vpack.c.bf16 %v12099_v50, %v14072_v14  ;;  %v12654_v48 = vsub.f32 %v12466_v18, %v1383_v60  ;;  %v12657_v17 = vsub.f32 %v12473_v15, %v1386_v40 }
  0xab   :  { %v12646_v34 = vpack.c.bf16 %v14071_v27, %v14070_v13  ;;  %v14074_v35 = vand.u32 4294901760, %v14072_v14  ;;  %v14075_v36 = vand.u32 4294901760, %v12099_v50  ;;  %v1520_v28 = vand.u32 4294901760, %v1519_v53 }
  0xac   :  { %11219 = vmatpush1.bf16.msra.mxu0 %v14073_v43  ;;  %v1527_v3 = vand.u32 4294901760, %v1526_v49  ;;  %v14076_v47 = vand.u32 4294901760, %v12103_v54  ;;  %v14077_v13 = vand.u32 4294901760, %v12106_v56  ;;  %v14078_v18 = vand.u32 4294901760, %v12110_v58 }
  0xad   :  { %v12663_v26 = vpack.c.bf16 %v14075_v36, %v14074_v35  ;;  %11221 = vmatprep.subr.bf16.mxu0 %v11220_v19  ;;  %v14079_v15 = vand.u32 4294901760, %v12112_v59  ;;  %v11356_v50 = vpack.c.bf16 %v1513_v4, %v1506_v6  ;;  %v1560_v40 = vand.u32 4294901760, %v12610_v32  ;;  %v14084_v59 = vld [vmem:[#allocation53_spill] sm:$0xff] }
  0xae   :  { %v12669_v27 = vpack.c.bf16 %v14077_v13, %v14076_v47  ;;  %v14080_v19 = vand.u32 4294901760, %v12122_v10  ;;  %v14081_v49 = vand.u32 4294901760, %v12124_v11  ;;  %v14082_v56 = vand.u32 4294901760, %v12129_v30  ;;  %595 = vmatmul.mubr.f32.gmra.mrb[12].mxu0 %v14084_v59 }
  0xaf   :  { %v12675_v60 = vpack.c.bf16 %v14079_v15, %v14078_v18  ;;  %v14083_v53 = vand.u32 4294901760, %v12131_v31  ;;  %v1567_v6 = vand.u32 4294901760, %v12616_v24  ;;  %v1574_v4 = vand.u32 4294901760, %v12621_v42  ;;  %600 = vmatprep.mubr.f32.mxu0 %v14002_v21  ;;  %11357 = vmatprep.subr.bf16.mxu1 %v11356_v50 }
  0xb0   :  { %v12683_v54 = vpack.c.bf16 %v14081_v49, %v14080_v19  ;;  %v1581_v10 = vand.u32 4294901760, %v12626_v25  ;;  %v1588_v11 = vand.u32 4294901760, %v12637_v16  ;;  %11223 = vmatpush1.bf16.msra.mxu0 %v11222_v20  ;;  %v1595_v14 = vand.u32 4294901760, %v12640_v29 }
  0xb1   :  { %v12689_v58 = vpack.c.bf16 %v14083_v53, %v14082_v56  ;;  %v14085_v36 = vand.u32 4294901760, %v12426_v7  ;;  %v14086_v47 = vand.u32 4294901760, %v12431_v44  ;;  %11225 = vmatprep.subr.bf16.mxu0 %v11224_v51  ;;  %v14088_v18 = vand.u32 4294901760, %v12470_v38 }
  0xb2   :  { %v14089_v15 = vand.u32 4294901760, %v12479_v1  ;;  %v14091_v19 = vand.u32 4294901760, %v12482_v46  ;;  %v14092_v49 = vand.u32 4294901760, %v12491_v52  ;;  %v14094_v53 = vand.u32 4294901760, %v12493_v45 }
  0xb3   :  { %v12705_v13 = vpack.c.bf16 %v14086_v47, %v14085_v36  ;;  %v12723_v43 = vpack.c.bf16 %v1567_v6, %v1560_v40  ;;  %v1554_v51 = vsub.f32 %v12574_v5, %v1553_v8  ;;  %v12727_v36 = vpack.c.bf16 %v1581_v10, %v1574_v4 }
  0xb4   :  { %v12711_v20 = vpack.c.bf16 %v14089_v15, %v14088_v18  ;;  %v12717_v56 = vpack.c.bf16 %v14092_v49, %v14091_v19  ;;  %v12721_v35 = vpack.c.bf16 %v1553_v8, %v14094_v53  ;;  %v12729_v47 = vpack.c.bf16 %v1595_v14, %v1588_v11  ;;  %v14102_v49 = vld [vmem:[#allocation57_spill] sm:$0xff] }
  0xb5   :  { %14087 = vst [vmem:[#allocation25_spill] sm:$0xff] %v12705_v13  ;;  %14096 = vst [vmem:[#allocation73_spill] sm:$0xff] %v12723_v43  ;;  %v14099_v18 = vand.u32 4294901760, %v12654_v48  ;;  %v14100_v15 = vand.u32 4294901760, %v12657_v17  ;;  %602 = vmatmul.mubr.f32.gmra.mrb[14].mxu0 %v14102_v49  ;;  %v11360_v53 = vpack.c.bf16 %v1527_v3, %v1520_v28  ;;  %v1534_v43 = vand.u32 4294901760, %v12595_v41  ;;  %v14107_v28 = vld [vmem:[#allocation34_spill] sm:$0xff] }
  0xb6   :  { %14090 = vst [vmem:[#allocation49_spill] sm:$0xff] %v12711_v20  ;;  %14093 = vst [vmem:[#allocation28_spill] sm:$0xff] %v12717_v56  ;;  %v14103_v8 = vpack.c.bf16 %v12131_v31, %v12129_v30  ;;  %736 = vmatprep.mubr.f32.mxu0 %v14002_v21  ;;  %v1561_v41 = vsub.f32 %v12610_v32, %v1560_v40  ;;  %v1568_v30 = vsub.f32 %v12616_v24, %v1567_v6  ;;  %v14108_v31 = vld [vmem:[#allocation16_spill] sm:$0xff]  ;;  %v14109_v3 = vld [vmem:[#allocation17_spill] sm:$0xff] }
  0xb7   :  { %14095 = vst [vmem:[#allocation53_spill] sm:$0xff] %v12721_v35  ;;  %14097 = vst [vmem:[#allocation74_spill] sm:$0xff] %v12727_v36  ;;  %v12735_v19 = vpack.c.bf16 %v14100_v15, %v14099_v18  ;;  %v1541_v35 = vand.u32 4294901760, %v12600_v23  ;;  %v14105_v36 = vld [vmem:[#allocation40_spill] sm:$0xff]  ;;  %v1548_v18 = vand.u32 4294901760, %v12605_v12  ;;  %v1555_v15 = vand.u32 4294901760, %v1554_v51 }
  0xb8   :  { %14098 = vst [vmem:[#allocation75_spill] sm:$0xff] %v12729_v47  ;;  %11227 = vmatpush1.bf16.msra.mxu0 %v14103_v8  ;;  %v14104_v47 = vld [vmem:[#allocation15_spill] sm:$0xff]  ;;  %10421 = vmatmul.mubr.f32.vlgmr.msra.gmra.mrb[0].mxu1 %v14105_v36  ;;  %v14112_v36 = vld [vmem:[#allocation37_spill] sm:$0xff]  ;;  %v1575_v40 = vsub.f32 %v12621_v42, %v1574_v4  ;;  %v1582_v6 = vsub.f32 %v12626_v25, %v1581_v10  ;;  %v14125_v13 = vld [vmem:[#allocation22_spill] sm:$0xff] }
  0xb9   :  { %14101 = vst [vmem:[#allocation76_spill] sm:$0xff] %v12735_v19  ;;  %11229 = vmatprep.subr.bf16.mxu0 %v14104_v47  ;;  %11359 = vmatpush3.bf16.msra.mxu1 %v11356_v50  ;;  %v14106_v19 = vld [vmem:[#allocation45_spill] sm:$0xff]  ;;  %v11364_v23 = vpack.c.bf16 %v1541_v35, %v1534_v43  ;;  %v14110_v50 = vld [vmem:[#allocation46_spill] sm:$0xff]  ;;  %v11368_v12 = vpack.c.bf16 %v1555_v15, %v1548_v18  ;;  %v14111_v51 = vld [vmem:[#allocation51_spill] sm:$0xff]  ;;  %v1562_v43 = vand.u32 4294901760, %v1561_v41  ;;  %v1569_v35 = vand.u32 4294901760, %v1568_v30 }
  0xba   :  { %10423 = vmatprep.mubr.f32.mxu1 %v14106_v19  ;;  %11361 = vmatprep.subr.bf16.mxu1 %v11360_v53  ;;  %v14113_v19 = vld [vmem:[#allocation18_spill] sm:$0xff]  ;;  %v14114_v8 = vld [vmem:[#allocation19_spill] sm:$0xff]  ;;  %v14116_v18 = vld [vmem:[#allocation60_spill] sm:$0xff]  ;;  %v1576_v4 = vand.u32 4294901760, %v1575_v40  ;;  %v1583_v30 = vand.u32 4294901760, %v1582_v6  ;;  %v1596_v10 = vsub.f32 %v12640_v29, %v1595_v14  ;;  %v14123_v40 = vand.u32 4294901760, %v12654_v48 }
  0xbb   :  { %739 = vmatmul.mubr.f32.vlgmr.msra.gmra.mrb[0].mxu0 %v14107_v28  ;;  %v14117_v15 = vld [vmem:[#allocation41_spill] sm:$0xff]  ;;  %v11372_v41 = vpack.c.bf16 %v1569_v35, %v1562_v43  ;;  %v14124_v6 = vand.u32 4294901760, %v12657_v17 }
  0xbc   :  { %11231 = vmatpush1.bf16.msra.mxu0 %v14108_v31  ;;  %744 = vmatprep.mubr.f32.mxu0 %v14002_v21  ;;  %v14119_v56 = vld [vmem:[#allocation21_spill] sm:$0xff]  ;;  %v11376_v43 = vpack.c.bf16 %v1583_v30, %v1576_v4  ;;  %v1597_v35 = vand.u32 4294901760, %v1596_v10  ;;  %v1603_v14 = vsub.f32 %v12654_v48, %v14123_v40  ;;  %v14129_v40 = vld [vmem:[#allocation26_spill] sm:$0xff] }
  0xbd   :  { %11233 = vmatprep.subr.bf16.mxu0 %v14109_v3  ;;  %10424 = vmatmul.mubr.f32.gmra.mrb[2].mxu1 %v14110_v50  ;;  %v14115_v50 = vld [vmem:[#allocation55_spill] sm:$0xff]  ;;  %v1610_v20 = vsub.f32 %v12657_v17, %v14124_v6  ;;  %v14130_v6 = vld [vmem:[#allocation50_spill] sm:$0xff] }
  0xbe   :  { %11363 = vmatpush3.bf16.msra.mxu1 %v11360_v53  ;;  %10426 = vmatprep.mubr.f32.mxu1 %v14111_v51  ;;  %v1589_v53 = vsub.f32 %v12637_v16, %v1588_v11  ;;  %v14118_v51 = vld [vmem:[#allocation20_spill] sm:$0xff]  ;;  %v1604_v30 = vand.u32 4294901760, %v1603_v14  ;;  %v14136_v14 = vld [vmem:[#allocation58_spill] sm:$0xff] }
  0xbf   :  { %747 = vmatmul.mubr.f32.gmra.mrb[2].mxu0 %v14112_v36  ;;  %11365 = vmatprep.subr.bf16.mxu1 %v11364_v23  ;;  %v1611_v10 = vand.u32 4294901760, %v1610_v20  ;;  %v11388_v20 = vpack.c.bf16 %v12431_v44, %v12426_v7  ;;  %v14139_v44 = vld [vmem:[#allocation35_spill] sm:$0xff] }
  0xc0   :  { %11235 = vmatpush1.bf16.msra.mxu0 %v14113_v19  ;;  %752 = vmatprep.mubr.f32.mxu0 %v14002_v21  ;;  %v1590_v11 = vand.u32 4294901760, %v1589_v53  ;;  %v14127_v53 = vld [vmem:[#allocation47_spill] sm:$0xff] }
  0xc1   :  { %11237 = vmatprep.subr.bf16.mxu0 %v14114_v8  ;;  %10427 = vmatmul.mubr.f32.gmra.mrb[4].mxu1 %v14115_v50  ;;  %v14120_v50 = vld [vmem:[#allocation61_spill] sm:$0xff]  ;;  %v11384_v63 = vpack.c.bf16 %v1611_v10, %v1604_v30  ;;  %v11392_v30 = vpack.c.bf16 %v12479_v1, %v12470_v38  ;;  %v14138_v10 = vld [vmem:[#allocation67_spill] sm:$0xff]  ;;  %v14142_v38 = vld [vmem:[#allocation38_spill] sm:$0xff]  ;;  %v11400_v1 = vpack.c.bf16 %v12574_v5, %v12493_v45 }
  0xc2   :  { %11367 = vmatpush3.bf16.msra.mxu1 %v11364_v23  ;;  %10429 = vmatprep.mubr.f32.mxu1 %v14116_v18  ;;  %v14121_v23 = vld [vmem:[#allocation31_spill] sm:$0xff]  ;;  %v11380_v4 = vpack.c.bf16 %v1597_v35, %v1590_v11  ;;  %v14133_v11 = vld [vmem:[#allocation54_spill] sm:$0xff]  ;;  %v14144_v45 = vld [vmem:[#allocation44_spill] sm:$0xff] }
  0xc3   :  { %755 = vmatmul.mubr.f32.gmra.mrb[4].mxu0 %v14117_v15  ;;  %11369 = vmatprep.subr.bf16.mxu1 %v11368_v12  ;;  %v14122_v18 = vld [vmem:[#allocation43_spill] sm:$0xff]  ;;  %v14134_v35 = vld [vmem:[#allocation30_spill] sm:$0xff] }
  0xc4   :  { %11239 = vmatpush1.bf16.msra.mxu0 %v14118_v51  ;;  %760 = vmatprep.mubr.f32.mxu0 %v14002_v21  ;;  %v14140_v7 = vld [vmem:[#allocation39_spill] sm:$0xff]  ;;  %v14151_v5 = vld [vmem:[#allocation62_spill] sm:$0xff] }
  0xc5   :  { %11241 = vmatprep.subr.bf16.mxu0 %v14119_v56  ;;  %10430 = vmatmul.mubr.f32.gmra.mrb[6].mxu1 %v14120_v50  ;;  %v14128_v50 = vld [vmem:[#allocation24_spill] sm:$0xff] }
  0xc6   :  { %11371 = vmatpush3.bf16.msra.mxu1 %v11368_v12  ;;  %10464 = vmatprep.mubr.f32.mxu1 %v14121_v23  ;;  %v14126_v12 = vld [vmem:[#allocation23_spill] sm:$0xff] }
  0xc7   :  { %763 = vmatmul.mubr.f32.gmra.mrb[6].mxu0 %v14122_v18  ;;  %11373 = vmatprep.subr.bf16.mxu1 %v11372_v41 }
  0xc8   :  { %11243 = vmatpush1.bf16.msra.mxu0 %v14125_v13  ;;  %768 = vmatprep.mubr.f32.mxu0 %v14002_v21 }
  0xc9   :  { %11245 = vmatprep.subr.bf16.mxu0 %v14126_v12 }
  0xca   :  { %11375 = vmatpush3.bf16.msra.mxu1 %v11372_v41  ;;  %v14132_v41 = vld [vmem:[#allocation29_spill] sm:$0xff] }
  0xcb   :  { %771 = vmatmul.mubr.f32.gmra.mrb[8].mxu0 %v14127_v53  ;;  %11377 = vmatprep.subr.bf16.mxu1 %v11376_v43 }
  0xcc   :  { %11247 = vmatpush1.bf16.msra.mxu0 %v14128_v50  ;;  %776 = vmatprep.mubr.f32.mxu0 %v14002_v21 }
  0xcd   :  { %11249 = vmatprep.subr.bf16.mxu0 %v14129_v40 }
  0xce   :  { %11379 = vmatpush3.bf16.msra.mxu1 %v11376_v43  ;;  %v14135_v43 = vld [vmem:[#allocation32_spill] sm:$0xff] }
  0xcf   :  { %779 = vmatmul.mubr.f32.gmra.mrb[10].mxu0 %v14130_v6  ;;  %11381 = vmatprep.subr.bf16.mxu1 %v11380_v4 }
  0xd0   :  { %11251 = vmatpush1.bf16.msra.mxu0 %v14131_v62  ;;  %784 = vmatprep.mubr.f32.mxu0 %v14002_v21 }
  0xd1   :  { %11253 = vmatprep.subr.bf16.mxu0 %v14132_v41 }
  0xd2   :  { %11383 = vmatpush3.bf16.msra.mxu1 %v11380_v4  ;;  %v14137_v4 = vld [vmem:[#allocation33_spill] sm:$0xff] }
  0xd3   :  { %787 = vmatmul.mubr.f32.gmra.mrb[12].mxu0 %v14133_v11  ;;  %11385 = vmatprep.subr.bf16.mxu1 %v11384_v63 }
  0xd4   :  { %11255 = vmatpush1.bf16.msra.mxu0 %v14134_v35  ;;  %792 = vmatprep.mubr.f32.mxu0 %v14002_v21  ;;  %v14141_v35 = vld [vmem:[#allocation36_spill] sm:$0xff] }
  0xd5   :  { %11257 = vmatprep.subr.bf16.mxu0 %v14135_v43 }
  0xd6   :  { %11387 = vmatpush3.bf16.msra.mxu1 %v11384_v63  ;;  %v11396_v63 = vpack.c.bf16 %v12491_v52, %v12482_v46  ;;  %v14143_v46 = vld [vmem:[#allocation42_spill] sm:$0xff]  ;;  %v11408_v52 = vpack.c.bf16 %v12626_v25, %v12621_v42  ;;  %v14148_v25 = vld [vmem:[#allocation52_spill] sm:$0xff]  ;;  %v11416_v42 = vpack.c.bf16 %v12657_v17, %v12654_v48  ;;  %v14157_v48 = vld [vmem:[#allocation71_spill] sm:$0xff] }
  0xd7   :  { %795 = vmatmul.mubr.f32.gmra.mrb[14].mxu0 %v14136_v14  ;;  %11389 = vmatprep.subr.bf16.mxu1 %v11388_v20  ;;  %v14158_v17 = vld [vmem:[#allocation72_spill] sm:$0xff] }
  0xd8   :  { %11259 = vmatpush1.bf16.msra.mxu0 %v14137_v4  ;;  %897 = vmatprep.mubr.f32.mxu0 %v14002_v21 }
  0xd9   :  { %11261 = vmatprep.subr.bf16.mxu0 %v14138_v10  ;;  %10465 = vmatmul.mubr.f32.vlgmr.msra.gmra.mrb[0].mxu1 %v14139_v44 }
  0xda   :  { %11391 = vmatpush3.bf16.msra.mxu1 %v11388_v20  ;;  %10467 = vmatprep.mubr.f32.mxu1 %v14140_v7 }
  0xdb   :  { %901 = vmatmul.mubr.f32.vlgmr.msra.gmra.mrb[0].mxu0 %v14141_v35  ;;  %11393 = vmatprep.subr.bf16.mxu1 %v11392_v30 }
  0xdc   :  { %11263 = vmatpush1.bf16.msra.mxu0 %v12488_v39  ;;  %906 = vmatprep.mubr.f32.mxu0 %v14002_v21  ;;  %v11404_v39 = vpack.c.bf16 %v12616_v24, %v12610_v32  ;;  %v14152_v32 = vld [vmem:[#allocation63_spill] sm:$0xff]  ;;  %v14153_v24 = vld [vmem:[#allocation65_spill] sm:$0xff] }
  0xdd   :  { %11265 = vmatprep.subr.bf16.mxu0 %v12499_v55  ;;  %10468 = vmatmul.mubr.f32.gmra.mrb[2].mxu1 %v12202_v37  ;;  %v14145_v55 = vld [vmem:[#allocation70_spill] sm:$0xff] }
  0xde   :  { %11395 = vmatpush3.bf16.msra.mxu1 %v11392_v30  ;;  %10470 = vmatprep.mubr.f32.mxu1 %v12240_v33 }
  0xdf   :  { %910 = vmatmul.mubr.f32.gmra.mrb[2].mxu0 %v14142_v38  ;;  %11397 = vmatprep.subr.bf16.mxu1 %v11396_v63 }
  0xe0   :  { %11267 = vmatpush1.bf16.msra.mxu0 %v12505_v0  ;;  %915 = vmatprep.mubr.f32.mxu0 %v14002_v21  ;;  %v14146_v0 = vld [vmem:[#allocation64_spill] sm:$0xff] }
  0xe1   :  { %11269 = vmatprep.subr.bf16.mxu0 %v12527_v9  ;;  %10471 = vmatmul.mubr.f32.gmra.mrb[4].mxu1 %v14069_v57  ;;  %v14147_v9 = vld [vmem:[#allocation48_spill] sm:$0xff] }
  0xe2   :  { %11399 = vmatpush3.bf16.msra.mxu1 %v11396_v63  ;;  %10473 = vmatprep.mubr.f32.mxu1 %v14084_v59 }
  0xe3   :  { %919 = vmatmul.mubr.f32.gmra.mrb[4].mxu0 %v14143_v46  ;;  %11401 = vmatprep.subr.bf16.mxu1 %v11400_v1 }
  0xe4   :  { %11271 = vmatpush1.bf16.msra.mxu0 %v12533_v22  ;;  %924 = vmatprep.mubr.f32.mxu0 %v14002_v21  ;;  %v11412_v22 = vpack.c.bf16 %v12640_v29, %v12637_v16  ;;  %v14154_v16 = vld [vmem:[#allocation66_spill] sm:$0xff]  ;;  %v14155_v29 = vld [vmem:[#allocation68_spill] sm:$0xff] }
  0xe5   :  { %11273 = vmatprep.subr.bf16.mxu0 %v12548_v2  ;;  %10474 = vmatmul.mubr.f32.gmra.mrb[6].mxu1 %v14102_v49  ;;  %v14149_v2 = vld [vmem:[#allocation56_spill] sm:$0xff] }
  0xe6   :  { %11403 = vmatpush3.bf16.msra.mxu1 %v11400_v1  ;;  %10508 = vmatprep.mubr.f32.mxu1 %v14107_v28  ;;  %v127_v28 = vlaneseq }
  0xe7   :  { %928 = vmatmul.mubr.f32.gmra.mrb[6].mxu0 %v14144_v45  ;;  %11405 = vmatprep.subr.bf16.mxu1 %v11404_v39 }
  0xe8   :  { %11275 = vmatpush1.bf16.msra.mxu0 %v14145_v55  ;;  %933 = vmatprep.mubr.f32.mxu0 %v14002_v21 }
  0xe9   :  { %11277 = vmatprep.subr.bf16.mxu0 %v14146_v0 }
  0xea   :  { %11407 = vmatpush3.bf16.msra.mxu1 %v11404_v39 }
  0xeb   :  { %937 = vmatmul.mubr.f32.gmra.mrb[8].mxu0 %v14147_v9  ;;  %11409 = vmatprep.subr.bf16.mxu1 %v11408_v52 }
  0xec   :  { %11279 = vmatpush1.bf16.msra.mxu0 %v12632_v61  ;;  %942 = vmatprep.mubr.f32.mxu0 %v14002_v21  ;;  %v14150_v61 = vld [vmem:[#allocation59_spill] sm:$0xff] }
  0xed   :  { %11281 = vmatprep.subr.bf16.mxu0 %v12646_v34  ;;  %v14156_v34 = vld [vmem:[#allocation69_spill] sm:$0xff] }
  0xee   :  { %11411 = vmatpush3.bf16.msra.mxu1 %v11408_v52 }
  0xef   :  { %946 = vmatmul.mubr.f32.gmra.mrb[10].mxu0 %v14148_v25  ;;  %11413 = vmatprep.subr.bf16.mxu1 %v11412_v22 }
  0xf0   :  { %11283 = vmatpush1.bf16.msra.mxu0 %v12663_v26  ;;  %951 = vmatprep.mubr.f32.mxu0 %v14002_v21  ;;  %v14159_v26 = vld [vmem:[#allocation30_spill] sm:$0xff] }
  0xf1   :  { %11285 = vmatprep.subr.bf16.mxu0 %v12669_v27  ;;  %v14161_v27 = vld [vmem:[#allocation49_spill] sm:$0xff] }
  0xf2   :  { %11415 = vmatpush3.bf16.msra.mxu1 %v11412_v22 }
  0xf3   :  { %955 = vmatmul.mubr.f32.gmra.mrb[12].mxu0 %v14149_v2  ;;  %11417 = vmatprep.subr.bf16.mxu1 %v11416_v42 }
  0xf4   :  { %11287 = vmatpush1.bf16.msra.mxu0 %v12675_v60  ;;  %960 = vmatprep.mubr.f32.mxu0 %v14002_v21  ;;  %v14162_v60 = vld [vmem:[#allocation28_spill] sm:$0xff] }
  0xf5   :  { %11289 = vmatprep.subr.bf16.mxu0 %v12683_v54  ;;  %v14163_v54 = vld [vmem:[#allocation53_spill] sm:$0xff] }
  0xf6   :  { %11419 = vmatpush3.bf16.msra.mxu1 %v11416_v42 }
  0xf7   :  { %964 = vmatmul.mubr.f32.gmra.mrb[14].mxu0 %v14150_v61  ;;  %11421 = vmatprep.subr.bf16.mxu1 %v14151_v5 }
  0xf8   :  { %11291 = vmatpush1.bf16.msra.mxu0 %v12689_v58  ;;  %1130 = vmatprep.mubr.f32.mxu0 %v14002_v21  ;;  %v14164_v58 = vld [vmem:[#allocation73_spill] sm:$0xff] }
  0xf9   :  { %11293 = vmatprep.subr.bf16.mxu0 %v14104_v47  ;;  %10509 = vmatmul.mubr.f32.vlgmr.msra.gmra.mrb[0].mxu1 %v14112_v36  ;;  %v14167_v47 = vld [vmem:[#allocation76_spill] sm:$0xff] }
  0xfa   :  { %11423 = vmatpush3.bf16.msra.mxu1 %v14151_v5  ;;  %10511 = vmatprep.mubr.f32.mxu1 %v14117_v15 }
  0xfb   :  { %1132 = vmatmul.mubr.f32.vlgmr.msra.gmra.mrb[0].mxu0 %v14121_v23  ;;  %11425 = vmatprep.subr.bf16.mxu1 %v14152_v32 }
  0xfc   :  { %11295 = vmatpush1.bf16.msra.mxu0 %v14108_v31  ;;  %1137 = vmatprep.mubr.f32.mxu0 %v14002_v21  ;;  %v12986_v31 = vshrl.u32 %v127_v28, 7 }
  0xfd   :  { %11297 = vmatprep.subr.bf16.mxu0 %v14109_v3  ;;  %10512 = vmatmul.mubr.f32.gmra.mrb[2].mxu1 %v14122_v18 }
  0xfe   :  { %11427 = vmatpush3.bf16.msra.mxu1 %v14152_v32  ;;  %10514 = vmatprep.mubr.f32.mxu1 %v14127_v53 }
  0xff   :  { %1139 = vmatmul.mubr.f32.gmra.mrb[2].mxu0 %v14139_v44  ;;  %11429 = vmatprep.subr.bf16.mxu1 %v14153_v24 }
 0x100   :  { %11299 = vmatpush1.bf16.msra.mxu0 %v14113_v19  ;;  %1144 = vmatprep.mubr.f32.mxu0 %v14002_v21 }
 0x101   :  { %11301 = vmatprep.subr.bf16.mxu0 %v14114_v8  ;;  %10515 = vmatmul.mubr.f32.gmra.mrb[4].mxu1 %v14130_v6 }
 0x102   :  { %11431 = vmatpush3.bf16.msra.mxu1 %v14153_v24  ;;  %10517 = vmatprep.mubr.f32.mxu1 %v14133_v11 }
 0x103   :  { %1146 = vmatmul.mubr.f32.gmra.mrb[4].mxu0 %v14140_v7  ;;  %11433 = vmatprep.subr.bf16.mxu1 %v14154_v16 }
 0x104   :  { %11303 = vmatpush1.bf16.msra.mxu0 %v14118_v51  ;;  %1151 = vmatprep.mubr.f32.mxu0 %v14002_v21 }
 0x105   :  { %11305 = vmatprep.subr.bf16.mxu0 %v14119_v56  ;;  %10518 = vmatmul.mubr.f32.gmra.mrb[6].mxu1 %v14136_v14  ;;  %v14166_v56 = vld [vmem:[#allocation75_spill] sm:$0xff] }
 0x106   :  { %11435 = vmatpush3.bf16.msra.mxu1 %v14154_v16  ;;  %10552 = vmatprep.mubr.f32.mxu1 %v14141_v35 }
 0x107   :  { %1153 = vmatmul.mubr.f32.gmra.mrb[6].mxu0 %v12202_v37  ;;  %11437 = vmatprep.subr.bf16.mxu1 %v14155_v29 }
 0x108   :  { %11307 = vmatpush1.bf16.msra.mxu0 %v14125_v13  ;;  %1158 = vmatprep.mubr.f32.mxu0 %v14002_v21  ;;  %v14165_v13 = vld [vmem:[#allocation74_spill] sm:$0xff] }
 0x109   :  { %11309 = vmatprep.subr.bf16.mxu0 %v14126_v12 }
 0x10a   :  { %11439 = vmatpush3.bf16.msra.mxu1 %v14155_v29 }
 0x10b   :  { %1160 = vmatmul.mubr.f32.gmra.mrb[8].mxu0 %v12240_v33  ;;  %11441 = vmatprep.subr.bf16.mxu1 %v14156_v34 }
 0x10c   :  { %11311 = vmatpush1.bf16.msra.mxu0 %v14128_v50  ;;  %1165 = vmatprep.mubr.f32.mxu0 %v14002_v21 }
 0x10d   :  { %11313 = vmatprep.subr.bf16.mxu0 %v14129_v40 }
 0x10e   :  { %11443 = vmatpush3.bf16.msra.mxu1 %v14156_v34 }
 0x10f   :  { %1167 = vmatmul.mubr.f32.gmra.mrb[10].mxu0 %v14069_v57  ;;  %11445 = vmatprep.subr.bf16.mxu1 %v14157_v48 }
 0x110   :  { %11315 = vmatpush1.bf16.msra.mxu0 %v14131_v62  ;;  %1172 = vmatprep.mubr.f32.mxu0 %v14002_v21  ;;  %v14160_v62 = vld [vmem:[#allocation25_spill] sm:$0xff] }
 0x111   :  { %11317 = vmatprep.subr.bf16.mxu0 %v14132_v41 }
 0x112   :  { %11447 = vmatpush3.bf16.msra.mxu1 %v14157_v48 }
 0x113   :  { %1174 = vmatmul.mubr.f32.gmra.mrb[12].mxu0 %v14084_v59  ;;  %11449 = vmatprep.subr.bf16.mxu1 %v14158_v17 }
 0x114   :  { %11319 = vmatpush1.bf16.msra.mxu0 %v14159_v26  ;;  %1179 = vmatprep.mubr.f32.mxu0 %v14002_v21 }
 0x115   :  { %11321 = vmatprep.subr.bf16.mxu0 %v14135_v43 }
 0x116   :  { %11451 = vmatpush3.bf16.msra.mxu1 %v14158_v17 }
 0x117   :  { %1181 = vmatmul.mubr.f32.gmra.mrb[14].mxu0 %v14102_v49  ;;  %11453 = vmatprep.subr.bf16.mxu1 %v14160_v62 }
 0x118   :  { %11323 = vmatpush1.bf16.msra.mxu0 %v14137_v4  ;;  %1283 = vmatprep.mubr.f32.mxu0 %v14002_v21 }
 0x119   :  { %10553 = vmatmul.mubr.f32.vlgmr.msra.gmra.mrb[0].mxu1 %v14142_v38  ;;  %10682 = vmatprep.subr.mxu0 %v14002_v21 }
 0x11a   :  { %11455 = vmatpush3.bf16.msra.mxu1 %v14160_v62  ;;  %10555 = vmatprep.mubr.f32.mxu1 %v14143_v46 }
 0x11b   :  { %1285 = vmatmul.mubr.f32.vlgmr.msra.gmra.mrb[0].mxu0 %v14121_v23  ;;  %11457 = vmatprep.subr.bf16.mxu1 %v14161_v27 }
 0x11c   :  { %1290 = vmatprep.mubr.f32.mxu0 %v14002_v21 }
 0x11d   :  { %10556 = vmatmul.mubr.f32.gmra.mrb[2].mxu1 %v14144_v45 }
 0x11e   :  { %11459 = vmatpush3.bf16.msra.mxu1 %v14161_v27  ;;  %10558 = vmatprep.mubr.f32.mxu1 %v14147_v9 }
 0x11f   :  { %1292 = vmatmul.mubr.f32.gmra.mrb[2].mxu0 %v14139_v44  ;;  %11461 = vmatprep.subr.bf16.mxu1 %v14162_v60 }
 0x120   :  { %1297 = vmatprep.mubr.f32.mxu0 %v14002_v21 }
 0x121   :  { %10559 = vmatmul.mubr.f32.gmra.mrb[4].mxu1 %v14148_v25 }
 0x122   :  { %11463 = vmatpush3.bf16.msra.mxu1 %v14162_v60  ;;  %10561 = vmatprep.mubr.f32.mxu1 %v14149_v2 }
 0x123   :  { %1299 = vmatmul.mubr.f32.gmra.mrb[4].mxu0 %v14140_v7  ;;  %11465 = vmatprep.subr.bf16.mxu1 %v14163_v54 }
 0x124   :  { %1304 = vmatprep.mubr.f32.mxu0 %v14002_v21 }
 0x125   :  { %10562 = vmatmul.mubr.f32.gmra.mrb[6].mxu1 %v14150_v61 }
 0x126   :  { %11467 = vmatpush3.bf16.msra.mxu1 %v14163_v54  ;;  %10596 = vmatprep.mubr.f32.mxu1 %v14121_v23 }
 0x127   :  { %1306 = vmatmul.mubr.f32.gmra.mrb[6].mxu0 %v12202_v37  ;;  %11469 = vmatprep.subr.bf16.mxu1 %v14164_v58 }
 0x128   :  { %1311 = vmatprep.mubr.f32.mxu0 %v14002_v21 }
 0x12a   :  { %11471 = vmatpush3.bf16.msra.mxu1 %v14164_v58 }
 0x12b   :  { %1313 = vmatmul.mubr.f32.gmra.mrb[8].mxu0 %v12240_v33  ;;  %11473 = vmatprep.subr.bf16.mxu1 %v14165_v13 }
 0x12c   :  { %1318 = vmatprep.mubr.f32.mxu0 %v14002_v21 }
 0x12e   :  { %11475 = vmatpush3.bf16.msra.mxu1 %v14165_v13 }
 0x12f   :  { %1320 = vmatmul.mubr.f32.gmra.mrb[10].mxu0 %v14069_v57  ;;  %11477 = vmatprep.subr.bf16.mxu1 %v14166_v56 }
 0x130   :  { %1325 = vmatprep.mubr.f32.mxu0 %v14002_v21 }
 0x132   :  { %11479 = vmatpush3.bf16.msra.mxu1 %v14166_v56 }
 0x133   :  { %1327 = vmatmul.mubr.f32.gmra.mrb[12].mxu0 %v14084_v59  ;;  %11481 = vmatprep.subr.bf16.mxu1 %v14167_v47 }
 0x134   :  { %1332 = vmatprep.mubr.f32.mxu0 %v14002_v21 }
 0x136   :  { %11483 = vmatpush3.bf16.msra.mxu1 %v14167_v47 }
 0x137   :  { %1334 = vmatmul.mubr.f32.gmra.mrb[14].mxu0 %v14102_v49  ;;  %11485 = vmatprep.subr.bf16.mxu1 %v14151_v5 }
 0x138   :  { %10684 = vmatprep.mubr.msk.f32.mxu0 %vm11943_vm0, %v14002_v21 }
 0x139   :  { %10597 = vmatmul.mubr.f32.vlgmr.msra.gmra.mrb[0].mxu1 %v14139_v44 }
 0x13a   :  { %11487 = vmatpush3.bf16.msra.mxu1 %v14151_v5  ;;  %10599 = vmatprep.mubr.f32.mxu1 %v14140_v7 }
 0x13b   :  { %11489 = vmatprep.subr.bf16.mxu1 %v14152_v32 }
 0x13d   :  { %10600 = vmatmul.mubr.f32.gmra.mrb[2].mxu1 %v12202_v37 }
 0x13e   :  { %11491 = vmatpush3.bf16.msra.mxu1 %v14152_v32  ;;  %10602 = vmatprep.mubr.f32.mxu1 %v12240_v33 }
 0x13f   :  { %11493 = vmatprep.subr.bf16.mxu1 %v14153_v24 }
 0x141   :  { %10603 = vmatmul.mubr.f32.gmra.mrb[4].mxu1 %v14069_v57 }
 0x142   :  { %11495 = vmatpush3.bf16.msra.mxu1 %v14153_v24  ;;  %10605 = vmatprep.mubr.f32.mxu1 %v14084_v59 }
 0x143   :  { %11497 = vmatprep.subr.bf16.mxu1 %v14154_v16 }
 0x145   :  { %10606 = vmatmul.mubr.f32.gmra.mrb[6].mxu1 %v14102_v49 }
 0x146   :  { %11499 = vmatpush3.bf16.msra.mxu1 %v14154_v16  ;;  %10640 = vmatprep.mubr.f32.mxu1 %v14121_v23 }
 0x147   :  { %11501 = vmatprep.subr.bf16.mxu1 %v14155_v29 }
 0x14a   :  { %11503 = vmatpush3.bf16.msra.mxu1 %v14155_v29 }
 0x14b   :  { %11505 = vmatprep.subr.bf16.mxu1 %v14156_v34 }
 0x14e   :  { %11507 = vmatpush3.bf16.msra.mxu1 %v14156_v34 }
 0x14f   :  { %11509 = vmatprep.subr.bf16.mxu1 %v14157_v48 }
 0x152   :  { %11511 = vmatpush3.bf16.msra.mxu1 %v14157_v48 }
 0x153   :  { %11513 = vmatprep.subr.bf16.mxu1 %v14158_v17 }
 0x156   :  { %11515 = vmatpush3.bf16.msra.mxu1 %v14158_v17 }
 0x157   :  { %10652 = vmatprep.subr.mxu1 %v14002_v21 }
 0x159   :  { %10641 = vmatmul.mubr.f32.vlgmr.msra.gmra.mrb[0].mxu1 %v14139_v44 }
 0x15a   :  { %10643 = vmatprep.mubr.f32.mxu1 %v14140_v7 }
 0x15d   :  { %10644 = vmatmul.mubr.f32.gmra.mrb[2].mxu1 %v12202_v37  ;;  %v12989_v37 = vsub.s32 0, %v12986_v31 }
 0x15e   :  { %10646 = vmatprep.mubr.f32.mxu1 %v12240_v33  ;;  %v12991_v33 = vld [vmem:[#allocation7] sm:$0x7] }
 0x161   :  { %10647 = vmatmul.mubr.f32.gmra.mrb[4].mxu1 %v14069_v57  ;;  %v12994_v57 = vsub.s32 1, %v12986_v31 }
 0x162   :  { %10649 = vmatprep.mubr.f32.mxu1 %v14084_v59  ;;  %v12998_v59 = vrot.slane %v12991_v33, %v12989_v37 }
 0x165   :  { %10650 = vmatmul.mubr.f32.gmra.mrb[6].mxu1 %v14102_v49  ;;  %v13002_v49 = vrot.slane %v12991_v33, %v12994_v57 }
 0x166   :  { %10654 = vmatprep.mubr.msk.f32.mxu1 %vm11943_vm0, %v14002_v21 }
 0x1ee   :  { %v1286_v3 = vpop.f32.mrb[0].mxu0 }
 0x1ef   :  { %v13005_v36 = vadd.f32 %v1286_v3, %v12998_v59  ;;  %v1288_v19 = vpop.f32.mrb[1].mxu0 }
 0x1f0   :  { %v11517_v8 = vadd.f32 %v1288_v19, %v13002_v49 }
 0x1f2   :  { %v2283_v15 = vmax.f32 %v11517_v8, 0.0  ;;  %v1293_v51 = vpop.f32.mrb[2].mxu0 }
 0x1f3   :  { %v13009_v23 = vadd.f32 %v1293_v51, %v12998_v59  ;;  %v1295_v18 = vpop.f32.mrb[3].mxu0 }
 0x1f4   :  { %v11519_v12 = vadd.f32 %v1295_v18, %v13002_v49  ;;  %v13012_v53 = vand.u32 4294901760, %v2283_v15 }
 0x1f6   :  { %v2286_v50 = vmax.f32 %v11519_v12, 0.0  ;;  %v1300_v40 = vpop.f32.mrb[4].mxu0  ;;  %v13018_v11 = vsub.f32 %v2283_v15, %v13012_v53 }
 0x1f7   :  { %v13015_v6 = vadd.f32 %v1300_v40, %v12998_v59  ;;  %v1302_v41 = vpop.f32.mrb[5].mxu0 }
 0x1f8   :  { %v13020_v20 = vand.u32 4294901760, %v2286_v50  ;;  %v2374_v30 = vand.u32 4294901760, %v13018_v11  ;;  %v11521_v58 = vadd.f32 %v1302_v41, %v13002_v49 }
 0x1fa   :  { %v1307_v35 = vpop.f32.mrb[6].mxu0  ;;  %v13029_v4 = vsub.f32 %v2286_v50, %v13020_v20  ;;  %v2375_v1 = vsub.f32 %v13018_v11, %v2374_v30  ;;  %v2289_v56 = vmax.f32 %v11521_v58, 0.0 }
 0x1fb   :  { %v13023_v43 = vadd.f32 %v1307_v35, %v12998_v59  ;;  %v13025_v14 = vpop.f32.mrb[7].mxu0 }
 0x1fc   :  { %v2820_v46 = vand.u32 4294901760, %v13029_v4  ;;  %v2376_v25 = vand.u32 4294901760, %v2375_v1  ;;  %v11523_v47 = vadd.f32 %v13025_v14, %v13002_v49  ;;  %v13095_v8 = vand.u32 4294901760, %v2289_v56 }
 0x1fe   :  { %v1314_v10 = vpop.f32.mrb[8].mxu0  ;;  %v2821_v42 = vsub.f32 %v13029_v4, %v2820_v46  ;;  %v2292_v15 = vmax.f32 %v11523_v47, 0.0  ;;  %v13108_v18 = vsub.f32 %v2289_v56, %v13095_v8 }
 0x1ff   :  { %v11524_v44 = vadd.f32 %v1314_v10, %v12998_v59  ;;  %v1316_v7 = vpop.f32.mrb[9].mxu0 }
 0x200   :  { %v13033_v63 = vadd.f32 %v1316_v7, %v13002_v49  ;;  %v2822_v34 = vand.u32 4294901760, %v2821_v42  ;;  %v13110_v12 = vand.u32 4294901760, %v2292_v15 }
 0x201   :  { %v2294_v38 = vmax.f32 %v11524_v44, 0.0 }
 0x202   :  { %v1321_v39 = vpop.f32.mrb[10].mxu0  ;;  %v13128_v35 = vsub.f32 %v2292_v15, %v13110_v12 }
 0x203   :  { %v13039_v45 = vand.u32 4294901760, %v2294_v38  ;;  %v11526_v52 = vadd.f32 %v1321_v39, %v12998_v59  ;;  %v1323_v55 = vpop.f32.mrb[11].mxu0 }
 0x204   :  { %v13043_v0 = vadd.f32 %v1323_v55, %v13002_v49  ;;  %v3712_v7 = vand.u32 4294901760, %v13128_v35 }
 0x205   :  { %v2384_v9 = vsub.f32 %v2294_v38, %v13039_v45  ;;  %v2297_v22 = vmax.f32 %v11526_v52, 0.0  ;;  %10653 = vmatpush3.xpose.msra.mxu1 %v13039_v45 }
 0x206   :  { %v1328_v2 = vpop.f32.mrb[12].mxu0  ;;  %10657 = vmatprep.subr.mxu1 %v14002_v21  ;;  %v3713_v52 = vsub.f32 %v13128_v35, %v3712_v7 }
 0x207   :  { %v2385_v61 = vand.u32 4294901760, %v2384_v9  ;;  %v13051_v5 = vand.u32 4294901760, %v2297_v22  ;;  %v1330_v32 = vpop.f32.mrb[13].mxu0  ;;  %v11528_v13 = vadd.f32 %v1328_v2, %v12998_v59 }
 0x208   :  { %v13054_v24 = vadd.f32 %v1330_v32, %v13002_v49  ;;  %10655 = vmatmul.mubr.f32.vlgmr.msra.gmra.mrb[8].mxu1 %v2376_v25 }
 0x209   :  { %v2386_v16 = vsub.f32 %v2384_v9, %v2385_v61  ;;  %v2830_v29 = vsub.f32 %v2297_v22, %v13051_v5  ;;  %10683 = vmatpush3.xpose.msra.mxu0 %v13051_v5  ;;  %10659 = vmatprep.mubr.msk.f32.mxu1 %vm11943_vm0, %v14002_v21  ;;  %v2300_v3 = vmax.f32 %v11528_v13, 0.0 }
 0x20a   :  { %v1335_v48 = vpop.f32.mrb[14].mxu0  ;;  %10687 = vmatprep.subr.mxu0 %v14002_v21 }
 0x20b   :  { %v2831_v17 = vand.u32 4294901760, %v2830_v29  ;;  %v1337_v26 = vpop.f32.mrb[15].mxu0  ;;  %v2387_v62 = vand.u32 4294901760, %v2386_v16  ;;  %v11530_v19 = vadd.f32 %v1335_v48, %v12998_v59  ;;  %v13098_v51 = vand.u32 4294901760, %v2300_v3 }
 0x20c   :  { %v13062_v27 = vadd.f32 %v1337_v26, %v13002_v49  ;;  %10685 = vmatmul.mubr.f32.vlgmr.msra.gmra.mrb[16].mxu0 %v2822_v34  ;;  %v13105_v59 = vsub.s32 2, %v12986_v31  ;;  %v2295_v48 = vmax.f32 %v13033_v63, 0.0 }
 0x20d   :  { %v2832_v60 = vsub.f32 %v2830_v29, %v2831_v17  ;;  %10658 = vmatpush3.xpose.msra.mxu1 %v2387_v62  ;;  %10689 = vmatprep.mubr.msk.f32.mxu0 %vm11943_vm0, %v14002_v21  ;;  %v2303_v49 = vmax.f32 %v11530_v19, 0.0  ;;  %v13114_v50 = vsub.f32 %v2300_v3, %v13098_v51  ;;  %v2298_v62 = vmax.f32 %v13043_v0, 0.0 }
 0x20e   :  { %10662 = vmatprep.subr.mxu1 %v14002_v21  ;;  %v13124_v41 = vrot.slane %v12991_v33, %v13105_v59  ;;  %v13219_v26 = vand.u32 4294901760, %v2295_v48 }
 0x20f   :  { %v2833_v54 = vand.u32 4294901760, %v2832_v60  ;;  %v13116_v40 = vand.u32 4294901760, %v2303_v49  ;;  %v3277_v14 = vand.u32 4294901760, %v13114_v50  ;;  %v2285_v60 = vmax.f32 %v13009_v23, 0.0 }
 0x210   :  { %10660 = vmatmul.mubr.f32.vlgmr.msra.gmra.mrb[8].mxu1 %v13012_v53 }
 0x211   :  { %10663 = vmatpush3.xpose.msra.mxu1 %v2384_v9  ;;  %10688 = vmatpush3.xpose.msra.mxu0 %v2833_v54  ;;  %v3278_v38 = vsub.f32 %v13114_v50, %v3277_v14  ;;  %v13231_v54 = vand.u32 4294901760, %v2298_v62  ;;  %v13235_v58 = vand.u32 4294901760, %v2285_v60 }
 0x212   :  { %10692 = vmatprep.subr.mxu0 %v14002_v21  ;;  %10664 = vmatprep.mubr.msk.f32.mxu1 %vm11943_vm0, %v14002_v21 }
 0x213   :  { %10667 = vmatprep.subr.mxu1 %v14002_v21  ;;  %v3279_v22 = vand.u32 4294901760, %v3278_v38  ;;  %v4607_v13 = vsub.f32 %v2298_v62, %v13231_v54  ;;  %v4618_v47 = vsub.f32 %v2285_v60, %v13235_v58 }
 0x214   :  { %10690 = vmatmul.mubr.f32.vlgmr.msra.gmra.mrb[16].mxu0 %v13020_v20 }
 0x215   :  { %10693 = vmatpush3.xpose.msra.mxu0 %v2830_v29  ;;  %10694 = vmatprep.mubr.msk.f32.mxu0 %vm11943_vm0, %v14002_v21  ;;  %v4608_v19 = vand.u32 4294901760, %v4607_v13 }
 0x216   :  { %10697 = vmatprep.subr.mxu0 %v14002_v21 }
 0x218   :  { %10665 = vmatmul.mubr.f32.vlgmr.msra.gmra.mrb[8].mxu1 %v13018_v11  ;;  %v3266_v11 = vand.u32 4294901760, %v13108_v18 }
 0x219   :  { %10668 = vmatpush3.xpose.msra.mxu1 %v13039_v45  ;;  %10669 = vmatprep.mubr.msk.f32.mxu1 %vm11943_vm0, %v14002_v21 }
 0x21a   :  { %10672 = vmatprep.subr.mxu1 %v14002_v21  ;;  %v3267_v44 = vsub.f32 %v13108_v18, %v3266_v11 }
 0x21c   :  { %10695 = vmatmul.mubr.f32.vlgmr.msra.gmra.mrb[16].mxu0 %v13029_v4  ;;  %v3268_v55 = vand.u32 4294901760, %v3267_v44  ;;  %v2291_v44 = vmax.f32 %v13023_v43, 0.0 }
 0x21d   :  { %10698 = vmatpush3.xpose.msra.mxu0 %v13051_v5  ;;  %10699 = vmatprep.mubr.msk.f32.mxu0 %vm11943_vm0, %v14002_v21 }
 0x21e   :  { %10702 = vmatprep.subr.mxu0 %v14002_v21 }
 0x220   :  { %10670 = vmatmul.mubr.f32.vlgmr.msra.gmra.mrb[8].mxu1 %v2374_v30  ;;  %v13133_v30 = vsub.f32 %v2303_v49, %v13116_v40  ;;  %v4609_v49 = vsub.f32 %v4607_v13, %v4608_v19 }
 0x221   :  { %10673 = vmatpush3.xpose.msra.mxu1 %v2385_v61  ;;  %10674 = vmatprep.mubr.msk.f32.mxu1 %vm11943_vm0, %v14002_v21  ;;  %v3714_v61 = vand.u32 4294901760, %v3713_v52 }
 0x222   :  { %10677 = vmatprep.subr.mxu1 %v14002_v21  ;;  %v3723_v1 = vand.u32 4294901760, %v13133_v30 }
 0x224   :  { %10700 = vmatmul.mubr.f32.vlgmr.msra.gmra.mrb[16].mxu0 %v2820_v46 }
 0x225   :  { %10703 = vmatpush3.xpose.msra.mxu0 %v2831_v17  ;;  %10704 = vmatprep.mubr.msk.f32.mxu0 %vm11943_vm0, %v14002_v21  ;;  %v2282_v17 = vmax.f32 %v13005_v36, 0.0  ;;  %v4161_v36 = vsub.f32 %v2295_v48, %v13219_v26 }
 0x226   :  { %10707 = vmatprep.subr.mxu0 %v14002_v21 }
 0x227   :  { %v13223_v63 = vand.u32 4294901760, %v2282_v17  ;;  %v4162_v23 = vand.u32 4294901760, %v4161_v36 }
 0x228   :  { %10675 = vmatmul.mubr.f32.vlgmr.msra.gmra.mrb[8].mxu1 %v13012_v53 }
 0x229   :  { %10678 = vmatpush3.xpose.msra.mxu1 %v13039_v45  ;;  %10679 = vmatprep.mubr.msk.f32.mxu1 %vm11943_vm0, %v14002_v21  ;;  %v4172_v0 = vsub.f32 %v2282_v17, %v13223_v63  ;;  %v4163_v3 = vsub.f32 %v4161_v36, %v4162_v23 }
 0x22a   :  { %10712 = vmatprep.subr.mxu1 %v14002_v21 }
 0x22b   :  { %v4173_v56 = vand.u32 4294901760, %v4172_v0 }
 0x22c   :  { %10705 = vmatmul.mubr.f32.vlgmr.msra.gmra.mrb[16].mxu0 %v13020_v20  ;;  %v10642_v4 = vpop.f32.mrb[0].mxu1 }
 0x22d   :  { %10708 = vmatpush3.xpose.msra.mxu0 %v13051_v5  ;;  %10709 = vmatprep.mubr.msk.f32.mxu0 %vm11943_vm0, %v14002_v21  ;;  %v13140_v33 = vadd.f32 %v10642_v4, %v13124_v41  ;;  %v13142_v10 = vpop.f32.mrb[1].mxu1  ;;  %v4174_v15 = vsub.f32 %v4172_v0, %v4173_v56 }
 0x22e   :  { %10742 = vmatprep.subr.mxu0 %v14002_v21 }
 0x230   :  { %10680 = vmatmul.mubr.f32.vlgmr.msra.gmra.mrb[8].mxu1 %v13012_v53  ;;  %v10645_v46 = vpop.f32.mrb[2].mxu1  ;;  %v3724_v53 = vsub.f32 %v13133_v30, %v3723_v1 }
 0x231   :  { %10713 = vmatpush3.xpose.msra.mxu1 %v13098_v51  ;;  %10714 = vmatprep.mubr.msk.f32.mxu1 %vm11943_vm0, %v14002_v21  ;;  %v13158_v39 = vadd.f32 %v10645_v46, %v13124_v41  ;;  %v2248_v45 = vpop.f32.mrb[3].mxu1 }
 0x232   :  { %10717 = vmatprep.subr.mxu1 %v14002_v21  ;;  %v13165_v9 = vadd.f32 %v2248_v45, %v13124_v41  ;;  %v3725_v32 = vand.u32 4294901760, %v3724_v53 }
 0x234   :  { %10710 = vmatmul.mubr.f32.vlgmr.msra.gmra.mrb[16].mxu0 %v13020_v20  ;;  %10715 = vmatmul.mubr.f32.vlgmr.msra.gmra.mrb[10].mxu1 %v3268_v55  ;;  %v10648_v25 = vpop.f32.mrb[4].mxu1 }
 0x235   :  { %10718 = vmatpush3.xpose.msra.mxu1 %v3279_v22  ;;  %10743 = vmatpush3.xpose.msra.mxu0 %v13116_v40  ;;  %v13171_v42 = vadd.f32 %v10648_v25, %v13124_v41  ;;  %v2260_v2 = vpop.f32.mrb[5].mxu1 }
 0x236   :  { %10744 = vmatprep.mubr.msk.f32.mxu0 %vm11943_vm0, %v14002_v21  ;;  %10747 = vmatprep.subr.mxu0 %v14002_v21  ;;  %v13177_v5 = vadd.f32 %v2260_v2, %v13124_v41 }
 0x237   :  { %10719 = vmatprep.mubr.msk.f32.mxu1 %vm11943_vm0, %v14002_v21  ;;  %10722 = vmatprep.subr.mxu1 %v14002_v21 }
 0x238   :  { %10745 = vmatmul.mubr.f32.vlgmr.msra.gmra.mrb[18].mxu0 %v3714_v61  ;;  %v10651_v20 = vpop.f32.mrb[6].mxu1 }
 0x239   :  { %10748 = vmatpush3.xpose.msra.mxu0 %v3725_v32  ;;  %10749 = vmatprep.mubr.msk.f32.mxu0 %vm11943_vm0, %v14002_v21  ;;  %v13185_v16 = vadd.f32 %v10651_v20, %v13124_v41  ;;  %v2272_v29 = vpop.f32.mrb[7].mxu1 }
 0x23a   :  { %10752 = vmatprep.subr.mxu0 %v14002_v21  ;;  %v13189_v34 = vadd.f32 %v2272_v29, %v13124_v41  ;;  %v11533_v29 = vadd.f32 %v13142_v10, %v13124_v41 }
 0x23c   :  { %10720 = vmatmul.mubr.f32.vlgmr.msra.gmra.mrb[10].mxu1 %v13095_v8  ;;  %v2284_v48 = vmax.f32 %v11533_v29, 0.0 }
 0x23d   :  { %10723 = vmatpush3.xpose.msra.mxu1 %v13114_v50  ;;  %10724 = vmatprep.mubr.msk.f32.mxu1 %vm11943_vm0, %v14002_v21 }
 0x23e   :  { %10727 = vmatprep.subr.mxu1 %v14002_v21  ;;  %v13358_v17 = vand.u32 4294901760, %v2284_v48 }
 0x240   :  { %10750 = vmatmul.mubr.f32.vlgmr.msra.gmra.mrb[18].mxu0 %v13110_v12  ;;  %v13366_v41 = vsub.f32 %v2284_v48, %v13358_v17 }
 0x241   :  { %10753 = vmatpush3.xpose.msra.mxu0 %v13133_v30  ;;  %10754 = vmatprep.mubr.msk.f32.mxu0 %vm11943_vm0, %v14002_v21  ;;  %v2304_v30 = vmax.f32 %v13062_v27, 0.0  ;;  %v13299_v27 = vand.u32 4294901760, %v2291_v44 }
 0x242   :  { %10757 = vmatprep.subr.mxu0 %v14002_v21  ;;  %v6123_v10 = vand.u32 4294901760, %v13366_v41 }
 0x243   :  { %v5510_v46 = vsub.f32 %v2291_v44, %v13299_v27 }
 0x244   :  { %10725 = vmatmul.mubr.f32.vlgmr.msra.gmra.mrb[10].mxu1 %v13108_v18  ;;  %v4164_v18 = vand.u32 4294901760, %v4163_v3 }
 0x245   :  { %10728 = vmatpush3.xpose.msra.mxu1 %v13098_v51  ;;  %10729 = vmatprep.mubr.msk.f32.mxu1 %vm11943_vm0, %v14002_v21  ;;  %v5511_v53 = vand.u32 4294901760, %v5510_v46 }
 0x246   :  { %10732 = vmatprep.subr.mxu1 %v14002_v21 }
 0x247   :  { %v5512_v2 = vsub.f32 %v5510_v46, %v5511_v53 }
 0x248   :  { %10755 = vmatmul.mubr.f32.vlgmr.msra.gmra.mrb[18].mxu0 %v13128_v35  ;;  %v2288_v35 = vmax.f32 %v13015_v6, 0.0 }
 0x249   :  { %10758 = vmatpush3.xpose.msra.mxu0 %v13116_v40  ;;  %10759 = vmatprep.mubr.msk.f32.mxu0 %vm11943_vm0, %v14002_v21  ;;  %v5513_v20 = vand.u32 4294901760, %v5512_v2 }
 0x24a   :  { %10762 = vmatprep.subr.mxu0 %v14002_v21  ;;  %v13289_v4 = vand.u32 4294901760, %v2288_v35 }
 0x24c   :  { %10730 = vmatmul.mubr.f32.vlgmr.msra.gmra.mrb[10].mxu1 %v3266_v11 }
 0x24d   :  { %10733 = vmatpush3.xpose.msra.mxu1 %v3277_v14  ;;  %10734 = vmatprep.mubr.msk.f32.mxu1 %vm11943_vm0, %v14002_v21 }
 0x24e   :  { %10737 = vmatprep.subr.mxu1 %v14002_v21 }
 0x250   :  { %10760 = vmatmul.mubr.f32.vlgmr.msra.gmra.mrb[18].mxu0 %v3712_v7  ;;  %v5064_v7 = vsub.f32 %v2288_v35, %v13289_v4 }
 0x251   :  { %10763 = vmatpush3.xpose.msra.mxu0 %v3723_v1  ;;  %10764 = vmatprep.mubr.msk.f32.mxu0 %vm11943_vm0, %v14002_v21 }
 0x252   :  { %10767 = vmatprep.subr.mxu0 %v14002_v21  ;;  %v5065_v1 = vand.u32 4294901760, %v5064_v7 }
 0x254   :  { %10735 = vmatmul.mubr.f32.vlgmr.msra.gmra.mrb[10].mxu1 %v13095_v8  ;;  %v5066_v55 = vsub.f32 %v5064_v7, %v5065_v1 }
 0x255   :  { %10738 = vmatpush3.xpose.msra.mxu1 %v13098_v51  ;;  %10739 = vmatprep.mubr.msk.f32.mxu1 %vm11943_vm0, %v14002_v21  ;;  %v4619_v51 = vand.u32 4294901760, %v4618_v47 }
 0x256   :  { %10772 = vmatprep.subr.mxu1 %v14002_v21  ;;  %v5067_v61 = vand.u32 4294901760, %v5066_v55 }
 0x257   :  { %v4620_v50 = vsub.f32 %v4618_v47, %v4619_v51 }
 0x258   :  { %10765 = vmatmul.mubr.f32.vlgmr.msra.gmra.mrb[18].mxu0 %v13110_v12 }
 0x259   :  { %10768 = vmatpush3.xpose.msra.mxu0 %v13116_v40  ;;  %10769 = vmatprep.mubr.msk.f32.mxu0 %vm11943_vm0, %v14002_v21  ;;  %v4175_v40 = vand.u32 4294901760, %v4174_v15  ;;  %v4621_v11 = vand.u32 4294901760, %v4620_v50 }
 0x25a   :  { %10802 = vmatprep.subr.mxu0 %v14002_v21 }
 0x25c   :  { %10740 = vmatmul.mubr.f32.vlgmr.msra.gmra.mrb[10].mxu1 %v13095_v8  ;;  %v4610_v8 = vand.u32 4294901760, %v4609_v49 }
 0x25d   :  { %10773 = vmatpush3.xpose.msra.mxu1 %v13223_v63  ;;  %10774 = vmatprep.mubr.msk.f32.mxu1 %vm11943_vm0, %v14002_v21 }
 0x25e   :  { %10777 = vmatprep.subr.mxu1 %v14002_v21 }
 0x260   :  { %10770 = vmatmul.mubr.f32.vlgmr.msra.gmra.mrb[18].mxu0 %v13110_v12  ;;  %10775 = vmatmul.mubr.f32.vlgmr.msra.gmra.mrb[12].mxu1 %v4164_v18  ;;  %v2301_v12 = vmax.f32 %v13054_v24, 0.0  ;;  %v13295_v24 = vand.u32 4294901760, %v2304_v30 }
 0x261   :  { %10778 = vmatpush3.xpose.msra.mxu1 %v4175_v40  ;;  %10803 = vmatpush3.xpose.msra.mxu0 %v13235_v58 }
 0x262   :  { %10804 = vmatprep.mubr.msk.f32.mxu0 %vm11943_vm0, %v14002_v21  ;;  %10807 = vmatprep.subr.mxu0 %v14002_v21  ;;  %v13285_v14 = vand.u32 4294901760, %v2301_v12  ;;  %v5499_v38 = vsub.f32 %v2304_v30, %v13295_v24 }
 0x263   :  { %10779 = vmatprep.mubr.msk.f32.mxu1 %vm11943_vm0, %v14002_v21  ;;  %10782 = vmatprep.subr.mxu1 %v14002_v21 }
 0x264   :  { %10805 = vmatmul.mubr.f32.vlgmr.msra.gmra.mrb[20].mxu0 %v4610_v8  ;;  %v5053_v6 = vsub.f32 %v2301_v12, %v13285_v14  ;;  %v5500_v52 = vand.u32 4294901760, %v5499_v38 }
 0x265   :  { %10808 = vmatpush3.xpose.msra.mxu0 %v4621_v11  ;;  %10809 = vmatprep.mubr.msk.f32.mxu0 %vm11943_vm0, %v14002_v21 }
 0x266   :  { %10812 = vmatprep.subr.mxu0 %v14002_v21  ;;  %v5054_v43 = vand.u32 4294901760, %v5053_v6  ;;  %v5501_v22 = vsub.f32 %v5499_v38, %v5500_v52 }
 0x268   :  { %10780 = vmatmul.mubr.f32.vlgmr.msra.gmra.mrb[12].mxu1 %v13219_v26  ;;  %v5055_v45 = vsub.f32 %v5053_v6, %v5054_v43  ;;  %v5502_v32 = vand.u32 4294901760, %v5501_v22 }
 0x269   :  { %10783 = vmatpush3.xpose.msra.mxu1 %v4172_v0  ;;  %10784 = vmatprep.mubr.msk.f32.mxu1 %vm11943_vm0, %v14002_v21 }
 0x26a   :  { %10787 = vmatprep.subr.mxu1 %v14002_v21  ;;  %v5056_v25 = vand.u32 4294901760, %v5055_v45 }
 0x26c   :  { %10810 = vmatmul.mubr.f32.vlgmr.msra.gmra.mrb[20].mxu0 %v13231_v54 }
 0x26d   :  { %10813 = vmatpush3.xpose.msra.mxu0 %v4618_v47  ;;  %10814 = vmatprep.mubr.msk.f32.mxu0 %vm11943_vm0, %v14002_v21 }
 0x26e   :  { %10817 = vmatprep.subr.mxu0 %v14002_v21 }
 0x270   :  { %10785 = vmatmul.mubr.f32.vlgmr.msra.gmra.mrb[12].mxu1 %v4161_v36 }
 0x271   :  { %10788 = vmatpush3.xpose.msra.mxu1 %v13223_v63  ;;  %10789 = vmatprep.mubr.msk.f32.mxu1 %vm11943_vm0, %v14002_v21 }
 0x272   :  { %10792 = vmatprep.subr.mxu1 %v14002_v21 }
 0x274   :  { %10815 = vmatmul.mubr.f32.vlgmr.msra.gmra.mrb[20].mxu0 %v4607_v13 }
 0x275   :  { %10818 = vmatpush3.xpose.msra.mxu0 %v13235_v58  ;;  %10819 = vmatprep.mubr.msk.f32.mxu0 %vm11943_vm0, %v14002_v21 }
 0x276   :  { %10822 = vmatprep.subr.mxu0 %v14002_v21 }
 0x278   :  { %10790 = vmatmul.mubr.f32.vlgmr.msra.gmra.mrb[12].mxu1 %v4162_v23 }
 0x279   :  { %10793 = vmatpush3.xpose.msra.mxu1 %v4173_v56  ;;  %10794 = vmatprep.mubr.msk.f32.mxu1 %vm11943_vm0, %v14002_v21 }
 0x27a   :  { %10797 = vmatprep.subr.mxu1 %v14002_v21 }
 0x27c   :  { %10820 = vmatmul.mubr.f32.vlgmr.msra.gmra.mrb[20].mxu0 %v4608_v19 }
 0x27d   :  { %10823 = vmatpush3.xpose.msra.mxu0 %v4619_v51  ;;  %10824 = vmatprep.mubr.msk.f32.mxu0 %vm11943_vm0, %v14002_v21 }
 0x27e   :  { %10827 = vmatprep.subr.mxu0 %v14002_v21 }
 0x280   :  { %10795 = vmatmul.mubr.f32.vlgmr.msra.gmra.mrb[12].mxu1 %v13219_v26 }
 0x281   :  { %10798 = vmatpush3.xpose.msra.mxu1 %v13223_v63  ;;  %10799 = vmatprep.mubr.msk.f32.mxu1 %vm11943_vm0, %v14002_v21 }
 0x282   :  { %10832 = vmatprep.subr.mxu1 %v14002_v21 }
 0x284   :  { %10825 = vmatmul.mubr.f32.vlgmr.msra.gmra.mrb[20].mxu0 %v13231_v54 }
 0x285   :  { %10828 = vmatpush3.xpose.msra.mxu0 %v13235_v58  ;;  %10829 = vmatprep.mubr.msk.f32.mxu0 %vm11943_vm0, %v14002_v21 }
 0x286   :  { %10862 = vmatprep.subr.mxu0 %v14002_v21 }
 0x288   :  { %10800 = vmatmul.mubr.f32.vlgmr.msra.gmra.mrb[12].mxu1 %v13219_v26 }
 0x289   :  { %10833 = vmatpush3.xpose.msra.mxu1 %v13289_v4  ;;  %10834 = vmatprep.mubr.msk.f32.mxu1 %vm11943_vm0, %v14002_v21 }
 0x28a   :  { %10837 = vmatprep.subr.mxu1 %v14002_v21 }
 0x28c   :  { %10830 = vmatmul.mubr.f32.vlgmr.msra.gmra.mrb[20].mxu0 %v13231_v54  ;;  %10835 = vmatmul.mubr.f32.vlgmr.msra.gmra.mrb[14].mxu1 %v5056_v25 }
 0x28d   :  { %10838 = vmatpush3.xpose.msra.mxu1 %v5067_v61  ;;  %10863 = vmatpush3.xpose.msra.mxu0 %v13299_v27 }
 0x28e   :  { %10864 = vmatprep.mubr.msk.f32.mxu0 %vm11943_vm0, %v14002_v21  ;;  %10867 = vmatprep.subr.mxu0 %v14002_v21 }
 0x28f   :  { %10839 = vmatprep.mubr.msk.f32.mxu1 %vm11943_vm0, %v14002_v21  ;;  %10842 = vmatprep.subr.mxu1 %v14002_v21 }
 0x290   :  { %10865 = vmatmul.mubr.f32.vlgmr.msra.gmra.mrb[22].mxu0 %v5502_v32 }
 0x291   :  { %10868 = vmatpush3.xpose.msra.mxu0 %v5513_v20  ;;  %10869 = vmatprep.mubr.msk.f32.mxu0 %vm11943_vm0, %v14002_v21  ;;  %v11944_v20 = vmov 0  }
 0x292   :  { %10872 = vmatprep.subr.mxu0 %v14002_v21  ;;  %11755 = vset.pattern.permute.xlu1 %v11944_v20 }
 0x293   :  { %11754 = vset.pattern.permute.xlu0 %v11944_v20 }
 0x294   :  { %10840 = vmatmul.mubr.f32.vlgmr.msra.gmra.mrb[14].mxu1 %v13285_v14 }
 0x295   :  { %10843 = vmatpush3.xpose.msra.mxu1 %v5064_v7  ;;  %10844 = vmatprep.mubr.msk.f32.mxu1 %vm11943_vm0, %v14002_v21 }
 0x296   :  { %10847 = vmatprep.subr.mxu1 %v14002_v21 }
 0x298   :  { %10870 = vmatmul.mubr.f32.vlgmr.msra.gmra.mrb[22].mxu0 %v13295_v24 }
 0x299   :  { %10873 = vmatpush3.xpose.msra.mxu0 %v5510_v46  ;;  %10874 = vmatprep.mubr.msk.f32.mxu0 %vm11943_vm0, %v14002_v21 }
 0x29a   :  { %10877 = vmatprep.subr.mxu0 %v14002_v21 }
 0x29c   :  { %10845 = vmatmul.mubr.f32.vlgmr.msra.gmra.mrb[14].mxu1 %v5053_v6 }
 0x29d   :  { %10848 = vmatpush3.xpose.msra.mxu1 %v13289_v4  ;;  %10849 = vmatprep.mubr.msk.f32.mxu1 %vm11943_vm0, %v14002_v21 }
 0x29e   :  { %10852 = vmatprep.subr.mxu1 %v14002_v21 }
 0x2a0   :  { %10875 = vmatmul.mubr.f32.vlgmr.msra.gmra.mrb[22].mxu0 %v5499_v38  ;;  %v13389_v38 = vand.u32 127, %v127_v28 }
 0x2a1   :  { %10878 = vmatpush3.xpose.msra.mxu0 %v13299_v27  ;;  %10879 = vmatprep.mubr.msk.f32.mxu0 %vm11943_vm0, %v14002_v21 }
 0x2a2   :  { %10882 = vmatprep.subr.mxu0 %v14002_v21  ;;  %v13393_v46 = vsub.s32 %v13389_v38, %v12986_v31  ;;  %vm5886_vm7 = vcmp.lt.s32.totalorder %v13389_v38, 32 }
 0x2a4   :  { %10850 = vmatmul.mubr.f32.vlgmr.msra.gmra.mrb[14].mxu1 %v5054_v43 }
 0x2a5   :  { %10853 = vmatpush3.xpose.msra.mxu1 %v5065_v1  ;;  %10854 = vmatprep.mubr.msk.f32.mxu1 %vm11943_vm0, %v14002_v21 }
 0x2a6   :  { %10857 = vmatprep.subr.mxu1 %v14002_v21 }
 0x2a8   :  { %10880 = vmatmul.mubr.f32.vlgmr.msra.gmra.mrb[22].mxu0 %v5500_v52 }
 0x2a9   :  { %10883 = vmatpush3.xpose.msra.mxu0 %v5511_v53  ;;  %10884 = vmatprep.mubr.msk.f32.mxu0 %vm11943_vm0, %v14002_v21 }
 0x2aa   :  { %10887 = vmatprep.subr.mxu0 %v14002_v21 }
 0x2ac   :  { %10855 = vmatmul.mubr.f32.vlgmr.msra.gmra.mrb[14].mxu1 %v13285_v14 }
 0x2ad   :  { %10858 = vmatpush3.xpose.msra.mxu1 %v13289_v4  ;;  %10859 = vmatprep.mubr.msk.f32.mxu1 %vm11943_vm0, %v14002_v21 }
 0x2ae   :  { %10892 = vmatprep.subr.mxu1 %v14002_v21 }
 0x2b0   :  { %10885 = vmatmul.mubr.f32.vlgmr.msra.gmra.mrb[22].mxu0 %v13295_v24 }
 0x2b1   :  { %10888 = vmatpush3.xpose.msra.mxu0 %v13299_v27  ;;  %10889 = vmatprep.mubr.msk.f32.mxu0 %vm11943_vm0, %v14002_v21 }
 0x2b2   :  { %10912 = vmatprep.subr.mxu0 %v14002_v21 }
 0x2b4   :  { %10860 = vmatmul.mubr.f32.vlgmr.msra.gmra.mrb[14].mxu1 %v13285_v14 }
 0x2b5   :  { %10893 = vmatpush3.msra.mxu1 %v13358_v17  ;;  %10894 = vmatprep.mubr.msk.f32.mxu1 %vm11943_vm0, %v14002_v21 }
 0x2b6   :  { %10897 = vmatprep.subr.mxu1 %v14002_v21 }
 0x2b8   :  { %10890 = vmatmul.mubr.f32.vlgmr.msra.gmra.mrb[22].mxu0 %v13295_v24 }
 0x2b9   :  { %10913 = vmatpush3.msra.mxu0 %v6123_v10  ;;  %10914 = vmatprep.mubr.msk.f32.mxu0 %vm11943_vm0, %v14002_v21 }
 0x2ba   :  { %10922 = vmatprep.subr.mxu0 %v14002_v21 }
 0x303   :  { %v2748_v26 = vpop.f32.mrb[8].mxu1 }
 0x304   :  { %11756 = vtanh.f32 %v2748_v26  ;;  %v10681_v62 = vpop.f32.mrb[9].mxu1 }
 0x307   :  { %v3194_v63 = vpop.f32.mrb[16].mxu0 }
 0x308   :  { %11758 = vtanh.f32 %v3194_v63  ;;  %v10711_v60 = vpop.f32.mrb[17].mxu0 }
 0x30e   :  { %v11757_v36 = vpop.eup %11756 }
 0x30f   :  { %v5890_v54 = vsel %vm5889_vm1, %v11757_v36, 0.0 }
 0x310   :  { %5891 = vadd.xlane.f32.xlu0 %v5890_v54 }
 0x312   :  { %v11759_v0 = vpop.eup %11758 }
 0x313   :  { %v5893_v58 = vsel %vm5889_vm1, %v11759_v0, 0.0 }
 0x314   :  { %5894 = vadd.xlane.f32.xlu0 %v5893_v58 }
 0x32f   :  { %v3640_v23 = vpop.f32.mrb[10].mxu1 }
 0x330   :  { %11760 = vtanh.f32 %v3640_v23  ;;  %v10741_v13 = vpop.f32.mrb[11].mxu1 }
 0x333   :  { %v4086_v56 = vpop.f32.mrb[18].mxu0 }
 0x334   :  { %11762 = vtanh.f32 %v4086_v56  ;;  %v10771_v47 = vpop.f32.mrb[19].mxu0  ;;  %v13412_v56 = vsub.s32 3, %v12986_v31 }
 0x33a   :  { %v11761_v3 = vpop.eup %11760 }
 0x33b   :  { %v5896_v19 = vsel %vm5889_vm1, %v11761_v3, 0.0 }
 0x33c   :  { %5897 = vadd.xlane.f32.xlu1 %v5896_v19 }
 0x33e   :  { %v11763_v15 = vpop.eup %11762 }
 0x33f   :  { %v5899_v51 = vsel %vm5889_vm1, %v11763_v15, 0.0 }
 0x340   :  { %5900 = vadd.xlane.f32.xlu1 %v5899_v51 }
 0x35b   :  { %v4536_v49 = vpop.f32.mrb[12].mxu1 }
 0x35c   :  { %11764 = vtanh.f32 %v4536_v49  ;;  %v10801_v18 = vpop.f32.mrb[13].mxu1 }
 0x35f   :  { %v4982_v50 = vpop.f32.mrb[20].mxu0 }
 0x360   :  { %11766 = vtanh.f32 %v4982_v50  ;;  %v10831_v40 = vpop.f32.mrb[21].mxu0 }
 0x366   :  { %v11765_v8 = vpop.eup %11764 }
 0x367   :  { %v7966_v11 = vsel %vm5889_vm1, %v11765_v8, 0.0 }
 0x368   :  { %7967 = vadd.xlane.f32.xlu0 %v7966_v11 }
 0x36a   :  { %v11767_v12 = vpop.eup %11766 }
 0x36b   :  { %v7969_v35 = vsel %vm5889_vm1, %v11767_v12, 0.0 }
 0x36c   :  { %7970 = vadd.xlane.f32.xlu1 %v7969_v35 }
 0x387   :  { %v5428_v14 = vpop.f32.mrb[14].mxu1 }
 0x388   :  { %11768 = vtanh.f32 %v5428_v14  ;;  %v10861_v30 = vpop.f32.mrb[15].mxu1 }
 0x38b   :  { %v5874_v4 = vpop.f32.mrb[22].mxu0 }
 0x38c   :  { %11770 = vtanh.f32 %v5874_v4  ;;  %v10891_v44 = vpop.f32.mrb[23].mxu0 }
 0x392   :  { %v11769_v6 = vpop.eup %11768 }
 0x393   :  { %v7972_v24 = vsel %vm5889_vm1, %v11769_v6, 0.0 }
 0x394   :  { %7973 = vadd.xlane.f32.xlu0 %v7972_v24 }
 0x396   :  { %v11771_v7 = vpop.eup %11770 }
 0x397   :  { %v7975_v27 = vsel %vm5889_vm1, %v11771_v7, 0.0 }
 0x398   :  { %7976 = vadd.xlane.f32.xlu1 %v7975_v27 }
 0x39d   :  { %v5892_v43 = vpop.xlane.xlu0 %5891 }
 0x39e   :  { %v5909_v53 = vrot.slane %v5892_v43, %v13393_v46 }
 0x3a1   :  { %v5895_v1 = vpop.xlane.xlu0 %5894 }
 0x3a2   :  { %v5913_v52 = vrot.slane %v5895_v1, %v13393_v46 }
 0x3a4   :  { %v5923_v28 = vsel %vm5922_vm2, %v5913_v52, %v5909_v53 }
 0x3c9   :  { %v5898_v45 = vpop.xlane.xlu1 %5897 }
 0x3ca   :  { %v5917_v55 = vrot.slane %v5898_v45, %v13393_v46 }
 0x3cc   :  { %v5925_v2 = vsel %vm5924_vm3, %v5917_v55, %v5923_v28 }
 0x3cd   :  { %v5901_v22 = vpop.xlane.xlu1 %5900 }
 0x3ce   :  { %v5921_v25 = vrot.slane %v5901_v22, %v13393_v46 }
 0x3d0   :  { %v5927_v61 = vsel %vm5926_vm4, %v5921_v25, %v5925_v2 }
 0x3d1   :  { %v5930_v32 = vsel %vm5929_vm5, %v5927_v61, -inf }
 0x3d2   :  { %5931 = vmax.xlane.f32.xlu0 %v5930_v32 }
 0x3f5   :  { %v7968_v29 = vpop.xlane.xlu0 %7967 }
 0x3f6   :  { %v7985_v60 = vrot.slane %v7968_v29, %v13393_v46 }
 0x3f9   :  { %v7971_v48 = vpop.xlane.xlu1 %7970 }
 0x3fa   :  { %v7989_v62 = vrot.slane %v7971_v48, %v13393_v46 }
 0x3fc   :  { %v7998_v0 = vsel %vm5922_vm2, %v7989_v62, %v7985_v60 }
 0x421   :  { %v7974_v26 = vpop.xlane.xlu0 %7973 }
 0x422   :  { %v7993_v63 = vrot.slane %v7974_v26, %v13393_v46 }
 0x424   :  { %v7999_v58 = vsel %vm5924_vm3, %v7993_v63, %v7998_v0 }
 0x425   :  { %v7977_v36 = vpop.xlane.xlu1 %7976 }
 0x426   :  { %v7997_v54 = vrot.slane %v7977_v36, %v13393_v46 }
 0x428   :  { %v8000_v23 = vsel %vm5926_vm4, %v7997_v54, %v7999_v58 }
 0x429   :  { %v8002_v13 = vsel %vm5929_vm5, %v8000_v23, -inf }
 0x42a   :  { %8003 = vmax.xlane.f32.xlu1 %v8002_v13 }
 0x45f   :  { %v5932_v47 = vpop.xlane.xlu0 %5931 }
 0x460   :  { %v5937_v3 = vrot.slane %v5932_v47, %v12989_v37  ;;  %v5941_v19 = vrot.slane %v5932_v47, %v12994_v57  ;;  %v5945_v15 = vrot.slane %v5932_v47, %v13105_v59  ;;  %v5949_v18 = vrot.slane %v5932_v47, %v13412_v56 }
 0x462   :  { %v5954_v51 = vsub.f32 %v5892_v43, %v5937_v3  ;;  %v5955_v49 = vsub.f32 %v5895_v1, %v5941_v19  ;;  %v5956_v50 = vsub.f32 %v5898_v45, %v5945_v15  ;;  %v5957_v11 = vsub.f32 %v5901_v22, %v5949_v18 }
 0x464   :  { %v5958_v40 = vmul.f32 1.442695, %v5954_v51  ;;  %v5960_v8 = vmul.f32 1.442695, %v5955_v49  ;;  %v5962_v12 = vmul.f32 1.442695, %v5956_v50 }
 0x465   :  { %v5964_v31 = vmul.f32 1.442695, %v5957_v11 }
 0x466   :  { %11772 = vpow2.f32 %v5958_v40 }
 0x467   :  { %11774 = vpow2.f32 %v5960_v8 }
 0x468   :  { %11776 = vpow2.f32 %v5962_v12 }
 0x469   :  { %11778 = vpow2.f32 %v5964_v31 }
 0x470   :  { %v13418_v35 = vpop.eup %11772 }
 0x471   :  { %v13420_v14 = vpop.eup %11774  ;;  %5971 = vperm.xlu0 %11754, %v13418_v35  }
 0x472   :  { %5974 = vperm.xlu1 %11755, %v13420_v14   ;;  %v13424_v30 = vpop.eup %11776 }
 0x473   :  { %v13427_v4 = vpop.eup %11778 }
 0x476   :  { %5977 = vperm.xlu1 %11755, %v13424_v30  }
 0x47a   :  { %5980 = vperm.xlu1 %11755, %v13427_v4  }
 0x4b7   :  { %v8004_v44 = vpop.xlane.xlu1 %8003 }
 0x4b8   :  { %v8009_v6 = vrot.slane %v8004_v44, %v12989_v37  ;;  %v8013_v24 = vrot.slane %v8004_v44, %v12994_v57  ;;  %v8017_v7 = vrot.slane %v8004_v44, %v13105_v59  ;;  %v8021_v45 = vrot.slane %v8004_v44, %v13412_v56 }
 0x4ba   :  { %v8026_v27 = vsub.f32 %v7968_v29, %v8009_v6  ;;  %v8027_v43 = vsub.f32 %v7971_v48, %v8013_v24  ;;  %v8028_v52 = vsub.f32 %v7974_v26, %v8017_v7  ;;  %v8029_v53 = vsub.f32 %v7977_v36, %v8021_v45 }
 0x4bc   :  { %v8030_v1 = vmul.f32 1.442695, %v8026_v27  ;;  %v8032_v55 = vmul.f32 1.442695, %v8027_v43  ;;  %v8034_v22 = vmul.f32 1.442695, %v8028_v52 }
 0x4bd   :  { %v8036_v25 = vmul.f32 1.442695, %v8029_v53 }
 0x4be   :  { %11780 = vpow2.f32 %v8030_v1 }
 0x4bf   :  { %11782 = vpow2.f32 %v8032_v55 }
 0x4c0   :  { %11784 = vpow2.f32 %v8034_v22 }
 0x4c1   :  { %11786 = vpow2.f32 %v8036_v25 }
 0x4c8   :  { %v13434_v28 = vpop.eup %11780 }
 0x4c9   :  { %8043 = vperm.xlu1 %11755, %v13434_v28   ;;  %v13437_v2 = vpop.eup %11782 }
 0x4ca   :  { %v13440_v61 = vpop.eup %11784 }
 0x4cb   :  { %v13443_v32 = vpop.eup %11786 }
 0x4cd   :  { %8046 = vperm.xlu1 %11755, %v13437_v2  }
 0x4d1   :  { %8049 = vperm.xlu1 %11755, %v13440_v61  }
 0x4d5   :  { %8052 = vperm.xlu1 %11755, %v13443_v32  }
 0x4f0   :  { %v5972_v29 = vpop.permute.xlu0 %5971 }
 0x4f1   :  { %v5975_v20 = vpop.permute.xlu1 %5974  ;;  %v5985_v62 = vrot.slane %v5972_v29, %v13393_v46 }
 0x4f2   :  { %v5989_v26 = vrot.slane %v5975_v20, %v13393_v46 }
 0x4f4   :  { %v5998_v36 = vsel %vm5922_vm2, %v5989_v26, %v5985_v62 }
 0x4f5   :  { %v5978_v48 = vpop.permute.xlu1 %5977 }
 0x4f6   :  { %v5993_v63 = vrot.slane %v5978_v48, %v13393_v46 }
 0x4f8   :  { %v5999_v0 = vsel %vm5924_vm3, %v5993_v63, %v5998_v36 }
 0x4f9   :  { %v5981_v60 = vpop.permute.xlu1 %5980 }
 0x4fa   :  { %v5997_v54 = vrot.slane %v5981_v60, %v13393_v46 }
 0x4fc   :  { %v6000_v58 = vsel %vm5926_vm4, %v5997_v54, %v5999_v0 }
 0x4fd   :  { %v6002_v23 = vsel %vm5929_vm5, %v6000_v58, 0.0 }
 0x4fe   :  { %6003 = vadd.xlane.f32.xlu1 %v6002_v23 }
 0x548   :  { %v8044_v13 = vpop.permute.xlu1 %8043 }
 0x549   :  { %v8057_v51 = vrot.slane %v8044_v13, %v13393_v46 }
 0x54c   :  { %v8047_v47 = vpop.permute.xlu1 %8046 }
 0x54d   :  { %v8061_v19 = vrot.slane %v8047_v47, %v13393_v46 }
 0x54f   :  { %v8070_v18 = vsel %vm5922_vm2, %v8061_v19, %v8057_v51 }
 0x550   :  { %v8050_v3 = vpop.permute.xlu1 %8049 }
 0x551   :  { %v8065_v15 = vrot.slane %v8050_v3, %v13393_v46  ;;  %v6124_v3 = vsub.f32 %v13366_v41, %v6123_v10 }
 0x553   :  { %v8071_v40 = vsel %vm5924_vm3, %v8065_v15, %v8070_v18 }
 0x554   :  { %v8053_v49 = vpop.permute.xlu1 %8052 }
 0x555   :  { %v8069_v50 = vrot.slane %v8053_v49, %v13393_v46 }
 0x557   :  { %v8072_v8 = vsel %vm5926_vm4, %v8069_v50, %v8071_v40 }
 0x558   :  { %v8074_v11 = vsel %vm5929_vm5, %v8072_v8, 0.0  ;;  %v6125_v8 = vand.u32 4294901760, %v6124_v3 }
 0x559   :  { %8075 = vadd.xlane.f32.xlu0 %v8074_v11 }
 0x58b   :  { %v6004_v12 = vpop.xlane.xlu1 %6003 }
 0x58c   :  { %v6009_v31 = vrot.slane %v6004_v12, %v12989_v37  ;;  %v6013_v44 = vrot.slane %v6004_v12, %v12994_v57  ;;  %v6017_v6 = vrot.slane %v6004_v12, %v13105_v59  ;;  %v6021_v24 = vrot.slane %v6004_v12, %v13412_v56 }
 0x58e   :  { %11788 = vrcp.f32 %v6009_v31 }
 0x58f   :  { %11790 = vrcp.f32 %v6013_v44 }
 0x590   :  { %11792 = vrcp.f32 %v6017_v6  ;;  %v2290_v6 = vmax.f32 %v13165_v9, 0.0 }
 0x591   :  { %11794 = vrcp.f32 %v6021_v24 }
 0x598   :  { %v11789_v7 = vpop.eup %11788 }
 0x599   :  { %v11791_v27 = vpop.eup %11790  ;;  %v6027_v43 = vmul.f32 %v11789_v7, %v13418_v35 }
 0x59a   :  { %v11793_v1 = vpop.eup %11792  ;;  %v6029_v45 = vmul.f32 %v11791_v27, %v13420_v14  ;;  %v13536_v27 = vand.u32 4294901760, %v2290_v6 }
 0x59b   :  { %v11795_v52 = vpop.eup %11794  ;;  %6036 = vperm.xlu0 %11754, %v6027_v43   ;;  %v6031_v53 = vmul.f32 %v11793_v1, %v13424_v30 }
 0x59c   :  { %6492 = vperm.xlu1 %11755, %v6029_v45   ;;  %v6033_v55 = vmul.f32 %v11795_v52, %v13427_v4  ;;  %v7034_v45 = vsub.f32 %v2290_v6, %v13536_v27 }
 0x59f   :  { %7404 = vperm.xlu0 %11754, %v6033_v55  }
 0x5a0   :  { %6948 = vperm.xlu1 %11755, %v6031_v53   ;;  %v2293_v53 = vmax.f32 %v13158_v39, 0.0 }
 0x5e6   :  { %v8076_v22 = vpop.xlane.xlu0 %8075 }
 0x5e7   :  { %v8081_v25 = vrot.slane %v8076_v22, %v12989_v37  ;;  %v8085_v20 = vrot.slane %v8076_v22, %v12994_v57  ;;  %v8089_v29 = vrot.slane %v8076_v22, %v13105_v59  ;;  %v8093_v35 = vrot.slane %v8076_v22, %v13412_v56 }
 0x5e8   :  { %v2287_v56 = vmax.f32 %v13140_v33, 0.0  ;;  %v7035_v22 = vand.u32 4294901760, %v7034_v45 }
 0x5e9   :  { %11796 = vrcp.f32 %v8081_v25 }
 0x5ea   :  { %11798 = vrcp.f32 %v8085_v20  ;;  %v13485_v0 = vand.u32 4294901760, %v2287_v56  ;;  %v7036_v25 = vsub.f32 %v7034_v45, %v7035_v22 }
 0x5eb   :  { %11800 = vrcp.f32 %v8089_v29 }
 0x5ec   :  { %11802 = vrcp.f32 %v8093_v35  ;;  %v6578_v12 = vsub.f32 %v2287_v56, %v13485_v0  ;;  %v7037_v35 = vand.u32 4294901760, %v7036_v25 }
 0x5ee   :  { %v6579_v44 = vand.u32 4294901760, %v6578_v12 }
 0x5f3   :  { %v11797_v14 = vpop.eup %11796 }
 0x5f4   :  { %v11799_v48 = vpop.eup %11798  ;;  %v8099_v4 = vmul.f32 %v11797_v14, %v13434_v28 }
 0x5f5   :  { %v11801_v30 = vpop.eup %11800  ;;  %v8101_v26 = vmul.f32 %v11799_v48, %v13437_v2  ;;  %v2296_v48 = vmax.f32 %v13177_v5, 0.0 }
 0x5f6   :  { %v11803_v62 = vpop.eup %11802  ;;  %8108 = vperm.xlu1 %11755, %v8099_v4   ;;  %v8103_v37 = vmul.f32 %v11801_v30, %v13440_v61 }
 0x5f7   :  { %8564 = vperm.xlu0 %11754, %v8101_v26   ;;  %v8105_v57 = vmul.f32 %v11803_v62, %v13443_v32  ;;  %v8117_v4 = vand.u32 4294901760, %v2296_v48 }
 0x5f9   :  { %v13614_v30 = vsub.f32 %v2296_v48, %v8117_v4 }
 0x5fa   :  { %9020 = vperm.xlu1 %11755, %v8103_v37  }
 0x5fb   :  { %9476 = vperm.xlu0 %11754, %v8105_v57   ;;  %v8195_v62 = vand.u32 4294901760, %v13614_v30 }
 0x5fd   :  { %v8196_v37 = vsub.f32 %v13614_v30, %v8195_v62 }
 0x5ff   :  { %v8197_v57 = vand.u32 4294901760, %v8196_v37 }
 0x61a   :  { %v6037_v59 = vpop.permute.xlu0 %6036 }
 0x61b   :  { %v6493_v63 = vpop.permute.xlu1 %6492  ;;  %v6041_v60 = vrot.slane %v6037_v59, %v13393_v46  ;;  %v2299_v59 = vmax.f32 %v13171_v42, 0.0 }
 0x61c   :  { %v6497_v28 = vrot.slane %v6493_v63, %v13393_v46 }
 0x61d   :  { %v6042_v36 = vsel %vm5889_vm1, %v6041_v60, 0  ;;  %v8573_v56 = vand.u32 4294901760, %v2299_v59 }
 0x61e   :  { %v6498_v2 = vsel %vm5889_vm1, %v6497_v28, 0  ;;  %v13483_v54 = vand.u32 4294901760, %v6042_v36  ;;  %v7405_v49 = vpop.permute.xlu0 %7404 }
 0x61f   :  { %v13487_v61 = vand.u32 4294901760, %v6498_v2  ;;  %v6949_v32 = vpop.permute.xlu1 %6948  ;;  %v7409_v10 = vrot.slane %v7405_v49, %v13393_v46  ;;  %v13636_v60 = vsub.f32 %v2299_v59, %v8573_v56 }
 0x620   :  { %v6111_v58 = vsub.f32 %v6042_v36, %v13483_v54  ;;  %v6953_v33 = vrot.slane %v6949_v32, %v13393_v46  ;;  %10915 = vmatmul.mubr.f32.vlgmr.msra.gmra.mrb[24].mxu0 %v13483_v54  ;;  %v2302_v32 = vmax.f32 %v13189_v34, 0.0 }
 0x621   :  { %v13493_v23 = vsub.f32 %v6498_v2, %v13487_v61  ;;  %10923 = vmatpush3.msra.mxu0 %v13485_v0  ;;  %10924 = vmatprep.mubr.msk.f32.mxu0 %vm11943_vm0, %v14002_v21  ;;  %v7410_v24 = vsel %vm5889_vm1, %v7409_v10, 0 }
 0x622   :  { %v6112_v13 = vand.u32 4294901760, %v6111_v58  ;;  %v6954_v47 = vsel %vm5889_vm1, %v6953_v33, 0  ;;  %10932 = vmatprep.subr.mxu0 %v14002_v21  ;;  %v13528_v7 = vand.u32 4294901760, %v7410_v24 }
 0x623   :  { %v6568_v19 = vand.u32 4294901760, %v13493_v23  ;;  %v13504_v15 = vand.u32 4294901760, %v6954_v47 }
 0x624   :  { %v6113_v51 = vsub.f32 %v6111_v58, %v6112_v13  ;;  %v13545_v43 = vsub.f32 %v7410_v24, %v13528_v7 }
 0x625   :  { %v6569_v18 = vsub.f32 %v13493_v23, %v6568_v19  ;;  %v13510_v40 = vsub.f32 %v6954_v47, %v13504_v15  ;;  %v13652_v47 = vand.u32 4294901760, %v2302_v32 }
 0x626   :  { %v6114_v50 = vand.u32 4294901760, %v6113_v51  ;;  %v7480_v52 = vand.u32 4294901760, %v13545_v43 }
 0x627   :  { %v6570_v11 = vand.u32 4294901760, %v6569_v18  ;;  %v7024_v31 = vand.u32 4294901760, %v13510_v40  ;;  %v13659_v51 = vsub.f32 %v2302_v32, %v13652_v47 }
 0x628   :  { %10895 = vmatmul.mubr.f32.vlgmr.msra.gmra.mrb[16].mxu1 %v6114_v50  ;;  %v7481_v39 = vsub.f32 %v13545_v43, %v7480_v52 }
 0x629   :  { %10898 = vmatpush3.msra.mxu1 %v6125_v8  ;;  %10925 = vmatmul.mubr.f32.vlgmr.msra.gmra.mrb[26].mxu0 %v6570_v11  ;;  %v7025_v9 = vsub.f32 %v13510_v40, %v7024_v31  ;;  %v9107_v8 = vand.u32 4294901760, %v13659_v51 }
 0x62a   :  { %10933 = vmatpush3.msra.mxu0 %v6578_v12  ;;  %10899 = vmatprep.mubr.msk.f32.mxu1 %vm11943_vm0, %v14002_v21  ;;  %v7482_v20 = vand.u32 4294901760, %v7481_v39 }
 0x62b   :  { %10902 = vmatprep.subr.mxu1 %v14002_v21  ;;  %10934 = vmatprep.mubr.msk.f32.mxu0 %vm11943_vm0, %v14002_v21  ;;  %v7026_v1 = vand.u32 4294901760, %v7025_v9 }
 0x62c   :  { %10942 = vmatprep.subr.mxu0 %v14002_v21  ;;  %10900 = vmatmul.mubr.f32.vlgmr.msra.gmra.mrb[18].mxu1 %v13483_v54 }
 0x62d   :  { %10903 = vmatpush3.msra.mxu1 %v13366_v41  ;;  %10935 = vmatmul.mubr.f32.vlgmr.msra.gmra.mrb[28].mxu0 %v13493_v23  ;;  %v6580_v41 = vsub.f32 %v6578_v12, %v6579_v44 }
 0x62e   :  { %10943 = vmatpush3.msra.mxu0 %v6579_v44  ;;  %10904 = vmatprep.mubr.msk.f32.mxu1 %vm11943_vm0, %v14002_v21 }
 0x62f   :  { %10907 = vmatprep.subr.mxu1 %v14002_v21  ;;  %10944 = vmatprep.mubr.msk.f32.mxu0 %vm11943_vm0, %v14002_v21  ;;  %v6581_v55 = vand.u32 4294901760, %v6580_v41 }
 0x630   :  { %10952 = vmatprep.subr.mxu0 %v14002_v21  ;;  %10905 = vmatmul.mubr.f32.vlgmr.msra.gmra.mrb[20].mxu1 %v6111_v58 }
 0x631   :  { %10908 = vmatpush3.msra.mxu1 %v13358_v17  ;;  %10945 = vmatmul.mubr.f32.vlgmr.msra.gmra.mrb[30].mxu0 %v13487_v61 }
 0x632   :  { %10953 = vmatpush3.msra.mxu0 %v13536_v27  ;;  %10909 = vmatprep.mubr.msk.f32.mxu1 %vm11943_vm0, %v14002_v21 }
 0x633   :  { %10917 = vmatprep.subr.mxu1 %v14002_v21  ;;  %10954 = vmatprep.mubr.msk.f32.mxu0 %vm11943_vm0, %v14002_v21 }
 0x634   :  { %10962 = vmatprep.subr.mxu0 %v14002_v21  ;;  %10910 = vmatmul.mubr.f32.vlgmr.msra.gmra.mrb[22].mxu1 %v6112_v13 }
 0x635   :  { %10918 = vmatpush3.msra.mxu1 %v13358_v17  ;;  %10955 = vmatmul.mubr.f32.vlgmr.msra.gmra.mrb[32].mxu0 %v7026_v1  ;;  %v7413_v17 = vand.u32 4294901760, %v2293_v53 }
 0x636   :  { %10963 = vmatpush3.msra.mxu0 %v7034_v45  ;;  %10919 = vmatprep.mubr.msk.f32.mxu1 %vm11943_vm0, %v14002_v21 }
 0x637   :  { %10927 = vmatprep.subr.mxu1 %v14002_v21  ;;  %10964 = vmatprep.mubr.msk.f32.mxu0 %vm11943_vm0, %v14002_v21  ;;  %v7490_v29 = vsub.f32 %v2293_v53, %v7413_v17 }
 0x638   :  { %10972 = vmatprep.subr.mxu0 %v14002_v21  ;;  %10920 = vmatmul.mubr.f32.vlgmr.msra.gmra.mrb[24].mxu1 %v13483_v54 }
 0x639   :  { %10928 = vmatpush3.msra.mxu1 %v6581_v55  ;;  %10965 = vmatmul.mubr.f32.vlgmr.msra.gmra.mrb[34].mxu0 %v13510_v40  ;;  %v7491_v14 = vand.u32 4294901760, %v7490_v29  ;;  %v2305_v40 = vmax.f32 %v13185_v16, 0.0 }
 0x63a   :  { %10973 = vmatpush3.msra.mxu0 %v7035_v22  ;;  %10929 = vmatprep.mubr.msk.f32.mxu1 %vm11943_vm0, %v14002_v21 }
 0x63b   :  { %10937 = vmatprep.subr.mxu1 %v14002_v21  ;;  %10974 = vmatprep.mubr.msk.f32.mxu0 %vm11943_vm0, %v14002_v21  ;;  %v7492_v5 = vsub.f32 %v7490_v29, %v7491_v14  ;;  %v13678_v10 = vand.u32 4294901760, %v2305_v40 }
 0x63c   :  { %10982 = vmatprep.subr.mxu0 %v14002_v21  ;;  %10930 = vmatmul.mubr.f32.vlgmr.msra.gmra.mrb[26].mxu1 %v13487_v61 }
 0x63d   :  { %10938 = vmatpush3.msra.mxu1 %v13485_v0  ;;  %10975 = vmatmul.mubr.f32.vlgmr.msra.gmra.mrb[36].mxu0 %v13504_v15  ;;  %v7493_v26 = vand.u32 4294901760, %v7492_v5 }
 0x63e   :  { %10983 = vmatpush3.msra.mxu0 %v7413_v17  ;;  %10939 = vmatprep.mubr.msk.f32.mxu1 %vm11943_vm0, %v14002_v21 }
 0x63f   :  { %10947 = vmatprep.subr.mxu1 %v14002_v21  ;;  %10984 = vmatprep.mubr.msk.f32.mxu0 %vm11943_vm0, %v14002_v21 }
 0x640   :  { %10992 = vmatprep.subr.mxu0 %v14002_v21  ;;  %10940 = vmatmul.mubr.f32.vlgmr.msra.gmra.mrb[28].mxu1 %v6568_v19 }
 0x641   :  { %10948 = vmatpush3.msra.mxu1 %v13485_v0  ;;  %10985 = vmatmul.mubr.f32.vlgmr.msra.gmra.mrb[38].mxu0 %v7482_v20 }
 0x642   :  { %10993 = vmatpush3.msra.mxu0 %v7490_v29  ;;  %10949 = vmatprep.mubr.msk.f32.mxu1 %vm11943_vm0, %v14002_v21 }
 0x643   :  { %10957 = vmatprep.subr.mxu1 %v14002_v21  ;;  %10994 = vmatprep.mubr.msk.f32.mxu0 %vm11943_vm0, %v14002_v21 }
 0x644   :  { %11002 = vmatprep.subr.mxu0 %v14002_v21  ;;  %10950 = vmatmul.mubr.f32.vlgmr.msra.gmra.mrb[30].mxu1 %v13487_v61  ;;  %v8651_v61 = vand.u32 4294901760, %v13636_v60 }
 0x645   :  { %10958 = vmatpush3.msra.mxu1 %v7037_v35  ;;  %10995 = vmatmul.mubr.f32.vlgmr.msra.gmra.mrb[40].mxu0 %v13545_v43 }
 0x646   :  { %11003 = vmatpush3.msra.mxu0 %v7491_v14  ;;  %10959 = vmatprep.mubr.msk.f32.mxu1 %vm11943_vm0, %v14002_v21  ;;  %v8652_v13 = vsub.f32 %v13636_v60, %v8651_v61 }
 0x647   :  { %10967 = vmatprep.subr.mxu1 %v14002_v21  ;;  %11004 = vmatprep.mubr.msk.f32.mxu0 %vm11943_vm0, %v14002_v21 }
 0x648   :  { %11012 = vmatprep.subr.mxu0 %v14002_v21  ;;  %10960 = vmatmul.mubr.f32.vlgmr.msra.gmra.mrb[32].mxu1 %v13504_v15  ;;  %v8653_v18 = vand.u32 4294901760, %v8652_v13 }
 0x649   :  { %10968 = vmatpush3.msra.mxu1 %v13536_v27  ;;  %11005 = vmatmul.mubr.f32.vlgmr.msra.gmra.mrb[42].mxu0 %v13528_v7 }
 0x64a   :  { %11013 = vmatpush3.msra.mxu0 %v8117_v4  ;;  %10969 = vmatprep.mubr.msk.f32.mxu1 %vm11943_vm0, %v14002_v21 }
 0x64b   :  { %10977 = vmatprep.subr.mxu1 %v14002_v21  ;;  %11014 = vmatprep.mubr.msk.f32.mxu0 %vm11943_vm0, %v14002_v21 }
 0x64c   :  { %10970 = vmatmul.mubr.f32.vlgmr.msra.gmra.mrb[34].mxu1 %v7024_v31  ;;  %11022 = vmatprep.subr.mxu0 %v14002_v21  ;;  %v9108_v31 = vsub.f32 %v13659_v51, %v9107_v8 }
 0x64d   :  { %10978 = vmatpush3.msra.mxu1 %v13536_v27  ;;  %10979 = vmatprep.mubr.msk.f32.mxu1 %vm11943_vm0, %v14002_v21 }
 0x64e   :  { %10987 = vmatprep.subr.mxu1 %v14002_v21  ;;  %v9109_v27 = vand.u32 4294901760, %v9108_v31 }
 0x650   :  { %10980 = vmatmul.mubr.f32.vlgmr.msra.gmra.mrb[36].mxu1 %v13504_v15 }
 0x651   :  { %10988 = vmatpush3.msra.mxu1 %v7493_v26  ;;  %10989 = vmatprep.mubr.msk.f32.mxu1 %vm11943_vm0, %v14002_v21 }
 0x652   :  { %10997 = vmatprep.subr.mxu1 %v14002_v21 }
 0x654   :  { %10990 = vmatmul.mubr.f32.vlgmr.msra.gmra.mrb[38].mxu1 %v13528_v7 }
 0x655   :  { %10998 = vmatpush3.msra.mxu1 %v7413_v17  ;;  %10999 = vmatprep.mubr.msk.f32.mxu1 %vm11943_vm0, %v14002_v21 }
 0x656   :  { %11007 = vmatprep.subr.mxu1 %v14002_v21 }
 0x658   :  { %11000 = vmatmul.mubr.f32.vlgmr.msra.gmra.mrb[40].mxu1 %v7480_v52 }
 0x659   :  { %11008 = vmatpush3.msra.mxu1 %v7413_v17  ;;  %11009 = vmatprep.mubr.msk.f32.mxu1 %vm11943_vm0, %v14002_v21 }
 0x65a   :  { %11017 = vmatprep.subr.mxu1 %v14002_v21 }
 0x65c   :  { %11010 = vmatmul.mubr.f32.vlgmr.msra.gmra.mrb[42].mxu1 %v13528_v7  ;;  %v13691_v7 = vsub.f32 %v2305_v40, %v13678_v10 }
 0x65d   :  { %11018 = vmatpush3.msra.mxu1 %v8197_v57  ;;  %11019 = vmatprep.mubr.msk.f32.mxu1 %vm11943_vm0, %v14002_v21 }
 0x65e   :  { %11027 = vmatprep.subr.mxu1 %v14002_v21 }
 0x675   :  { %v8109_v63 = vpop.permute.xlu1 %8108 }
 0x676   :  { %v8113_v28 = vrot.slane %v8109_v63, %v13393_v46  ;;  %v8565_v36 = vpop.permute.xlu0 %8564 }
 0x677   :  { %v8569_v2 = vrot.slane %v8565_v36, %v13393_v46 }
 0x678   :  { %v8114_v54 = vsel %vm5889_vm1, %v8113_v28, 0 }
 0x679   :  { %v8182_v0 = vand.u32 4294901760, %v8114_v54  ;;  %v8570_v58 = vsel %vm5889_vm1, %v8569_v2, 0  ;;  %v9021_v34 = vpop.permute.xlu1 %9020 }
 0x67a   :  { %v13646_v42 = vand.u32 4294901760, %v8570_v58  ;;  %v9025_v49 = vrot.slane %v9021_v34, %v13393_v46  ;;  %v9477_v44 = vpop.permute.xlu0 %9476 }
 0x67b   :  { %v8183_v33 = vsub.f32 %v8114_v54, %v8182_v0  ;;  %11020 = vmatmul.mubr.f32.vlgmr.msra.gmra.mrb[44].mxu1 %v8182_v0  ;;  %v9481_v9 = vrot.slane %v9477_v44, %v13393_v46  ;;  %v9563_v46 = vand.u32 4294901760, %v13691_v7  ;;  %v11810_v44 = vld [vmem:[#allocation2] sm:$0xff] }
 0x67c   :  { %11028 = vmatpush3.msra.mxu1 %v8117_v4  ;;  %11029 = vmatprep.mubr.msk.f32.mxu1 %vm11943_vm0, %v14002_v21  ;;  %v8639_v19 = vsub.f32 %v8570_v58, %v13646_v42  ;;  %v9026_v11 = vsel %vm5889_vm1, %v9025_v49, 0  ;;  %v11809_v49 = vld [vmem:[#allocation2 + $0x10] sm:$0xff] }
 0x67d   :  { %11037 = vmatprep.subr.mxu1 %v14002_v21  ;;  %v8184_v23 = vand.u32 4294901760, %v8183_v33  ;;  %v13673_v12 = vand.u32 4294901760, %v9026_v11  ;;  %v9482_v43 = vsel %vm5889_vm1, %v9481_v9, 0  ;;  %v9564_v52 = vsub.f32 %v13691_v7, %v9563_v46 }
 0x67e   :  { %v8640_v50 = vand.u32 4294901760, %v8639_v19  ;;  %v9550_v1 = vand.u32 4294901760, %v9482_v43 }
 0x67f   :  { %11030 = vmatmul.mubr.f32.vlgmr.msra.gmra.mrb[46].mxu1 %v8184_v23  ;;  %v8185_v3 = vsub.f32 %v8183_v33, %v8184_v23  ;;  %v9095_v6 = vsub.f32 %v9026_v11, %v13673_v12  ;;  %v9565_v22 = vand.u32 4294901760, %v9564_v52 }
 0x680   :  { %11038 = vmatpush3.msra.mxu1 %v8117_v4  ;;  %11039 = vmatprep.mubr.msk.f32.mxu1 %vm11943_vm0, %v14002_v21  ;;  %v8641_v16 = vsub.f32 %v8639_v19, %v8640_v50  ;;  %v9551_v55 = vsub.f32 %v9482_v43, %v9550_v1 }
 0x681   :  { %11047 = vmatprep.subr.mxu1 %v14002_v21  ;;  %v8186_v15 = vand.u32 4294901760, %v8185_v3  ;;  %v9096_v41 = vand.u32 4294901760, %v9095_v6 }
 0x682   :  { %v8642_v24 = vand.u32 4294901760, %v8641_v16  ;;  %v9552_v39 = vand.u32 4294901760, %v9551_v55 }
 0x683   :  { %11015 = vmatmul.mubr.f32.vlgmr.msra.gmra.mrb[44].mxu0 %v8186_v15  ;;  %11040 = vmatmul.mubr.f32.vlgmr.msra.gmra.mrb[48].mxu1 %v8182_v0  ;;  %v9097_v45 = vsub.f32 %v9095_v6, %v9096_v41 }
 0x684   :  { %11023 = vmatpush3.msra.mxu0 %v13614_v30  ;;  %11048 = vmatpush3.msra.mxu1 %v8653_v18  ;;  %v9553_v17 = vsub.f32 %v9551_v55, %v9552_v39  ;;  %v7870_v18 = vrot.slane %v11809_v49, 4 }
 0x685   :  { %11024 = vmatprep.mubr.msk.f32.mxu0 %vm11943_vm0, %v14002_v21  ;;  %11032 = vmatprep.subr.mxu0 %v14002_v21  ;;  %v9098_v53 = vand.u32 4294901760, %v9097_v45 }
 0x686   :  { %11049 = vmatprep.mubr.msk.f32.mxu1 %vm11943_vm0, %v14002_v21  ;;  %11057 = vmatprep.subr.mxu1 %v14002_v21  ;;  %v9554_v25 = vand.u32 4294901760, %v9553_v17  ;;  %v7871_v31 = vadd.f32 %v11809_v49, %v7870_v18 }
 0x687   :  { %11025 = vmatmul.mubr.f32.vlgmr.msra.gmra.mrb[46].mxu0 %v8183_v33  ;;  %11050 = vmatmul.mubr.f32.vlgmr.msra.gmra.mrb[50].mxu1 %v13646_v42 }
 0x688   :  { %11033 = vmatpush3.msra.mxu0 %v8195_v62  ;;  %11058 = vmatpush3.msra.mxu1 %v8573_v56  ;;  %v7872_v52 = vrot.slane %v7871_v31, 2 }
 0x689   :  { %11034 = vmatprep.mubr.msk.f32.mxu0 %vm11943_vm0, %v14002_v21  ;;  %11042 = vmatprep.subr.mxu0 %v14002_v21 }
 0x68a   :  { %11059 = vmatprep.mubr.msk.f32.mxu1 %vm11943_vm0, %v14002_v21  ;;  %11067 = vmatprep.subr.mxu1 %v14002_v21 }
 0x68b   :  { %11035 = vmatmul.mubr.f32.vlgmr.msra.gmra.mrb[48].mxu0 %v8182_v0  ;;  %11060 = vmatmul.mubr.f32.vlgmr.msra.gmra.mrb[52].mxu1 %v8640_v50 }
 0x68c   :  { %11043 = vmatpush3.msra.mxu0 %v8573_v56  ;;  %11068 = vmatpush3.msra.mxu1 %v8573_v56 }
 0x68d   :  { %11044 = vmatprep.mubr.msk.f32.mxu0 %vm11943_vm0, %v14002_v21  ;;  %11052 = vmatprep.subr.mxu0 %v14002_v21 }
 0x68e   :  { %11069 = vmatprep.mubr.msk.f32.mxu1 %vm11943_vm0, %v14002_v21  ;;  %11077 = vmatprep.subr.mxu1 %v14002_v21 }
 0x68f   :  { %11045 = vmatmul.mubr.f32.vlgmr.msra.gmra.mrb[50].mxu0 %v8642_v24  ;;  %11070 = vmatmul.mubr.f32.vlgmr.msra.gmra.mrb[54].mxu1 %v13646_v42 }
 0x690   :  { %11053 = vmatpush3.msra.mxu0 %v13636_v60  ;;  %11078 = vmatpush3.msra.mxu1 %v9109_v27 }
 0x691   :  { %11054 = vmatprep.mubr.msk.f32.mxu0 %vm11943_vm0, %v14002_v21  ;;  %11062 = vmatprep.subr.mxu0 %v14002_v21 }
 0x692   :  { %11079 = vmatprep.mubr.msk.f32.mxu1 %vm11943_vm0, %v14002_v21  ;;  %11087 = vmatprep.subr.mxu1 %v14002_v21 }
 0x693   :  { %11055 = vmatmul.mubr.f32.vlgmr.msra.gmra.mrb[52].mxu0 %v8639_v19  ;;  %11080 = vmatmul.mubr.f32.vlgmr.msra.gmra.mrb[56].mxu1 %v13673_v12  ;;  %v11808_v19 = vld [vmem:[#allocation2 + $0x8] sm:$0xff] }
 0x694   :  { %11063 = vmatpush3.msra.mxu0 %v8651_v61  ;;  %11088 = vmatpush3.msra.mxu1 %v13652_v47  ;;  %v7864_v15 = vrot.slane %v11808_v19, 4 }
 0x695   :  { %11064 = vmatprep.mubr.msk.f32.mxu0 %vm11943_vm0, %v14002_v21  ;;  %11072 = vmatprep.subr.mxu0 %v14002_v21 }
 0x696   :  { %11089 = vmatprep.mubr.msk.f32.mxu1 %vm11943_vm0, %v14002_v21  ;;  %11097 = vmatprep.subr.mxu1 %v14002_v21  ;;  %v7865_v16 = vadd.f32 %v11808_v19, %v7864_v15 }
 0x697   :  { %11065 = vmatmul.mubr.f32.vlgmr.msra.gmra.mrb[54].mxu0 %v13646_v42  ;;  %11090 = vmatmul.mubr.f32.vlgmr.msra.gmra.mrb[58].mxu1 %v9096_v41 }
 0x698   :  { %11073 = vmatpush3.msra.mxu0 %v13652_v47  ;;  %11098 = vmatpush3.msra.mxu1 %v13652_v47 }
 0x699   :  { %11074 = vmatprep.mubr.msk.f32.mxu0 %vm11943_vm0, %v14002_v21  ;;  %11082 = vmatprep.subr.mxu0 %v14002_v21 }
 0x69a   :  { %11099 = vmatprep.mubr.msk.f32.mxu1 %vm11943_vm0, %v14002_v21  ;;  %11107 = vmatprep.subr.mxu1 %v14002_v21 }
 0x69b   :  { %11075 = vmatmul.mubr.f32.vlgmr.msra.gmra.mrb[56].mxu0 %v9098_v53  ;;  %11100 = vmatmul.mubr.f32.vlgmr.msra.gmra.mrb[60].mxu1 %v13673_v12 }
 0x69c   :  { %11083 = vmatpush3.msra.mxu0 %v13659_v51  ;;  %11108 = vmatpush3.msra.mxu1 %v9565_v22 }
 0x69d   :  { %11084 = vmatprep.mubr.msk.f32.mxu0 %vm11943_vm0, %v14002_v21  ;;  %11092 = vmatprep.subr.mxu0 %v14002_v21 }
 0x69e   :  { %11109 = vmatprep.mubr.msk.f32.mxu1 %vm11943_vm0, %v14002_v21  ;;  %11117 = vmatprep.subr.mxu1 %v14002_v21 }
 0x69f   :  { %11085 = vmatmul.mubr.f32.vlgmr.msra.gmra.mrb[58].mxu0 %v9095_v6  ;;  %11110 = vmatmul.mubr.f32.vlgmr.msra.gmra.mrb[62].mxu1 %v9550_v1  ;;  %v7858_v6 = vrot.slane %v11810_v44, 4 }
 0x6a0   :  { %11093 = vmatpush3.msra.mxu0 %v9107_v8  ;;  %11118 = vmatpush3.msra.mxu1 %v13678_v10 }
 0x6a1   :  { %11094 = vmatprep.mubr.msk.f32.mxu0 %vm11943_vm0, %v14002_v21  ;;  %11102 = vmatprep.subr.mxu0 %v14002_v21 }
 0x6a2   :  { %11119 = vmatprep.mubr.msk.f32.mxu1 %vm11943_vm0, %v14002_v21  ;;  %11127 = vmatprep.subr.mxu1 %v14002_v21 }
 0x6a3   :  { %11095 = vmatmul.mubr.f32.vlgmr.msra.gmra.mrb[60].mxu0 %v13673_v12  ;;  %11120 = vmatmul.mubr.f32.vlgmr.msra.gmra.mrb[64].mxu1 %v9552_v39 }
 0x6a4   :  { %11103 = vmatpush3.msra.mxu0 %v13678_v10  ;;  %11128 = vmatpush3.msra.mxu1 %v13678_v10 }
 0x6a5   :  { %11104 = vmatprep.mubr.msk.f32.mxu0 %vm11943_vm0, %v14002_v21  ;;  %11112 = vmatprep.subr.mxu0 %v14002_v21 }
 0x6a6   :  { %11129 = vmatprep.mubr.msk.f32.mxu1 %vm11943_vm0, %v14002_v21 }
 0x6a7   :  { %11105 = vmatmul.mubr.f32.vlgmr.msra.gmra.mrb[62].mxu0 %v9554_v25  ;;  %11130 = vmatmul.mubr.f32.vlgmr.msra.gmra.mrb[66].mxu1 %v9550_v1 }
 0x6a8   :  { %11113 = vmatpush3.msra.mxu0 %v13691_v7  ;;  %11114 = vmatprep.mubr.msk.f32.mxu0 %vm11943_vm0, %v14002_v21  ;;  %v11811_v7 = vld [vmem:[#allocation2 + $0x18] sm:$0xff] }
 0x6a9   :  { %11122 = vmatprep.subr.mxu0 %v14002_v21  ;;  %v7876_v9 = vrot.slane %v11811_v7, 4 }
 0x6ab   :  { %11115 = vmatmul.mubr.f32.vlgmr.msra.gmra.mrb[64].mxu0 %v9551_v55  ;;  %v7859_v55 = vadd.f32 %v11810_v44, %v7858_v6  ;;  %v7877_v53 = vadd.f32 %v11811_v7, %v7876_v9 }
 0x6ac   :  { %11123 = vmatpush3.msra.mxu0 %v9563_v46  ;;  %11124 = vmatprep.mubr.msk.f32.mxu0 %vm11943_vm0, %v14002_v21  ;;  %v7866_v46 = vrot.slane %v7865_v16, 2 }
 0x6ae   :  { %v7867_v39 = vadd.f32 %v7866_v46, %v7865_v16 }
 0x6af   :  { %11125 = vmatmul.mubr.f32.vlgmr.msra.gmra.mrb[66].mxu0 %v9550_v1 }
 0x6f3   :  { %v6414_v20 = vpop.f32.mrb[24].mxu0 }
 0x6f4   :  { %v10916_v29 = vpop.f32.mrb[25].mxu0 }
 0x6fb   :  { %v6116_v35 = vpop.f32.mrb[16].mxu1 }
 0x6fc   :  { %v6572_v14 = vpop.f32.mrb[26].mxu0  ;;  %v10896_v48 = vpop.f32.mrb[17].mxu1 }
 0x6fd   :  { %v10926_v4 = vpop.f32.mrb[27].mxu0 }
 0x6fe   :  { %v7878_v4 = vrot.slane %v7877_v53, 2 }
 0x6ff   :  { %v6192_v5 = vpop.f32.mrb[18].mxu1 }
 0x700   :  { %v6193_v30 = vadd.f32 %v6192_v5, %v6116_v35  ;;  %v6722_v26 = vpop.f32.mrb[28].mxu0  ;;  %v10901_v62 = vpop.f32.mrb[19].mxu1  ;;  %v7873_v35 = vadd.f32 %v7872_v52, %v7871_v31 }
 0x701   :  { %v10936_v37 = vpop.f32.mrb[29].mxu0 }
 0x702   :  { %v7874_v37 = vrot.slane %v7873_v35, 1 }
 0x703   :  { %v6266_v57 = vpop.f32.mrb[20].mxu1 }
 0x704   :  { %v6267_v59 = vadd.f32 %v6266_v57, %v6193_v30  ;;  %v6870_v56 = vpop.f32.mrb[30].mxu0  ;;  %v10906_v63 = vpop.f32.mrb[21].mxu1  ;;  %v7868_v30 = vrot.slane %v7867_v39, 1 }
 0x705   :  { %v10946_v60 = vpop.f32.mrb[31].mxu0 }
 0x706   :  { %v7869_v60 = vadd.f32 %v7868_v30, %v7867_v39 }
 0x707   :  { %v6340_v28 = vpop.f32.mrb[22].mxu1 }
 0x708   :  { %v6341_v36 = vadd.f32 %v6340_v28, %v6267_v59  ;;  %v7028_v2 = vpop.f32.mrb[32].mxu0  ;;  %v10911_v54 = vpop.f32.mrb[23].mxu1 }
 0x709   :  { %v10956_v0 = vpop.f32.mrb[33].mxu0 }
 0x70a   :  { %v6415_v61 = vadd.f32 %v6414_v20, %v6341_v36 }
 0x70b   :  { %v6486_v32 = vpop.f32.mrb[24].mxu1 }
 0x70c   :  { %v13758_v58 = vadd.f32 %v6486_v32, %v6415_v61  ;;  %v7178_v33 = vpop.f32.mrb[34].mxu0  ;;  %v10921_v42 = vpop.f32.mrb[25].mxu1  ;;  %v7883_v32 = vmul.f32 0.125, %v7869_v60 }
 0x70d   :  { %v10966_v23 = vpop.f32.mrb[35].mxu0 }
 0x70f   :  { %v6648_v13 = vpop.f32.mrb[26].mxu1 }
 0x710   :  { %v6649_v47 = vadd.f32 %v6648_v13, %v6572_v14  ;;  %v7326_v34 = vpop.f32.mrb[36].mxu0  ;;  %v10931_v3 = vpop.f32.mrb[27].mxu1  ;;  %v7860_v14 = vrot.slane %v7859_v55, 2 }
 0x711   :  { %v10976_v51 = vpop.f32.mrb[37].mxu0 }
 0x712   :  { %v6723_v50 = vadd.f32 %v6722_v26, %v6649_v47  ;;  %v7861_v57 = vadd.f32 %v7860_v14, %v7859_v55 }
 0x713   :  { %v6796_v40 = vpop.f32.mrb[28].mxu1 }
 0x714   :  { %v6797_v8 = vadd.f32 %v6796_v40, %v6723_v50  ;;  %v7484_v11 = vpop.f32.mrb[38].mxu0  ;;  %v10941_v12 = vpop.f32.mrb[29].mxu1  ;;  %v7862_v54 = vrot.slane %v7861_v57, 1 }
 0x715   :  { %v10986_v10 = vpop.f32.mrb[39].mxu0 }
 0x716   :  { %v6871_v24 = vadd.f32 %v6870_v56, %v6797_v8  ;;  %v7879_v56 = vadd.f32 %v7878_v4, %v7877_v53  ;;  %v7863_v13 = vadd.f32 %v7862_v54, %v7861_v57 }
 0x717   :  { %v6942_v27 = vpop.f32.mrb[30].mxu1 }
 0x718   :  { %v6943_v41 = vadd.f32 %v6942_v27, %v6871_v24  ;;  %v7634_v43 = vpop.f32.mrb[40].mxu0  ;;  %v10951_v1 = vpop.f32.mrb[31].mxu1  ;;  %v7880_v0 = vrot.slane %v7879_v56, 1  ;;  %v7882_v18 = vmul.f32 0.125, %v7863_v13 }
 0x719   :  { %v10996_v45 = vpop.f32.mrb[41].mxu0 }
 0x71a   :  { %v7881_v3 = vadd.f32 %v7880_v0, %v7879_v56  ;;  %v13760_v15 = vadd.f32 %v7883_v32, %v6943_v41  ;;  %v13767_v31 = vadd.f32 %v7882_v18, %v13758_v58  ;;  %v11812_v56 = vld [vmem:[#allocation2 + $0x28] sm:$0xff]  ;;  %v11815_v18 = vld [vmem:[#allocation2 + $0x38] sm:$0xff] }
 0x71b   :  { %v7104_v22 = vpop.f32.mrb[32].mxu1 }
 0x71c   :  { %v7105_v17 = vadd.f32 %v7104_v22, %v7028_v2  ;;  %v7782_v25 = vpop.f32.mrb[42].mxu0  ;;  %v10961_v20 = vpop.f32.mrb[33].mxu1  ;;  %v7875_v2 = vadd.f32 %v7874_v37, %v7873_v35  ;;  %v7885_v40 = vmul.f32 0.125, %v7881_v3  ;;  %v7894_v12 = vrot.slane %v13760_v15, 7 }
 0x71d   :  { %v11006_v29 = vpop.f32.mrb[43].mxu0 }
 0x71e   :  { %v7179_v48 = vadd.f32 %v7178_v33, %v7105_v17  ;;  %v7884_v23 = vmul.f32 0.125, %v7875_v2  ;;  %v7895_v24 = vsel %vm5922_vm2, %v7894_v12, %v13767_v31 }
 0x71f   :  { %v7252_v5 = vpop.f32.mrb[34].mxu1 }
 0x720   :  { %v7253_v26 = vadd.f32 %v7252_v5, %v7179_v48  ;;  %v10971_v62 = vpop.f32.mrb[35].mxu1 }
 0x722   :  { %v7327_v59 = vadd.f32 %v7326_v34, %v7253_v26 }
 0x723   :  { %v7398_v63 = vpop.f32.mrb[36].mxu1 }
 0x724   :  { %v7399_v28 = vadd.f32 %v7398_v63, %v7327_v59  ;;  %v10981_v36 = vpop.f32.mrb[37].mxu1  ;;  %v9936_v63 = vrot.slane %v11812_v56, 4 }
 0x725   :  { %v11813_v36 = vld [vmem:[#allocation2 + $0x30] sm:$0xff] }
 0x726   :  { %v13762_v49 = vadd.f32 %v7884_v23, %v7399_v28  ;;  %v9942_v2 = vrot.slane %v11813_v36, 4 }
 0x727   :  { %v7560_v61 = vpop.f32.mrb[38].mxu1 }
 0x728   :  { %v7561_v42 = vadd.f32 %v7560_v61, %v7484_v11  ;;  %v10991_v33 = vpop.f32.mrb[39].mxu1  ;;  %v7896_v10 = vrot.slane %v13762_v49, 6  ;;  %v9943_v13 = vadd.f32 %v11813_v36, %v9942_v2 }
 0x72a   :  { %v7635_v47 = vadd.f32 %v7634_v43, %v7561_v42  ;;  %v7897_v7 = vsel %vm5924_vm3, %v7896_v10, %v7895_v24  ;;  %v9937_v42 = vadd.f32 %v11812_v56, %v9936_v63 }
 0x72b   :  { %v7708_v19 = vpop.f32.mrb[40].mxu1 }
 0x72c   :  { %v7709_v34 = vadd.f32 %v7708_v19, %v7635_v47  ;;  %v11001_v51 = vpop.f32.mrb[41].mxu1  ;;  %v11814_v47 = vld [vmem:[#allocation2 + $0x20] sm:$0xff] }
 0x72d   :  { %v9930_v3 = vrot.slane %v11814_v47, 4 }
 0x72e   :  { %v7783_v50 = vadd.f32 %v7782_v25, %v7709_v34 }
 0x72f   :  { %v7854_v8 = vpop.f32.mrb[42].mxu1  ;;  %v9931_v10 = vadd.f32 %v11814_v47, %v9930_v3 }
 0x730   :  { %v7855_v16 = vadd.f32 %v7854_v8, %v7783_v50  ;;  %v11011_v11 = vpop.f32.mrb[43].mxu1  ;;  %v9948_v50 = vrot.slane %v11815_v18, 4  ;;  %v9938_v8 = vrot.slane %v9937_v42, 2 }
 0x731   :  { %v9944_v11 = vrot.slane %v9943_v13, 2 }
 0x732   :  { %v13769_v44 = vadd.f32 %v7885_v40, %v7855_v16 }
 0x734   :  { %v7898_v6 = vrot.slane %v13769_v44, 5 }
 0x736   :  { %v7899_v9 = vsel %vm5926_vm4, %v7898_v6, %v7897_v7 }
 0x737   :  { %v7902_v27 = vsel %vm7901_vm6, %v7899_v9, 0.0  ;;  %v9949_v9 = vadd.f32 %v11815_v18, %v9948_v50 }
 0x738   :  { %7903 = vadd.xlane.f32.xlu1 %v7902_v27  ;;  %v9939_v27 = vadd.f32 %v9938_v8, %v9937_v42 }
 0x74e   :  { %v8264_v41 = vpop.f32.mrb[44].mxu1 }
 0x74f   :  { %v11021_v46 = vpop.f32.mrb[45].mxu1 }
 0x752   :  { %v8412_v43 = vpop.f32.mrb[46].mxu1 }
 0x753   :  { %v11031_v58 = vpop.f32.mrb[47].mxu1 }
 0x754   :  { %v9932_v58 = vrot.slane %v9931_v10, 2 }
 0x756   :  { %v8188_v1 = vpop.f32.mrb[44].mxu0  ;;  %v8558_v45 = vpop.f32.mrb[48].mxu1 }
 0x757   :  { %v8265_v52 = vadd.f32 %v8264_v41, %v8188_v1  ;;  %v11016_v55 = vpop.f32.mrb[45].mxu0  ;;  %v11041_v53 = vpop.f32.mrb[49].mxu1 }
 0x758   :  { %v9950_v55 = vrot.slane %v9949_v9, 2  ;;  %v9940_v53 = vrot.slane %v9939_v27, 1 }
 0x75a   :  { %v8338_v22 = vpop.f32.mrb[46].mxu0  ;;  %v8720_v39 = vpop.f32.mrb[50].mxu1 }
 0x75b   :  { %v8339_v17 = vadd.f32 %v8338_v22, %v8265_v52  ;;  %v11026_v25 = vpop.f32.mrb[47].mxu0  ;;  %v11051_v20 = vpop.f32.mrb[51].mxu1 }
 0x75c   :  { %v9933_v20 = vadd.f32 %v9932_v58, %v9931_v10 }
 0x75d   :  { %v8413_v29 = vadd.f32 %v8412_v43, %v8339_v17  ;;  %v9945_v43 = vadd.f32 %v9944_v11, %v9943_v13 }
 0x75e   :  { %v8486_v35 = vpop.f32.mrb[48].mxu0  ;;  %v8868_v14 = vpop.f32.mrb[52].mxu1 }
 0x75f   :  { %v8487_v48 = vadd.f32 %v8486_v35, %v8413_v29  ;;  %v11036_v4 = vpop.f32.mrb[49].mxu0  ;;  %v11061_v5 = vpop.f32.mrb[53].mxu1  ;;  %v9946_v17 = vrot.slane %v9945_v43, 1 }
 0x760   :  { %v9941_v4 = vadd.f32 %v9940_v53, %v9939_v27 }
 0x761   :  { %v13777_v30 = vadd.f32 %v8558_v45, %v8487_v48  ;;  %v9951_v48 = vadd.f32 %v9950_v55, %v9949_v9  ;;  %v10049_v9 = vsel %vm5886_vm7, 1.0, %v14002_v21 }
 0x762   :  { %v8644_v26 = vpop.f32.mrb[50].mxu0  ;;  %v9014_v62 = vpop.f32.mrb[54].mxu1 }
 0x763   :  { %v8721_v37 = vadd.f32 %v8720_v39, %v8644_v26  ;;  %v11046_v57 = vpop.f32.mrb[51].mxu0  ;;  %v11071_v59 = vpop.f32.mrb[55].mxu1  ;;  %v9947_v26 = vadd.f32 %v9946_v17, %v9945_v43 }
 0x764   :  { %v9934_v57 = vrot.slane %v9933_v20, 1 }
 0x765   :  { %v9956_v36 = vmul.f32 0.125, %v9947_v26 }
 0x766   :  { %v8794_v60 = vpop.f32.mrb[52].mxu0  ;;  %v9176_v28 = vpop.f32.mrb[56].mxu1 }
 0x767   :  { %v8795_v54 = vadd.f32 %v8794_v60, %v8721_v37  ;;  %v11056_v0 = vpop.f32.mrb[53].mxu0  ;;  %v11081_v61 = vpop.f32.mrb[57].mxu1  ;;  %v9952_v60 = vrot.slane %v9951_v48, 1 }
 0x769   :  { %v8869_v32 = vadd.f32 %v8868_v14, %v8795_v54  ;;  %v9935_v54 = vadd.f32 %v9934_v57, %v9933_v20 }
 0x76a   :  { %v8942_v33 = vpop.f32.mrb[54].mxu0  ;;  %v9324_v23 = vpop.f32.mrb[58].mxu1 }
 0x76b   :  { %v8943_v19 = vadd.f32 %v8942_v33, %v8869_v32  ;;  %v11066_v34 = vpop.f32.mrb[55].mxu0  ;;  %v11091_v51 = vpop.f32.mrb[59].mxu1  ;;  %v9953_v32 = vadd.f32 %v9952_v60, %v9951_v48  ;;  %v9954_v47 = vmul.f32 0.125, %v9935_v54 }
 0x76d   :  { %v9015_v40 = vadd.f32 %v9014_v62, %v8943_v19  ;;  %v9957_v19 = vmul.f32 0.125, %v9953_v32  ;;  %v9958_v8 = vadd.f32 %v9954_v47, %v13777_v30 }
 0x76e   :  { %v9100_v12 = vpop.f32.mrb[56].mxu0  ;;  %v9470_v16 = vpop.f32.mrb[60].mxu1 }
 0x76f   :  { %v9177_v6 = vadd.f32 %v9176_v28, %v9100_v12  ;;  %v11076_v24 = vpop.f32.mrb[57].mxu0  ;;  %v11101_v7 = vpop.f32.mrb[61].mxu1  ;;  %v9955_v28 = vmul.f32 0.125, %v9941_v4 }
 0x771   :  { %v9959_v42 = vadd.f32 %v9955_v28, %v9015_v40 }
 0x772   :  { %v9250_v41 = vpop.f32.mrb[58].mxu0  ;;  %v9632_v46 = vpop.f32.mrb[62].mxu1 }
 0x773   :  { %v9251_v1 = vadd.f32 %v9250_v41, %v9177_v6  ;;  %v11086_v45 = vpop.f32.mrb[59].mxu0  ;;  %v11111_v52 = vpop.f32.mrb[63].mxu1  ;;  %v9966_v51 = vrot.slane %v9959_v42, 7 }
 0x775   :  { %v9325_v22 = vadd.f32 %v9324_v23, %v9251_v1 }
 0x776   :  { %v9398_v39 = vpop.f32.mrb[60].mxu0  ;;  %v9780_v25 = vpop.f32.mrb[64].mxu1 }
 0x777   :  { %v9399_v29 = vadd.f32 %v9398_v39, %v9325_v22  ;;  %v11096_v35 = vpop.f32.mrb[61].mxu0  ;;  %v11121_v14 = vpop.f32.mrb[65].mxu1 }
 0x779   :  { %v9471_v5 = vadd.f32 %v9470_v16, %v9399_v29  ;;  %v9967_v16 = vsel %vm5922_vm2, %v9966_v51, %v9958_v8 }
 0x77a   :  { %v9556_v62 = vpop.f32.mrb[62].mxu0  ;;  %v9926_v37 = vpop.f32.mrb[66].mxu1 }
 0x77b   :  { %v9633_v59 = vadd.f32 %v9632_v46, %v9556_v62  ;;  %v11106_v56 = vpop.f32.mrb[63].mxu0  ;;  %v11131_v63 = vpop.f32.mrb[67].mxu1  ;;  %v9960_v23 = vadd.f32 %v9956_v36, %v9471_v5 }
 0x77d   :  { %v9968_v50 = vrot.slane %v9960_v23, 6 }
 0x77e   :  { %v9706_v2 = vpop.f32.mrb[64].mxu0 }
 0x77f   :  { %v9707_v0 = vadd.f32 %v9706_v2, %v9633_v59  ;;  %v11116_v61 = vpop.f32.mrb[65].mxu0  ;;  %v9969_v10 = vsel %vm5924_vm3, %v9968_v50, %v9967_v16 }
 0x781   :  { %v9781_v33 = vadd.f32 %v9780_v25, %v9707_v0 }
 0x782   :  { %v9854_v13 = vpop.f32.mrb[66].mxu0 }
 0x783   :  { %v9855_v3 = vadd.f32 %v9854_v13, %v9781_v33  ;;  %v11126_v34 = vpop.f32.mrb[67].mxu0 }
 0x785   :  { %v9927_v18 = vadd.f32 %v9926_v37, %v9855_v3 }
 0x787   :  { %v9961_v12 = vadd.f32 %v9957_v19, %v9927_v18 }
 0x789   :  { %v9970_v11 = vrot.slane %v9961_v12, 5 }
 0x78b   :  { %v9971_v40 = vsel %vm5926_vm4, %v9970_v11, %v9969_v10 }
 0x78c   :  { %v9973_v6 = vsel %vm7901_vm6, %v9971_v40, 0.0 }
 0x78d   :  { %9974 = vadd.xlane.f32.xlu0 %v9973_v6 }
 0x7c5   :  { %v7904_v24 = vpop.xlane.xlu1 %7903 }
 0x7c6   :  { %v7905_v7 = vmul.f32 0.03125, %v7904_v24  ;;  %v10050_v24 = vld [vmem:[#allocation8] ss:$0 sm:$0xff] }
 0x7c8   :  { %v7907_v27 = vrot.slane %v7905_v7, 1  ;;  %v7908_v41 = vrot.slane %v7905_v7, 2  ;;  %v7909_v30 = vrot.slane %v7905_v7, 3  ;;  %v7914_v46 = vsub.f32 %v13767_v31, %v7905_v7 }
 0x7ca   :  { %v7915_v43 = vsub.f32 %v13760_v15, %v7907_v27  ;;  %v7916_v58 = vsub.f32 %v13762_v49, %v7908_v41  ;;  %v7917_v1 = vsub.f32 %v13769_v44, %v7909_v30  ;;  %v7918_v45 = vmul.f32 %v10049_v9, %v7914_v46  ;;  %v10051_v27 = vld [vmem:[#allocation8 + $0x1] ss:$0 sm:$0xff] }
 0x7cc   :  { %v7919_v52 = vmul.f32 %v10049_v9, %v7915_v43  ;;  %v7920_v55 = vmul.f32 %v10049_v9, %v7916_v58  ;;  %v7921_v53 = vmul.f32 %v10049_v9, %v7917_v1  ;;  %v7922_v21 = vmul.f32 %v7918_v45, %v7918_v45 }
 0x7ce   :  { %v7949_v38 = vrot.slane %v7919_v52, 7  ;;  %v7923_v22 = vmul.f32 %v7919_v52, %v7919_v52  ;;  %v7924_v39 = vmul.f32 %v7920_v55, %v7920_v55  ;;  %v7925_v17 = vmul.f32 %v7921_v53, %v7921_v53 }
 0x7cf   :  { %v7951_v25 = vrot.slane %v7920_v55, 6  ;;  %v7953_v35 = vrot.slane %v7921_v53, 5 }
 0x7d0   :  { %v7950_v20 = vsel %vm5922_vm2, %v7949_v38, %v7918_v45  ;;  %v7930_v29 = vrot.slane %v7923_v22, 7  ;;  %v7932_v31 = vrot.slane %v7924_v39, 6  ;;  %v7934_v44 = vrot.slane %v7925_v17, 5 }
 0x7d1   :  { %v7952_v15 = vsel %vm5924_vm3, %v7951_v25, %v7950_v20 }
 0x7d2   :  { %v7931_v49 = vsel %vm5922_vm2, %v7930_v29, %v7922_v21  ;;  %v7954_v14 = vsel %vm5926_vm4, %v7953_v35, %v7952_v15 }
 0x7d3   :  { %v7933_v48 = vsel %vm5924_vm3, %v7932_v31, %v7931_v49  ;;  %v7956_v7 = vmul.f32 %v10050_v24, %v7954_v14 }
 0x7d4   :  { %v7935_v4 = vsel %vm5926_vm4, %v7934_v44, %v7933_v48 }
 0x7d5   :  { %v7937_v5 = vsel %vm7901_vm6, %v7935_v4, 0.0 }
 0x7d6   :  { %7938 = vadd.xlane.f32.xlu0 %v7937_v5 }
 0x81a   :  { %v9975_v26 = vpop.xlane.xlu0 %9974 }
 0x81b   :  { %v9976_v62 = vmul.f32 0.03125, %v9975_v26 }
 0x81d   :  { %v9978_v37 = vrot.slane %v9976_v62, 1  ;;  %v9979_v57 = vrot.slane %v9976_v62, 2  ;;  %v9980_v59 = vrot.slane %v9976_v62, 3  ;;  %v9985_v56 = vsub.f32 %v9958_v8, %v9976_v62 }
 0x81f   :  { %v9986_v63 = vsub.f32 %v9959_v42, %v9978_v37  ;;  %v9987_v60 = vsub.f32 %v9960_v23, %v9979_v57  ;;  %v9988_v28 = vsub.f32 %v9961_v12, %v9980_v59  ;;  %v9989_v36 = vmul.f32 %v10049_v9, %v9985_v56 }
 0x821   :  { %v9990_v2 = vmul.f32 %v10049_v9, %v9986_v63  ;;  %v9991_v54 = vmul.f32 %v10049_v9, %v9987_v60  ;;  %v9992_v0 = vmul.f32 %v10049_v9, %v9988_v28  ;;  %v9993_v47 = vmul.f32 %v9989_v36, %v9989_v36 }
 0x823   :  { %v10016_v61 = vrot.slane %v9990_v2, 7  ;;  %v9994_v32 = vmul.f32 %v9990_v2, %v9990_v2  ;;  %v9995_v33 = vmul.f32 %v9991_v54, %v9991_v54  ;;  %v9996_v13 = vmul.f32 %v9992_v0, %v9992_v0 }
 0x824   :  { %v10018_v3 = vrot.slane %v9991_v54, 6  ;;  %v10020_v18 = vrot.slane %v9992_v0, 5 }
 0x825   :  { %v10017_v19 = vsel %vm5922_vm2, %v10016_v61, %v9989_v36  ;;  %v10001_v34 = vrot.slane %v9994_v32, 7  ;;  %v10003_v51 = vrot.slane %v9995_v33, 6  ;;  %v10005_v23 = vrot.slane %v9996_v13, 5 }
 0x826   :  { %v10019_v50 = vsel %vm5924_vm3, %v10018_v3, %v10017_v19 }
 0x827   :  { %v10002_v42 = vsel %vm5922_vm2, %v10001_v34, %v9993_v47  ;;  %v10021_v8 = vsel %vm5926_vm4, %v10020_v18, %v10019_v50 }
 0x828   :  { %v10004_v12 = vsel %vm5924_vm3, %v10003_v51, %v10002_v42  ;;  %v10023_v1 = vmul.f32 %v10050_v24, %v10021_v8 }
 0x829   :  { %v10006_v16 = vsel %vm5926_vm4, %v10005_v23, %v10004_v12 }
 0x82a   :  { %v10008_v11 = vsel %vm7901_vm6, %v10006_v16, 0.0 }
 0x82b   :  { %10009 = vadd.xlane.f32.xlu1 %v10008_v11 }
 0x863   :  { %v7939_v10 = vpop.xlane.xlu0 %7938 }
 0x864   :  { %v7940_v40 = vmul.f32 0.03125, %v7939_v10 }
 0x866   :  { %v7957_v6 = vadd.f32 1e-05, %v7940_v40 }
 0x868   :  { %11804 = vrsqrt.f32 %v7957_v6 }
 0x872   :  { %v11805_v9 = vpop.eup %11804 }
 0x873   :  { %v7959_v41 = vmul.f32 %v11805_v9, %v7956_v7 }
 0x875   :  { %v7964_v30 = vadd.f32 %v10051_v27, %v7959_v41 }
 0x877   :  { %7965 = vst [vmem:[#allocation10] sm:$0xf] %v7964_v30 }
 0x8b8   :  { %v10010_v46 = vpop.xlane.xlu1 %10009 }
 0x8b9   :  { %v10011_v43 = vmul.f32 0.03125, %v10010_v46 }
 0x8bb   :  { %v10024_v58 = vadd.f32 1e-05, %v10011_v43 }
 0x8bd   :  { %11806 = vrsqrt.f32 %v10024_v58 }
 0x8c7   :  { %v11807_v45 = vpop.eup %11806 }
 0x8c8   :  { %v10026_v52 = vmul.f32 %v11807_v45, %v10023_v1 }
 0x8ca   :  { %v10027_v55 = vadd.f32 %v10051_v27, %v10026_v52 }
 0x8cc   :  { %10029 = vst [vmem:[#allocation10 + $0x4] sm:$0xf] %v10027_v55 }
 0x8cd   :  { %11915 = shalt.err (!%p11912_p8)
}
 0x8ce   :  { %s11916_s16 = scalar_lea.hbm %s13820_s4, 128 }
 0x8cf   :  { %p11917_p9 = scmp.ne.s32.totalorder %s13820_s4, %s11916_s16  ;;  %p11920_p10 = scmp.lt.u32.totalorder %s11916_s16, %s13820_s4 }
 0x8d1   :  { %p11922_p11 = pnand %p11920_p10, %p11917_p9 }
 0x8d3   :  { %11925 = shalt.err (!%p11922_p11)
}
 0x8d4   :  { %s11946_s21 = smov 64   ;;  %s11947_s22 = smov 4  }
 0x8d5   :  { %10041 = dma.vmem_to_hbm [thread:$0]  %s10036_s1, 128, %s13820_s4, [#allocation4], %s11946_s21, %s11946_s21, %s11947_s22  }
 0x8d6   :  { %11932 = dma.done.wait [#allocation4], 128  }
 0x8d7   :  { %11933 = vsyncadd [#allocation4], 4294967168 }
 0x8d8   :  { %10045 = vsyncpa [#allocation3], 1 }
 0x8d9   :  { %10046 = vsyncpa [#allocation6], 1 }
 0x8da   :  { %10047 = vsyncpa [#allocation9], 1 }
 0x8db   :  { %10048 = vsyncpa [#allocation4], 1 }

</bundles_post_ra>
